<compile_context>
chip_gen: v7x
topology: tpu7x:2x2x1
jax: 0.10.0
libtpu: 0.0.40
codegen_flags: <defaults>
</compile_context>

<pallas_src>
import numpy as np
import jax
import jax.numpy as jnp
from jax.experimental import pallas as pl
from jax.experimental.pallas import tpu as pltpu

# (kernel-index, offset) pairs contributing to each of the two output phases
# (per spatial axis) of ConvTranspose2d(k=4, s=2, p=1); offset o means the
# contribution comes from input position (out_pos//2 + o - 1).
TAPS = {0: ((1, 1), (3, 0)), 1: ((0, 2), (2, 1))}

_EPS = 1e-5
_CPARAMS = pltpu.CompilerParams(vmem_limit_bytes=32 * 1024 * 1024)


def _vmem():
    return pl.BlockSpec(memory_space=pltpu.MemorySpace.VMEM)


# --------------------------------------------------------------------------
# In-kernel helpers.
# --------------------------------------------------------------------------
def _chan_dot(s, p_bf16):
    # f32-accurate per-channel reduce/broadcast of a (1, N) f32 stats row using
    # a hi/lo bf16 split (two exact bf16 MXU dots); p is a 0/1 matrix.
    s_hi = s.astype(jnp.bfloat16)
    s_lo = (s - s_hi.astype(jnp.float32)).astype(jnp.bfloat16)
    return (jnp.dot(s_hi, p_bf16, preferred_element_type=jnp.float32)
            + jnp.dot(s_lo, p_bf16, preferred_element_type=jnp.float32))


def _make_fused_kernel(B, layer_meta):
    inv_n_head = 1.0 / (16.0 * B)

    def kernel(*refs):
        it = iter(refs)
        zb_ref = next(it)
        wh_ref, ph_ref, gh_ref, bh_ref = next(it), next(it), next(it), next(it)
        per_layer = []
        for (_H, _W, _Cin, _Cout, has_bn) in layer_meta:
            t_ref = next(it)
            w_ref = next(it)
            if has_bn:
                per_layer.append((t_ref, w_ref, next(it), next(it), next(it)))
            else:
                per_layer.append((t_ref, w_ref, None, None, None))
        out_ref = next(it)

        # ---- head: ConvTranspose(nz+24 -> C1, 4, 1, 0) on 1x1 + BN + ReLU ----
        # zb rows are (ky, b) blocks, so one dot yields rows (ky, b), lanes (kx, c).
        y = jnp.dot(zb_ref[...].astype(jnp.bfloat16), wh_ref[...],
                    preferred_element_type=jnp.float32)                # (4B, 4*C1)
        s = jnp.sum(y, axis=0, keepdims=True) * inv_n_head
        mean = _chan_dot(s, ph_ref[...])
        d = y - mean
        sq = jnp.sum(d * d, axis=0, keepdims=True) * inv_n_head
        var = _chan_dot(sq, ph_ref[...])
        x = jnp.maximum(d * (jax.lax.rsqrt(var + _EPS) * gh_ref[...]) + bh_ref[...], 0.0)
        x = x.astype(jnp.bfloat16)                                     # rows (y,b)

        # ---- 4x ConvTranspose(4, 2, 1) (+ BN + ReLU | Tanh), all in VMEM ----
        for (H, W, _Cin, _Cout, has_bn), (t_ref, w_ref, p_ref, ga_ref, be_ref) \
                in zip(layer_meta, per_layer):
            inv_n = 1.0 / (4.0 * B * H * W)
            # Row-shifted tap slabs via 0/1 tap matrices (also undo the previous
            # layer's y-phase row packing and insert the zero boundary rows).
            slabs = [jnp.dot(t_ref[o], x, preferred_element_type=jnp.float32
                             ).astype(jnp.bfloat16) for o in range(3)]
            accs = []
            for py in (0, 1):
                (_, oa), (_, ob) = TAPS[py]
                lhs = jnp.concatenate([slabs[oa], slabs[ob]], axis=1)  # (M, 2L)
                accs.append(jnp.dot(lhs, w_ref[py],
                                    preferred_element_type=jnp.float32))
            if has_bn:
                s = (jnp.sum(accs[0], axis=0, keepdims=True)
                     + jnp.sum(accs[1], axis=0, keepdims=True)) * inv_n
                mean = _chan_dot(s, p_ref[...])
                d0 = accs[0] - mean
                d1 = accs[1] - mean
                sq = (jnp.sum(d0 * d0, axis=0, keepdims=True)
                      + jnp.sum(d1 * d1, axis=0, keepdims=True)) * inv_n
                var = _chan_dot(sq, p_ref[...])
                scale = jax.lax.rsqrt(var + _EPS) * ga_ref[...]
                a0 = jnp.maximum(d0 * scale + be_ref[...], 0.0)
                a1 = jnp.maximum(d1 * scale + be_ref[...], 0.0)
                # phase-packed inter-layer format: rows (py, b, y), bf16.
                x = jnp.concatenate([a0, a1], axis=0).astype(jnp.bfloat16)
            else:
                out_ref[0] = jnp.tanh(accs[0])
                out_ref[1] = jnp.tanh(accs[1])

    return kernel


# --------------------------------------------------------------------------
# One-time host-side parameter expansion (numpy) -> MXU-friendly layouts.
# --------------------------------------------------------------------------
def _shift_eye(W, off):
    S = np.zeros((W, W), np.float32)
    for xo in range(W):
        xi = xo + off - 1
        if 0 <= xi < W:
            S[xi, xo] = 1.0
    return S


def _kron_weights(w_t, W, in_lane_perm):
    """Per-output-y-phase folded kron weights: (2, 2*W*Cin, 2*W*Cout).

    Row order matches LHS = [slab_{oa} | slab_{ob}] (taps of TAPS[py]) with the
    incoming-activation lane permutation absorbed; output lanes are (px, x, c).
    """
    Cin, Cout = w_t.shape[0], w_t.shape[1]
    kron = np.zeros((4, W * Cin, 2 * W * Cout), np.float32)
    for ky in range(4):
        for px in (0, 1):
            blk = np.zeros((W * Cin, W * Cout), np.float32)
            for kx, ox in TAPS[px]:
                blk += np.kron(_shift_eye(W, ox), w_t[:, :, ky, kx])
            kron[ky, :, px * W * Cout:(px + 1) * W * Cout] = blk
    kron = kron[:, in_lane_perm, :]     # incoming lane l -> natural (x, c) row
    ws = []
    for py in (0, 1):
        (ka, _), (kb, _) = TAPS[py]
        ws.append(np.concatenate([kron[ka], kron[kb]], axis=0))
    return np.stack(ws)


def _phase_lane_perm(W, Cin):
    # incoming lanes are (px, w_prev, c) with x = 2*w_prev + px -> natural (x, c)
    Wp = W // 2
    idx = np.zeros((W * Cin,), np.int64)
    for px in (0, 1):
        for wp in range(Wp):
            for ci in range(Cin):
                idx[px * (Wp * Cin) + wp * Cin + ci] = (2 * wp + px) * Cin + ci
    return idx


def _t_matrices(B, H, col_b, col_y):
    # T[o, b*H + y, col] = 1  iff incoming row `col` is (b, y + o - 1)
    M = B * H
    T = np.zeros((3, M, M), np.float32)
    for o in range(3):
        for col in range(M):
            yo = int(col_y[col]) - (o - 1)
            if 0 <= yo < H:
                T[o, int(col_b[col]) * H + yo, col] = 1.0
    return T


def _row_map_from_head(B):
    cols = np.arange(4 * B)
    return cols % B, cols // B


def _row_map_from_phase(B, H):
    Hp = H // 2
    cols = np.arange(B * H)
    py = cols // (B * Hp)
    rem = cols % (B * Hp)
    return rem // Hp, 2 * (rem % Hp) + py


def prepare_inputs(params, B):
    """Expand torch-layout parameters into the fused kernel's operand list."""
    w0, g0, b0 = params[0]
    w0 = np.asarray(w0)
    nzc, C1 = w0.shape[0], w0.shape[1]
    # head RHS: rows (ky, ci), cols (kx, co); LHS z is replicated per-ky block.
    w_head = np.transpose(w0, (2, 0, 3, 1)).reshape(4 * nzc, 4 * C1)
    p_head = np.tile(np.eye(C1, dtype=np.float32), (4, 4))
    operands = [
        jnp.asarray(w_head, jnp.bfloat16),
        jnp.asarray(p_head, jnp.bfloat16),
        jnp.asarray(np.tile(np.asarray(g0), 4).reshape(1, 4 * C1), jnp.float32),
        jnp.asarray(np.tile(np.asarray(b0), 4).reshape(1, 4 * C1), jnp.float32),
    ]

    layer_meta = []
    W = 4
    for i in range(1, 5):
        w_t, gamma, beta = params[i]
        w_np = np.asarray(w_t)
        Cin, Cout = w_np.shape[0], w_np.shape[1]
        has_bn = i < 4
        if not has_bn and Cout < 4:
            # pad output channels to 4 -> lane-dense (256-lane) final output
            w_np = np.concatenate(
                [w_np, np.zeros((Cin, 4 - Cout, 4, 4), w_np.dtype)], axis=1)
            Cout = 4
        H = W
        if i == 1:
            col_b, col_y = _row_map_from_head(B)
            lane_perm = np.arange(W * Cin)
        else:
            col_b, col_y = _row_map_from_phase(B, H)
            lane_perm = _phase_lane_perm(W, Cin)
        operands.append(jnp.asarray(_t_matrices(B, H, col_b, col_y), jnp.bfloat16))
        operands.append(jnp.asarray(_kron_weights(w_np, W, lane_perm), jnp.bfloat16))
        if has_bn:
            P = np.tile(np.eye(Cout, dtype=np.float32), (2 * W, 2 * W))
            operands.append(jnp.asarray(P, jnp.bfloat16))
            operands.append(jnp.asarray(
                np.tile(np.asarray(gamma), 2 * W).reshape(1, -1), jnp.float32))
            operands.append(jnp.asarray(
                np.tile(np.asarray(beta), 2 * W).reshape(1, -1), jnp.float32))
        layer_meta.append((H, W, Cin, Cout, has_bn))
        W *= 2
    return operands, layer_meta, C1


# --------------------------------------------------------------------------
# Build the fused forward (PyTorch-equivalent), NCHW in / NCHW out.
# --------------------------------------------------------------------------
def build_generator(params, B):
    operands, layer_meta, _ = prepare_inputs(params, B)
    Wlast, Clast = layer_meta[-1][1], layer_meta[-1][3]
    nc = np.asarray(params[-1][0]).shape[1]
    kernel = _make_fused_kernel(B, layer_meta)

    fused = pl.pallas_call(
        kernel,
        out_shape=jax.ShapeDtypeStruct((2, B * Wlast, 2 * Wlast * Clast), jnp.float32),
        in_specs=[_vmem()] * (1 + len(operands)),
        out_specs=_vmem(),
        compiler_params=_CPARAMS,
    )
    eye4 = jnp.eye(4, dtype=jnp.float32)

    def forward(x, cond):
        z = jnp.concatenate([x.reshape(B, -1), cond.reshape(B, -1)], axis=1)
        z_blk = jnp.kron(eye4, z)                    # (4B, 4*(nz+24)) block rows
        out = fused(z_blk, *operands)                # (2, B*32, 2*32*Clast)
        # single final de-interleave: rows (py, b, y), lanes (px, x, c) -> NCHW
        img = out.reshape(2, B, Wlast, 2, Wlast, Clast)
        img = img.transpose(1, 5, 2, 0, 4, 3).reshape(B, Clast, 2 * Wlast, 2 * Wlast)
        return img[:, :nc]

    return jax.jit(forward)


# --------------------------------------------------------------------------
# Deterministic parameter init (shapes follow the nn.Module's __init__).
# --------------------------------------------------------------------------
def init_params(key, nz, ngf, nc):
    dims = [(nz + 24, ngf * 8), (ngf * 8, ngf * 4), (ngf * 4, ngf * 2),
            (ngf * 2, ngf), (ngf, nc)]
    params = []
    for cin, cout in dims:
        key, k1, k2, k3 = jax.random.split(key, 4)
        w = 0.1 * jax.random.normal(k1, (cin, cout, 4, 4), jnp.float32)  # torch layout
        gamma = 1.0 + 0.1 * jax.random.normal(k2, (cout,), jnp.float32)
        beta = 0.1 * jax.random.normal(k3, (cout,), jnp.float32)
        params.append((w, gamma, beta))
    return params


# --------------------------------------------------------------------------
# Pure-JAX reference (XLA conv) used to verify the Pallas kernel.
# --------------------------------------------------------------------------
def _conv_transpose_nchw(x, w_t, stride, pad):
    k = w_t.shape[2]
    w_conv = jnp.transpose(w_t[:, :, ::-1, ::-1], (1, 0, 2, 3))
    return jax.lax.conv_general_dilated(
        x, w_conv, window_strides=(1, 1),
        padding=[(k - 1 - pad, k - 1 - pad)] * 2,
        lhs_dilation=(stride, stride),
        dimension_numbers=("NCHW", "OIHW", "NCHW"))


def generator_ref(x, cond, params):
    B = x.shape[0]
    h = jnp.concatenate([x, cond.reshape(B, -1, 1, 1)], axis=1)
    strides_pads = [(1, 0), (2, 1), (2, 1), (2, 1), (2, 1)]
    for i, (s, p) in enumerate(strides_pads):
        w_t, gamma, beta = params[i]
        h = _conv_transpose_nchw(h, w_t, s, p)
        if i < 4:
            mean = jnp.mean(h, axis=(0, 2, 3), keepdims=True)
            var = jnp.mean((h - mean) ** 2, axis=(0, 2, 3), keepdims=True)
            h = (h - mean) * jax.lax.rsqrt(var + _EPS)
            h = h * gamma.reshape(1, -1, 1, 1) + beta.reshape(1, -1, 1, 1)
            h = jnp.maximum(h, 0.0)
        else:
            h = jnp.tanh(h)
    return h


if __name__ == "__main__":
    B, nz, ngf, nc = 2, 16, 8, 3          # small shapes; condition dim fixed at 24
    key = jax.random.PRNGKey(0)
    kx_, kc_, kp_ = jax.random.split(key, 3)
    x = jax.random.normal(kx_, (B, nz, 1, 1), jnp.float32)
    cond = jax.random.normal(kc_, (B, 24), jnp.float32)
    params = init_params(kp_, nz, ngf, nc)

    fwd = build_generator(params, B)      # one-time weight expansion, fused kernel
    out = jax.block_until_ready(fwd(x, cond))
    assert out.shape == (B, nc, 64, 64), out.shape

    # Reference uses the same bf16-rounded weights the kernel consumes.
    params_ref = [(w.astype(jnp.bfloat16).astype(jnp.float32), g, b)
                  for (w, g, b) in params]
    ref = generator_ref(x, cond, params_ref)
    err = float(jnp.max(jnp.abs(out - ref)))
    # bf16 MXU operands/activations vs the f32 XLA reference (~1e-2 typical).
    assert err < 5e-2, f"max abs diff vs reference: {err}"
    print("KERNEL_OK")
</pallas_src>

<mosaic_0001>
module attributes {stable_mosaic.version = 11 : i64} {
  func.func @kernel(%arg0: memref<8x160xf32, #tpu.memory_space<vmem>>, %arg1: memref<160x256xbf16, #tpu.memory_space<vmem>>, %arg2: memref<256x256xbf16, #tpu.memory_space<vmem>>, %arg3: memref<1x256xf32, #tpu.memory_space<vmem>>, %arg4: memref<1x256xf32, #tpu.memory_space<vmem>>, %arg5: memref<3x8x8xbf16, #tpu.memory_space<vmem>>, %arg6: memref<2x512x256xbf16, #tpu.memory_space<vmem>>, %arg7: memref<256x256xbf16, #tpu.memory_space<vmem>>, %arg8: memref<1x256xf32, #tpu.memory_space<vmem>>, %arg9: memref<1x256xf32, #tpu.memory_space<vmem>>, %arg10: memref<3x16x16xbf16, #tpu.memory_space<vmem>>, %arg11: memref<2x512x256xbf16, #tpu.memory_space<vmem>>, %arg12: memref<256x256xbf16, #tpu.memory_space<vmem>>, %arg13: memref<1x256xf32, #tpu.memory_space<vmem>>, %arg14: memref<1x256xf32, #tpu.memory_space<vmem>>, %arg15: memref<3x32x32xbf16, #tpu.memory_space<vmem>>, %arg16: memref<2x512x256xbf16, #tpu.memory_space<vmem>>, %arg17: memref<256x256xbf16, #tpu.memory_space<vmem>>, %arg18: memref<1x256xf32, #tpu.memory_space<vmem>>, %arg19: memref<1x256xf32, #tpu.memory_space<vmem>>, %arg20: memref<3x64x64xbf16, #tpu.memory_space<vmem>>, %arg21: memref<2x512x256xbf16, #tpu.memory_space<vmem>>, %arg22: memref<2x64x256xf32, #tpu.memory_space<vmem>>) attributes {dimension_semantics = [], scalar_prefetch = 0 : i64, scratch_operands = 0 : i64, tpu.core_type = #tpu.core_type<tc>} {
    %c0 = arith.constant 0 : index
    %c0_0 = arith.constant 0 : index
    %0 = vector.load %arg0[%c0, %c0_0] : memref<8x160xf32, #tpu.memory_space<vmem>>, vector<8x160xf32>
    %1 = arith.truncf %0 : vector<8x160xf32> to vector<8x160xbf16>
    %c0_1 = arith.constant 0 : index
    %c0_2 = arith.constant 0 : index
    %2 = vector.load %arg1[%c0_1, %c0_2] : memref<160x256xbf16, #tpu.memory_space<vmem>>, vector<160x256xbf16>
    %cst = arith.constant dense<0.000000e+00> : vector<8x256xf32>
    %3 = tpu.matmul %1, %2, %cst {dimension_numbers = #tpu.dot_dimension_numbers<[1], [0], [0], [1], [0, 0, 1, 1], [], []>} : vector<8x160xbf16>, vector<160x256xbf16>, vector<8x256xf32> -> vector<8x256xf32>
    %cst_3 = arith.constant dense<0.000000e+00> : vector<256xf32>
    %4 = vector.multi_reduction <add>, %3, %cst_3 [0] : vector<8x256xf32> to vector<256xf32>
    %5 = vector.shape_cast %4 : vector<256xf32> to vector<1x256xf32>
    %cst_4 = arith.constant 3.125000e-02 : f32
    %6 = vector.broadcast %cst_4 : f32 to vector<1x256xf32>
    %7 = arith.mulf %5, %6 : vector<1x256xf32>
    %c0_5 = arith.constant 0 : index
    %c0_6 = arith.constant 0 : index
    %8 = vector.load %arg2[%c0_5, %c0_6] : memref<256x256xbf16, #tpu.memory_space<vmem>>, vector<256x256xbf16>
    %9 = arith.truncf %7 : vector<1x256xf32> to vector<1x256xbf16>
    %10 = arith.extf %9 : vector<1x256xbf16> to vector<1x256xf32>
    %11 = arith.subf %7, %10 : vector<1x256xf32>
    %12 = arith.truncf %11 : vector<1x256xf32> to vector<1x256xbf16>
    %cst_7 = arith.constant dense<0.000000e+00> : vector<1x256xf32>
    %13 = tpu.matmul %9, %8, %cst_7 {dimension_numbers = #tpu.dot_dimension_numbers<[1], [0], [0], [1], [0, 0, 1, 1], [], []>} : vector<1x256xbf16>, vector<256x256xbf16>, vector<1x256xf32> -> vector<1x256xf32>
    %cst_8 = arith.constant dense<0.000000e+00> : vector<1x256xf32>
    %14 = tpu.matmul %12, %8, %cst_8 {dimension_numbers = #tpu.dot_dimension_numbers<[1], [0], [0], [1], [0, 0, 1, 1], [], []>} : vector<1x256xbf16>, vector<256x256xbf16>, vector<1x256xf32> -> vector<1x256xf32>
    %15 = arith.addf %13, %14 : vector<1x256xf32>
    %16 = vector.broadcast %15 : vector<1x256xf32> to vector<8x256xf32>
    %17 = arith.subf %3, %16 : vector<8x256xf32>
    %18 = arith.mulf %17, %17 : vector<8x256xf32>
    %cst_9 = arith.constant dense<0.000000e+00> : vector<256xf32>
    %19 = vector.multi_reduction <add>, %18, %cst_9 [0] : vector<8x256xf32> to vector<256xf32>
    %20 = vector.shape_cast %19 : vector<256xf32> to vector<1x256xf32>
    %cst_10 = arith.constant 3.125000e-02 : f32
    %21 = vector.broadcast %cst_10 : f32 to vector<1x256xf32>
    %22 = arith.mulf %20, %21 : vector<1x256xf32>
    %c0_11 = arith.constant 0 : index
    %c0_12 = arith.constant 0 : index
    %23 = vector.load %arg2[%c0_11, %c0_12] : memref<256x256xbf16, #tpu.memory_space<vmem>>, vector<256x256xbf16>
    %24 = arith.truncf %22 : vector<1x256xf32> to vector<1x256xbf16>
    %25 = arith.extf %24 : vector<1x256xbf16> to vector<1x256xf32>
    %26 = arith.subf %22, %25 : vector<1x256xf32>
    %27 = arith.truncf %26 : vector<1x256xf32> to vector<1x256xbf16>
    %cst_13 = arith.constant dense<0.000000e+00> : vector<1x256xf32>
    %28 = tpu.matmul %24, %23, %cst_13 {dimension_numbers = #tpu.dot_dimension_numbers<[1], [0], [0], [1], [0, 0, 1, 1], [], []>} : vector<1x256xbf16>, vector<256x256xbf16>, vector<1x256xf32> -> vector<1x256xf32>
    %cst_14 = arith.constant dense<0.000000e+00> : vector<1x256xf32>
    %29 = tpu.matmul %27, %23, %cst_14 {dimension_numbers = #tpu.dot_dimension_numbers<[1], [0], [0], [1], [0, 0, 1, 1], [], []>} : vector<1x256xbf16>, vector<256x256xbf16>, vector<1x256xf32> -> vector<1x256xf32>
    %30 = arith.addf %28, %29 : vector<1x256xf32>
    %cst_15 = arith.constant 9.99999974E-6 : f32
    %31 = vector.broadcast %cst_15 : f32 to vector<1x256xf32>
    %32 = arith.addf %30, %31 : vector<1x256xf32>
    %33 = math.rsqrt %32 : vector<1x256xf32>
    %c0_16 = arith.constant 0 : index
    %c0_17 = arith.constant 0 : index
    %34 = vector.load %arg3[%c0_16, %c0_17] : memref<1x256xf32, #tpu.memory_space<vmem>>, vector<1x256xf32>
    %35 = arith.mulf %33, %34 : vector<1x256xf32>
    %36 = vector.broadcast %35 : vector<1x256xf32> to vector<8x256xf32>
    %37 = arith.mulf %17, %36 : vector<8x256xf32>
    %c0_18 = arith.constant 0 : index
    %c0_19 = arith.constant 0 : index
    %38 = vector.load %arg4[%c0_18, %c0_19] : memref<1x256xf32, #tpu.memory_space<vmem>>, vector<1x256xf32>
    %39 = vector.broadcast %38 : vector<1x256xf32> to vector<8x256xf32>
    %40 = arith.addf %37, %39 : vector<8x256xf32>
    %cst_20 = arith.constant 0.000000e+00 : f32
    %41 = vector.broadcast %cst_20 : f32 to vector<8x256xf32>
    %42 = arith.maximumf %40, %41 : vector<8x256xf32>
    %43 = arith.truncf %42 : vector<8x256xf32> to vector<8x256xbf16>
    %c0_21 = arith.constant 0 : index
    %c0_22 = arith.constant 0 : index
    %c0_23 = arith.constant 0 : index
    %44 = vector.load %arg5[%c0_21, %c0_22, %c0_23] : memref<3x8x8xbf16, #tpu.memory_space<vmem>>, vector<1x8x8xbf16>
    %45 = vector.shape_cast %44 : vector<1x8x8xbf16> to vector<8x8xbf16>
    %cst_24 = arith.constant dense<0.000000e+00> : vector<8x256xf32>
    %46 = tpu.matmul %45, %43, %cst_24 {dimension_numbers = #tpu.dot_dimension_numbers<[1], [0], [0], [1], [0, 0, 1, 1], [], []>} : vector<8x8xbf16>, vector<8x256xbf16>, vector<8x256xf32> -> vector<8x256xf32>
    %47 = arith.truncf %46 : vector<8x256xf32> to vector<8x256xbf16>
    %c1 = arith.constant 1 : index
    %c0_25 = arith.constant 0 : index
    %c0_26 = arith.constant 0 : index
    %48 = vector.load %arg5[%c1, %c0_25, %c0_26] : memref<3x8x8xbf16, #tpu.memory_space<vmem>>, vector<1x8x8xbf16>
    %49 = vector.shape_cast %48 : vector<1x8x8xbf16> to vector<8x8xbf16>
    %cst_27 = arith.constant dense<0.000000e+00> : vector<8x256xf32>
    %50 = tpu.matmul %49, %43, %cst_27 {dimension_numbers = #tpu.dot_dimension_numbers<[1], [0], [0], [1], [0, 0, 1, 1], [], []>} : vector<8x8xbf16>, vector<8x256xbf16>, vector<8x256xf32> -> vector<8x256xf32>
    %51 = arith.truncf %50 : vector<8x256xf32> to vector<8x256xbf16>
    %c2 = arith.constant 2 : index
    %c0_28 = arith.constant 0 : index
    %c0_29 = arith.constant 0 : index
    %52 = vector.load %arg5[%c2, %c0_28, %c0_29] : memref<3x8x8xbf16, #tpu.memory_space<vmem>>, vector<1x8x8xbf16>
    %53 = vector.shape_cast %52 : vector<1x8x8xbf16> to vector<8x8xbf16>
    %cst_30 = arith.constant dense<0.000000e+00> : vector<8x256xf32>
    %54 = tpu.matmul %53, %43, %cst_30 {dimension_numbers = #tpu.dot_dimension_numbers<[1], [0], [0], [1], [0, 0, 1, 1], [], []>} : vector<8x8xbf16>, vector<8x256xbf16>, vector<8x256xf32> -> vector<8x256xf32>
    %55 = arith.truncf %54 : vector<8x256xf32> to vector<8x256xbf16>
    %56 = tpu.concatenate %51, %47 in 1 : vector<8x256xbf16>, vector<8x256xbf16> -> vector<8x512xbf16>
    %c0_31 = arith.constant 0 : index
    %c0_32 = arith.constant 0 : index
    %c0_33 = arith.constant 0 : index
    %57 = vector.load %arg6[%c0_31, %c0_32, %c0_33] : memref<2x512x256xbf16, #tpu.memory_space<vmem>>, vector<1x512x256xbf16>
    %58 = vector.shape_cast %57 : vector<1x512x256xbf16> to vector<512x256xbf16>
    %cst_34 = arith.constant dense<0.000000e+00> : vector<8x256xf32>
    %59 = tpu.matmul %56, %58, %cst_34 {dimension_numbers = #tpu.dot_dimension_numbers<[1], [0], [0], [1], [0, 0, 1, 1], [], []>} : vector<8x512xbf16>, vector<512x256xbf16>, vector<8x256xf32> -> vector<8x256xf32>
    %60 = tpu.concatenate %55, %51 in 1 : vector<8x256xbf16>, vector<8x256xbf16> -> vector<8x512xbf16>
    %c1_35 = arith.constant 1 : index
    %c0_36 = arith.constant 0 : index
    %c0_37 = arith.constant 0 : index
    %61 = vector.load %arg6[%c1_35, %c0_36, %c0_37] : memref<2x512x256xbf16, #tpu.memory_space<vmem>>, vector<1x512x256xbf16>
    %62 = vector.shape_cast %61 : vector<1x512x256xbf16> to vector<512x256xbf16>
    %cst_38 = arith.constant dense<0.000000e+00> : vector<8x256xf32>
    %63 = tpu.matmul %60, %62, %cst_38 {dimension_numbers = #tpu.dot_dimension_numbers<[1], [0], [0], [1], [0, 0, 1, 1], [], []>} : vector<8x512xbf16>, vector<512x256xbf16>, vector<8x256xf32> -> vector<8x256xf32>
    %cst_39 = arith.constant dense<0.000000e+00> : vector<256xf32>
    %64 = vector.multi_reduction <add>, %59, %cst_39 [0] : vector<8x256xf32> to vector<256xf32>
    %65 = vector.shape_cast %64 : vector<256xf32> to vector<1x256xf32>
    %cst_40 = arith.constant dense<0.000000e+00> : vector<256xf32>
    %66 = vector.multi_reduction <add>, %63, %cst_40 [0] : vector<8x256xf32> to vector<256xf32>
    %67 = vector.shape_cast %66 : vector<256xf32> to vector<1x256xf32>
    %68 = arith.addf %65, %67 : vector<1x256xf32>
    %cst_41 = arith.constant 7.812500e-03 : f32
    %69 = vector.broadcast %cst_41 : f32 to vector<1x256xf32>
    %70 = arith.mulf %68, %69 : vector<1x256xf32>
    %c0_42 = arith.constant 0 : index
    %c0_43 = arith.constant 0 : index
    %71 = vector.load %arg7[%c0_42, %c0_43] : memref<256x256xbf16, #tpu.memory_space<vmem>>, vector<256x256xbf16>
    %72 = arith.truncf %70 : vector<1x256xf32> to vector<1x256xbf16>
    %73 = arith.extf %72 : vector<1x256xbf16> to vector<1x256xf32>
    %74 = arith.subf %70, %73 : vector<1x256xf32>
    %75 = arith.truncf %74 : vector<1x256xf32> to vector<1x256xbf16>
    %cst_44 = arith.constant dense<0.000000e+00> : vector<1x256xf32>
    %76 = tpu.matmul %72, %71, %cst_44 {dimension_numbers = #tpu.dot_dimension_numbers<[1], [0], [0], [1], [0, 0, 1, 1], [], []>} : vector<1x256xbf16>, vector<256x256xbf16>, vector<1x256xf32> -> vector<1x256xf32>
    %cst_45 = arith.constant dense<0.000000e+00> : vector<1x256xf32>
    %77 = tpu.matmul %75, %71, %cst_45 {dimension_numbers = #tpu.dot_dimension_numbers<[1], [0], [0], [1], [0, 0, 1, 1], [], []>} : vector<1x256xbf16>, vector<256x256xbf16>, vector<1x256xf32> -> vector<1x256xf32>
    %78 = arith.addf %76, %77 : vector<1x256xf32>
    %79 = vector.broadcast %78 : vector<1x256xf32> to vector<8x256xf32>
    %80 = arith.subf %59, %79 : vector<8x256xf32>
    %81 = vector.broadcast %78 : vector<1x256xf32> to vector<8x256xf32>
    %82 = arith.subf %63, %81 : vector<8x256xf32>
    %83 = arith.mulf %80, %80 : vector<8x256xf32>
    %cst_46 = arith.constant dense<0.000000e+00> : vector<256xf32>
    %84 = vector.multi_reduction <add>, %83, %cst_46 [0] : vector<8x256xf32> to vector<256xf32>
    %85 = vector.shape_cast %84 : vector<256xf32> to vector<1x256xf32>
    %86 = arith.mulf %82, %82 : vector<8x256xf32>
    %cst_47 = arith.constant dense<0.000000e+00> : vector<256xf32>
    %87 = vector.multi_reduction <add>, %86, %cst_47 [0] : vector<8x256xf32> to vector<256xf32>
    %88 = vector.shape_cast %87 : vector<256xf32> to vector<1x256xf32>
    %89 = arith.addf %85, %88 : vector<1x256xf32>
    %cst_48 = arith.constant 7.812500e-03 : f32
    %90 = vector.broadcast %cst_48 : f32 to vector<1x256xf32>
    %91 = arith.mulf %89, %90 : vector<1x256xf32>
    %c0_49 = arith.constant 0 : index
    %c0_50 = arith.constant 0 : index
    %92 = vector.load %arg7[%c0_49, %c0_50] : memref<256x256xbf16, #tpu.memory_space<vmem>>, vector<256x256xbf16>
    %93 = arith.truncf %91 : vector<1x256xf32> to vector<1x256xbf16>
    %94 = arith.extf %93 : vector<1x256xbf16> to vector<1x256xf32>
    %95 = arith.subf %91, %94 : vector<1x256xf32>
    %96 = arith.truncf %95 : vector<1x256xf32> to vector<1x256xbf16>
    %cst_51 = arith.constant dense<0.000000e+00> : vector<1x256xf32>
    %97 = tpu.matmul %93, %92, %cst_51 {dimension_numbers = #tpu.dot_dimension_numbers<[1], [0], [0], [1], [0, 0, 1, 1], [], []>} : vector<1x256xbf16>, vector<256x256xbf16>, vector<1x256xf32> -> vector<1x256xf32>
    %cst_52 = arith.constant dense<0.000000e+00> : vector<1x256xf32>
    %98 = tpu.matmul %96, %92, %cst_52 {dimension_numbers = #tpu.dot_dimension_numbers<[1], [0], [0], [1], [0, 0, 1, 1], [], []>} : vector<1x256xbf16>, vector<256x256xbf16>, vector<1x256xf32> -> vector<1x256xf32>
    %99 = arith.addf %97, %98 : vector<1x256xf32>
    %cst_53 = arith.constant 9.99999974E-6 : f32
    %100 = vector.broadcast %cst_53 : f32 to vector<1x256xf32>
    %101 = arith.addf %99, %100 : vector<1x256xf32>
    %102 = math.rsqrt %101 : vector<1x256xf32>
    %c0_54 = arith.constant 0 : index
    %c0_55 = arith.constant 0 : index
    %103 = vector.load %arg8[%c0_54, %c0_55] : memref<1x256xf32, #tpu.memory_space<vmem>>, vector<1x256xf32>
    %104 = arith.mulf %102, %103 : vector<1x256xf32>
    %105 = vector.broadcast %104 : vector<1x256xf32> to vector<8x256xf32>
    %106 = arith.mulf %80, %105 : vector<8x256xf32>
    %c0_56 = arith.constant 0 : index
    %c0_57 = arith.constant 0 : index
    %107 = vector.load %arg9[%c0_56, %c0_57] : memref<1x256xf32, #tpu.memory_space<vmem>>, vector<1x256xf32>
    %108 = vector.broadcast %107 : vector<1x256xf32> to vector<8x256xf32>
    %109 = arith.addf %106, %108 : vector<8x256xf32>
    %cst_58 = arith.constant 0.000000e+00 : f32
    %110 = vector.broadcast %cst_58 : f32 to vector<8x256xf32>
    %111 = arith.maximumf %109, %110 : vector<8x256xf32>
    %112 = vector.broadcast %104 : vector<1x256xf32> to vector<8x256xf32>
    %113 = arith.mulf %82, %112 : vector<8x256xf32>
    %c0_59 = arith.constant 0 : index
    %c0_60 = arith.constant 0 : index
    %114 = vector.load %arg9[%c0_59, %c0_60] : memref<1x256xf32, #tpu.memory_space<vmem>>, vector<1x256xf32>
    %115 = vector.broadcast %114 : vector<1x256xf32> to vector<8x256xf32>
    %116 = arith.addf %113, %115 : vector<8x256xf32>
    %cst_61 = arith.constant 0.000000e+00 : f32
    %117 = vector.broadcast %cst_61 : f32 to vector<8x256xf32>
    %118 = arith.maximumf %116, %117 : vector<8x256xf32>
    %119 = tpu.concatenate %111, %118 in 0 : vector<8x256xf32>, vector<8x256xf32> -> vector<16x256xf32>
    %120 = arith.truncf %119 : vector<16x256xf32> to vector<16x256xbf16>
    %c0_62 = arith.constant 0 : index
    %c0_63 = arith.constant 0 : index
    %c0_64 = arith.constant 0 : index
    %121 = vector.load %arg10[%c0_62, %c0_63, %c0_64] : memref<3x16x16xbf16, #tpu.memory_space<vmem>>, vector<1x16x16xbf16>
    %122 = vector.shape_cast %121 : vector<1x16x16xbf16> to vector<16x16xbf16>
    %cst_65 = arith.constant dense<0.000000e+00> : vector<16x256xf32>
    %123 = tpu.matmul %122, %120, %cst_65 {dimension_numbers = #tpu.dot_dimension_numbers<[1], [0], [0], [1], [0, 0, 1, 1], [], []>} : vector<16x16xbf16>, vector<16x256xbf16>, vector<16x256xf32> -> vector<16x256xf32>
    %124 = arith.truncf %123 : vector<16x256xf32> to vector<16x256xbf16>
    %c1_66 = arith.constant 1 : index
    %c0_67 = arith.constant 0 : index
    %c0_68 = arith.constant 0 : index
    %125 = vector.load %arg10[%c1_66, %c0_67, %c0_68] : memref<3x16x16xbf16, #tpu.memory_space<vmem>>, vector<1x16x16xbf16>
    %126 = vector.shape_cast %125 : vector<1x16x16xbf16> to vector<16x16xbf16>
    %cst_69 = arith.constant dense<0.000000e+00> : vector<16x256xf32>
    %127 = tpu.matmul %126, %120, %cst_69 {dimension_numbers = #tpu.dot_dimension_numbers<[1], [0], [0], [1], [0, 0, 1, 1], [], []>} : vector<16x16xbf16>, vector<16x256xbf16>, vector<16x256xf32> -> vector<16x256xf32>
    %128 = arith.truncf %127 : vector<16x256xf32> to vector<16x256xbf16>
    %c2_70 = arith.constant 2 : index
    %c0_71 = arith.constant 0 : index
    %c0_72 = arith.constant 0 : index
    %129 = vector.load %arg10[%c2_70, %c0_71, %c0_72] : memref<3x16x16xbf16, #tpu.memory_space<vmem>>, vector<1x16x16xbf16>
    %130 = vector.shape_cast %129 : vector<1x16x16xbf16> to vector<16x16xbf16>
    %cst_73 = arith.constant dense<0.000000e+00> : vector<16x256xf32>
    %131 = tpu.matmul %130, %120, %cst_73 {dimension_numbers = #tpu.dot_dimension_numbers<[1], [0], [0], [1], [0, 0, 1, 1], [], []>} : vector<16x16xbf16>, vector<16x256xbf16>, vector<16x256xf32> -> vector<16x256xf32>
    %132 = arith.truncf %131 : vector<16x256xf32> to vector<16x256xbf16>
    %133 = tpu.concatenate %128, %124 in 1 : vector<16x256xbf16>, vector<16x256xbf16> -> vector<16x512xbf16>
    %c0_74 = arith.constant 0 : index
    %c0_75 = arith.constant 0 : index
    %c0_76 = arith.constant 0 : index
    %134 = vector.load %arg11[%c0_74, %c0_75, %c0_76] : memref<2x512x256xbf16, #tpu.memory_space<vmem>>, vector<1x512x256xbf16>
    %135 = vector.shape_cast %134 : vector<1x512x256xbf16> to vector<512x256xbf16>
    %cst_77 = arith.constant dense<0.000000e+00> : vector<16x256xf32>
    %136 = tpu.matmul %133, %135, %cst_77 {dimension_numbers = #tpu.dot_dimension_numbers<[1], [0], [0], [1], [0, 0, 1, 1], [], []>} : vector<16x512xbf16>, vector<512x256xbf16>, vector<16x256xf32> -> vector<16x256xf32>
    %137 = tpu.concatenate %132, %128 in 1 : vector<16x256xbf16>, vector<16x256xbf16> -> vector<16x512xbf16>
    %c1_78 = arith.constant 1 : index
    %c0_79 = arith.constant 0 : index
    %c0_80 = arith.constant 0 : index
    %138 = vector.load %arg11[%c1_78, %c0_79, %c0_80] : memref<2x512x256xbf16, #tpu.memory_space<vmem>>, vector<1x512x256xbf16>
    %139 = vector.shape_cast %138 : vector<1x512x256xbf16> to vector<512x256xbf16>
    %cst_81 = arith.constant dense<0.000000e+00> : vector<16x256xf32>
    %140 = tpu.matmul %137, %139, %cst_81 {dimension_numbers = #tpu.dot_dimension_numbers<[1], [0], [0], [1], [0, 0, 1, 1], [], []>} : vector<16x512xbf16>, vector<512x256xbf16>, vector<16x256xf32> -> vector<16x256xf32>
    %cst_82 = arith.constant dense<0.000000e+00> : vector<256xf32>
    %141 = vector.multi_reduction <add>, %136, %cst_82 [0] : vector<16x256xf32> to vector<256xf32>
    %142 = vector.shape_cast %141 : vector<256xf32> to vector<1x256xf32>
    %cst_83 = arith.constant dense<0.000000e+00> : vector<256xf32>
    %143 = vector.multi_reduction <add>, %140, %cst_83 [0] : vector<16x256xf32> to vector<256xf32>
    %144 = vector.shape_cast %143 : vector<256xf32> to vector<1x256xf32>
    %145 = arith.addf %142, %144 : vector<1x256xf32>
    %cst_84 = arith.constant 0.001953125 : f32
    %146 = vector.broadcast %cst_84 : f32 to vector<1x256xf32>
    %147 = arith.mulf %145, %146 : vector<1x256xf32>
    %c0_85 = arith.constant 0 : index
    %c0_86 = arith.constant 0 : index
    %148 = vector.load %arg12[%c0_85, %c0_86] : memref<256x256xbf16, #tpu.memory_space<vmem>>, vector<256x256xbf16>
    %149 = arith.truncf %147 : vector<1x256xf32> to vector<1x256xbf16>
    %150 = arith.extf %149 : vector<1x256xbf16> to vector<1x256xf32>
    %151 = arith.subf %147, %150 : vector<1x256xf32>
    %152 = arith.truncf %151 : vector<1x256xf32> to vector<1x256xbf16>
    %cst_87 = arith.constant dense<0.000000e+00> : vector<1x256xf32>
    %153 = tpu.matmul %149, %148, %cst_87 {dimension_numbers = #tpu.dot_dimension_numbers<[1], [0], [0], [1], [0, 0, 1, 1], [], []>} : vector<1x256xbf16>, vector<256x256xbf16>, vector<1x256xf32> -> vector<1x256xf32>
    %cst_88 = arith.constant dense<0.000000e+00> : vector<1x256xf32>
    %154 = tpu.matmul %152, %148, %cst_88 {dimension_numbers = #tpu.dot_dimension_numbers<[1], [0], [0], [1], [0, 0, 1, 1], [], []>} : vector<1x256xbf16>, vector<256x256xbf16>, vector<1x256xf32> -> vector<1x256xf32>
    %155 = arith.addf %153, %154 : vector<1x256xf32>
    %156 = vector.broadcast %155 : vector<1x256xf32> to vector<16x256xf32>
    %157 = arith.subf %136, %156 : vector<16x256xf32>
    %158 = vector.broadcast %155 : vector<1x256xf32> to vector<16x256xf32>
    %159 = arith.subf %140, %158 : vector<16x256xf32>
    %160 = arith.mulf %157, %157 : vector<16x256xf32>
    %cst_89 = arith.constant dense<0.000000e+00> : vector<256xf32>
    %161 = vector.multi_reduction <add>, %160, %cst_89 [0] : vector<16x256xf32> to vector<256xf32>
    %162 = vector.shape_cast %161 : vector<256xf32> to vector<1x256xf32>
    %163 = arith.mulf %159, %159 : vector<16x256xf32>
    %cst_90 = arith.constant dense<0.000000e+00> : vector<256xf32>
    %164 = vector.multi_reduction <add>, %163, %cst_90 [0] : vector<16x256xf32> to vector<256xf32>
    %165 = vector.shape_cast %164 : vector<256xf32> to vector<1x256xf32>
    %166 = arith.addf %162, %165 : vector<1x256xf32>
    %cst_91 = arith.constant 0.001953125 : f32
    %167 = vector.broadcast %cst_91 : f32 to vector<1x256xf32>
    %168 = arith.mulf %166, %167 : vector<1x256xf32>
    %c0_92 = arith.constant 0 : index
    %c0_93 = arith.constant 0 : index
    %169 = vector.load %arg12[%c0_92, %c0_93] : memref<256x256xbf16, #tpu.memory_space<vmem>>, vector<256x256xbf16>
    %170 = arith.truncf %168 : vector<1x256xf32> to vector<1x256xbf16>
    %171 = arith.extf %170 : vector<1x256xbf16> to vector<1x256xf32>
    %172 = arith.subf %168, %171 : vector<1x256xf32>
    %173 = arith.truncf %172 : vector<1x256xf32> to vector<1x256xbf16>
    %cst_94 = arith.constant dense<0.000000e+00> : vector<1x256xf32>
    %174 = tpu.matmul %170, %169, %cst_94 {dimension_numbers = #tpu.dot_dimension_numbers<[1], [0], [0], [1], [0, 0, 1, 1], [], []>} : vector<1x256xbf16>, vector<256x256xbf16>, vector<1x256xf32> -> vector<1x256xf32>
    %cst_95 = arith.constant dense<0.000000e+00> : vector<1x256xf32>
    %175 = tpu.matmul %173, %169, %cst_95 {dimension_numbers = #tpu.dot_dimension_numbers<[1], [0], [0], [1], [0, 0, 1, 1], [], []>} : vector<1x256xbf16>, vector<256x256xbf16>, vector<1x256xf32> -> vector<1x256xf32>
    %176 = arith.addf %174, %175 : vector<1x256xf32>
    %cst_96 = arith.constant 9.99999974E-6 : f32
    %177 = vector.broadcast %cst_96 : f32 to vector<1x256xf32>
    %178 = arith.addf %176, %177 : vector<1x256xf32>
    %179 = math.rsqrt %178 : vector<1x256xf32>
    %c0_97 = arith.constant 0 : index
    %c0_98 = arith.constant 0 : index
    %180 = vector.load %arg13[%c0_97, %c0_98] : memref<1x256xf32, #tpu.memory_space<vmem>>, vector<1x256xf32>
    %181 = arith.mulf %179, %180 : vector<1x256xf32>
    %182 = vector.broadcast %181 : vector<1x256xf32> to vector<16x256xf32>
    %183 = arith.mulf %157, %182 : vector<16x256xf32>
    %c0_99 = arith.constant 0 : index
    %c0_100 = arith.constant 0 : index
    %184 = vector.load %arg14[%c0_99, %c0_100] : memref<1x256xf32, #tpu.memory_space<vmem>>, vector<1x256xf32>
    %185 = vector.broadcast %184 : vector<1x256xf32> to vector<16x256xf32>
    %186 = arith.addf %183, %185 : vector<16x256xf32>
    %cst_101 = arith.constant 0.000000e+00 : f32
    %187 = vector.broadcast %cst_101 : f32 to vector<16x256xf32>
    %188 = arith.maximumf %186, %187 : vector<16x256xf32>
    %189 = vector.broadcast %181 : vector<1x256xf32> to vector<16x256xf32>
    %190 = arith.mulf %159, %189 : vector<16x256xf32>
    %c0_102 = arith.constant 0 : index
    %c0_103 = arith.constant 0 : index
    %191 = vector.load %arg14[%c0_102, %c0_103] : memref<1x256xf32, #tpu.memory_space<vmem>>, vector<1x256xf32>
    %192 = vector.broadcast %191 : vector<1x256xf32> to vector<16x256xf32>
    %193 = arith.addf %190, %192 : vector<16x256xf32>
    %cst_104 = arith.constant 0.000000e+00 : f32
    %194 = vector.broadcast %cst_104 : f32 to vector<16x256xf32>
    %195 = arith.maximumf %193, %194 : vector<16x256xf32>
    %196 = tpu.concatenate %188, %195 in 0 : vector<16x256xf32>, vector<16x256xf32> -> vector<32x256xf32>
    %197 = arith.truncf %196 : vector<32x256xf32> to vector<32x256xbf16>
    %c0_105 = arith.constant 0 : index
    %c0_106 = arith.constant 0 : index
    %c0_107 = arith.constant 0 : index
    %198 = vector.load %arg15[%c0_105, %c0_106, %c0_107] : memref<3x32x32xbf16, #tpu.memory_space<vmem>>, vector<1x32x32xbf16>
    %199 = vector.shape_cast %198 : vector<1x32x32xbf16> to vector<32x32xbf16>
    %cst_108 = arith.constant dense<0.000000e+00> : vector<32x256xf32>
    %200 = tpu.matmul %199, %197, %cst_108 {dimension_numbers = #tpu.dot_dimension_numbers<[1], [0], [0], [1], [0, 0, 1, 1], [], []>} : vector<32x32xbf16>, vector<32x256xbf16>, vector<32x256xf32> -> vector<32x256xf32>
    %201 = arith.truncf %200 : vector<32x256xf32> to vector<32x256xbf16>
    %c1_109 = arith.constant 1 : index
    %c0_110 = arith.constant 0 : index
    %c0_111 = arith.constant 0 : index
    %202 = vector.load %arg15[%c1_109, %c0_110, %c0_111] : memref<3x32x32xbf16, #tpu.memory_space<vmem>>, vector<1x32x32xbf16>
    %203 = vector.shape_cast %202 : vector<1x32x32xbf16> to vector<32x32xbf16>
    %cst_112 = arith.constant dense<0.000000e+00> : vector<32x256xf32>
    %204 = tpu.matmul %203, %197, %cst_112 {dimension_numbers = #tpu.dot_dimension_numbers<[1], [0], [0], [1], [0, 0, 1, 1], [], []>} : vector<32x32xbf16>, vector<32x256xbf16>, vector<32x256xf32> -> vector<32x256xf32>
    %205 = arith.truncf %204 : vector<32x256xf32> to vector<32x256xbf16>
    %c2_113 = arith.constant 2 : index
    %c0_114 = arith.constant 0 : index
    %c0_115 = arith.constant 0 : index
    %206 = vector.load %arg15[%c2_113, %c0_114, %c0_115] : memref<3x32x32xbf16, #tpu.memory_space<vmem>>, vector<1x32x32xbf16>
    %207 = vector.shape_cast %206 : vector<1x32x32xbf16> to vector<32x32xbf16>
    %cst_116 = arith.constant dense<0.000000e+00> : vector<32x256xf32>
    %208 = tpu.matmul %207, %197, %cst_116 {dimension_numbers = #tpu.dot_dimension_numbers<[1], [0], [0], [1], [0, 0, 1, 1], [], []>} : vector<32x32xbf16>, vector<32x256xbf16>, vector<32x256xf32> -> vector<32x256xf32>
    %209 = arith.truncf %208 : vector<32x256xf32> to vector<32x256xbf16>
    %210 = tpu.concatenate %205, %201 in 1 : vector<32x256xbf16>, vector<32x256xbf16> -> vector<32x512xbf16>
    %c0_117 = arith.constant 0 : index
    %c0_118 = arith.constant 0 : index
    %c0_119 = arith.constant 0 : index
    %211 = vector.load %arg16[%c0_117, %c0_118, %c0_119] : memref<2x512x256xbf16, #tpu.memory_space<vmem>>, vector<1x512x256xbf16>
    %212 = vector.shape_cast %211 : vector<1x512x256xbf16> to vector<512x256xbf16>
    %cst_120 = arith.constant dense<0.000000e+00> : vector<32x256xf32>
    %213 = tpu.matmul %210, %212, %cst_120 {dimension_numbers = #tpu.dot_dimension_numbers<[1], [0], [0], [1], [0, 0, 1, 1], [], []>} : vector<32x512xbf16>, vector<512x256xbf16>, vector<32x256xf32> -> vector<32x256xf32>
    %214 = tpu.concatenate %209, %205 in 1 : vector<32x256xbf16>, vector<32x256xbf16> -> vector<32x512xbf16>
    %c1_121 = arith.constant 1 : index
    %c0_122 = arith.constant 0 : index
    %c0_123 = arith.constant 0 : index
    %215 = vector.load %arg16[%c1_121, %c0_122, %c0_123] : memref<2x512x256xbf16, #tpu.memory_space<vmem>>, vector<1x512x256xbf16>
    %216 = vector.shape_cast %215 : vector<1x512x256xbf16> to vector<512x256xbf16>
    %cst_124 = arith.constant dense<0.000000e+00> : vector<32x256xf32>
    %217 = tpu.matmul %214, %216, %cst_124 {dimension_numbers = #tpu.dot_dimension_numbers<[1], [0], [0], [1], [0, 0, 1, 1], [], []>} : vector<32x512xbf16>, vector<512x256xbf16>, vector<32x256xf32> -> vector<32x256xf32>
    %cst_125 = arith.constant dense<0.000000e+00> : vector<256xf32>
    %218 = vector.multi_reduction <add>, %213, %cst_125 [0] : vector<32x256xf32> to vector<256xf32>
    %219 = vector.shape_cast %218 : vector<256xf32> to vector<1x256xf32>
    %cst_126 = arith.constant dense<0.000000e+00> : vector<256xf32>
    %220 = vector.multi_reduction <add>, %217, %cst_126 [0] : vector<32x256xf32> to vector<256xf32>
    %221 = vector.shape_cast %220 : vector<256xf32> to vector<1x256xf32>
    %222 = arith.addf %219, %221 : vector<1x256xf32>
    %cst_127 = arith.constant 4.8828125E-4 : f32
    %223 = vector.broadcast %cst_127 : f32 to vector<1x256xf32>
    %224 = arith.mulf %222, %223 : vector<1x256xf32>
    %c0_128 = arith.constant 0 : index
    %c0_129 = arith.constant 0 : index
    %225 = vector.load %arg17[%c0_128, %c0_129] : memref<256x256xbf16, #tpu.memory_space<vmem>>, vector<256x256xbf16>
    %226 = arith.truncf %224 : vector<1x256xf32> to vector<1x256xbf16>
    %227 = arith.extf %226 : vector<1x256xbf16> to vector<1x256xf32>
    %228 = arith.subf %224, %227 : vector<1x256xf32>
    %229 = arith.truncf %228 : vector<1x256xf32> to vector<1x256xbf16>
    %cst_130 = arith.constant dense<0.000000e+00> : vector<1x256xf32>
    %230 = tpu.matmul %226, %225, %cst_130 {dimension_numbers = #tpu.dot_dimension_numbers<[1], [0], [0], [1], [0, 0, 1, 1], [], []>} : vector<1x256xbf16>, vector<256x256xbf16>, vector<1x256xf32> -> vector<1x256xf32>
    %cst_131 = arith.constant dense<0.000000e+00> : vector<1x256xf32>
    %231 = tpu.matmul %229, %225, %cst_131 {dimension_numbers = #tpu.dot_dimension_numbers<[1], [0], [0], [1], [0, 0, 1, 1], [], []>} : vector<1x256xbf16>, vector<256x256xbf16>, vector<1x256xf32> -> vector<1x256xf32>
    %232 = arith.addf %230, %231 : vector<1x256xf32>
    %233 = vector.broadcast %232 : vector<1x256xf32> to vector<32x256xf32>
    %234 = arith.subf %213, %233 : vector<32x256xf32>
    %235 = vector.broadcast %232 : vector<1x256xf32> to vector<32x256xf32>
    %236 = arith.subf %217, %235 : vector<32x256xf32>
    %237 = arith.mulf %234, %234 : vector<32x256xf32>
    %cst_132 = arith.constant dense<0.000000e+00> : vector<256xf32>
    %238 = vector.multi_reduction <add>, %237, %cst_132 [0] : vector<32x256xf32> to vector<256xf32>
    %239 = vector.shape_cast %238 : vector<256xf32> to vector<1x256xf32>
    %240 = arith.mulf %236, %236 : vector<32x256xf32>
    %cst_133 = arith.constant dense<0.000000e+00> : vector<256xf32>
    %241 = vector.multi_reduction <add>, %240, %cst_133 [0] : vector<32x256xf32> to vector<256xf32>
    %242 = vector.shape_cast %241 : vector<256xf32> to vector<1x256xf32>
    %243 = arith.addf %239, %242 : vector<1x256xf32>
    %cst_134 = arith.constant 4.8828125E-4 : f32
    %244 = vector.broadcast %cst_134 : f32 to vector<1x256xf32>
    %245 = arith.mulf %243, %244 : vector<1x256xf32>
    %c0_135 = arith.constant 0 : index
    %c0_136 = arith.constant 0 : index
    %246 = vector.load %arg17[%c0_135, %c0_136] : memref<256x256xbf16, #tpu.memory_space<vmem>>, vector<256x256xbf16>
    %247 = arith.truncf %245 : vector<1x256xf32> to vector<1x256xbf16>
    %248 = arith.extf %247 : vector<1x256xbf16> to vector<1x256xf32>
    %249 = arith.subf %245, %248 : vector<1x256xf32>
    %250 = arith.truncf %249 : vector<1x256xf32> to vector<1x256xbf16>
    %cst_137 = arith.constant dense<0.000000e+00> : vector<1x256xf32>
    %251 = tpu.matmul %247, %246, %cst_137 {dimension_numbers = #tpu.dot_dimension_numbers<[1], [0], [0], [1], [0, 0, 1, 1], [], []>} : vector<1x256xbf16>, vector<256x256xbf16>, vector<1x256xf32> -> vector<1x256xf32>
    %cst_138 = arith.constant dense<0.000000e+00> : vector<1x256xf32>
    %252 = tpu.matmul %250, %246, %cst_138 {dimension_numbers = #tpu.dot_dimension_numbers<[1], [0], [0], [1], [0, 0, 1, 1], [], []>} : vector<1x256xbf16>, vector<256x256xbf16>, vector<1x256xf32> -> vector<1x256xf32>
    %253 = arith.addf %251, %252 : vector<1x256xf32>
    %cst_139 = arith.constant 9.99999974E-6 : f32
    %254 = vector.broadcast %cst_139 : f32 to vector<1x256xf32>
    %255 = arith.addf %253, %254 : vector<1x256xf32>
    %256 = math.rsqrt %255 : vector<1x256xf32>
    %c0_140 = arith.constant 0 : index
    %c0_141 = arith.constant 0 : index
    %257 = vector.load %arg18[%c0_140, %c0_141] : memref<1x256xf32, #tpu.memory_space<vmem>>, vector<1x256xf32>
    %258 = arith.mulf %256, %257 : vector<1x256xf32>
    %259 = vector.broadcast %258 : vector<1x256xf32> to vector<32x256xf32>
    %260 = arith.mulf %234, %259 : vector<32x256xf32>
    %c0_142 = arith.constant 0 : index
    %c0_143 = arith.constant 0 : index
    %261 = vector.load %arg19[%c0_142, %c0_143] : memref<1x256xf32, #tpu.memory_space<vmem>>, vector<1x256xf32>
    %262 = vector.broadcast %261 : vector<1x256xf32> to vector<32x256xf32>
    %263 = arith.addf %260, %262 : vector<32x256xf32>
    %cst_144 = arith.constant 0.000000e+00 : f32
    %264 = vector.broadcast %cst_144 : f32 to vector<32x256xf32>
    %265 = arith.maximumf %263, %264 : vector<32x256xf32>
    %266 = vector.broadcast %258 : vector<1x256xf32> to vector<32x256xf32>
    %267 = arith.mulf %236, %266 : vector<32x256xf32>
    %c0_145 = arith.constant 0 : index
    %c0_146 = arith.constant 0 : index
    %268 = vector.load %arg19[%c0_145, %c0_146] : memref<1x256xf32, #tpu.memory_space<vmem>>, vector<1x256xf32>
    %269 = vector.broadcast %268 : vector<1x256xf32> to vector<32x256xf32>
    %270 = arith.addf %267, %269 : vector<32x256xf32>
    %cst_147 = arith.constant 0.000000e+00 : f32
    %271 = vector.broadcast %cst_147 : f32 to vector<32x256xf32>
    %272 = arith.maximumf %270, %271 : vector<32x256xf32>
    %273 = tpu.concatenate %265, %272 in 0 : vector<32x256xf32>, vector<32x256xf32> -> vector<64x256xf32>
    %274 = arith.truncf %273 : vector<64x256xf32> to vector<64x256xbf16>
    %c0_148 = arith.constant 0 : index
    %c0_149 = arith.constant 0 : index
    %c0_150 = arith.constant 0 : index
    %275 = vector.load %arg20[%c0_148, %c0_149, %c0_150] : memref<3x64x64xbf16, #tpu.memory_space<vmem>>, vector<1x64x64xbf16>
    %276 = vector.shape_cast %275 : vector<1x64x64xbf16> to vector<64x64xbf16>
    %cst_151 = arith.constant dense<0.000000e+00> : vector<64x256xf32>
    %277 = tpu.matmul %276, %274, %cst_151 {dimension_numbers = #tpu.dot_dimension_numbers<[1], [0], [0], [1], [0, 0, 1, 1], [], []>} : vector<64x64xbf16>, vector<64x256xbf16>, vector<64x256xf32> -> vector<64x256xf32>
    %278 = arith.truncf %277 : vector<64x256xf32> to vector<64x256xbf16>
    %c1_152 = arith.constant 1 : index
    %c0_153 = arith.constant 0 : index
    %c0_154 = arith.constant 0 : index
    %279 = vector.load %arg20[%c1_152, %c0_153, %c0_154] : memref<3x64x64xbf16, #tpu.memory_space<vmem>>, vector<1x64x64xbf16>
    %280 = vector.shape_cast %279 : vector<1x64x64xbf16> to vector<64x64xbf16>
    %cst_155 = arith.constant dense<0.000000e+00> : vector<64x256xf32>
    %281 = tpu.matmul %280, %274, %cst_155 {dimension_numbers = #tpu.dot_dimension_numbers<[1], [0], [0], [1], [0, 0, 1, 1], [], []>} : vector<64x64xbf16>, vector<64x256xbf16>, vector<64x256xf32> -> vector<64x256xf32>
    %282 = arith.truncf %281 : vector<64x256xf32> to vector<64x256xbf16>
    %c2_156 = arith.constant 2 : index
    %c0_157 = arith.constant 0 : index
    %c0_158 = arith.constant 0 : index
    %283 = vector.load %arg20[%c2_156, %c0_157, %c0_158] : memref<3x64x64xbf16, #tpu.memory_space<vmem>>, vector<1x64x64xbf16>
    %284 = vector.shape_cast %283 : vector<1x64x64xbf16> to vector<64x64xbf16>
    %cst_159 = arith.constant dense<0.000000e+00> : vector<64x256xf32>
    %285 = tpu.matmul %284, %274, %cst_159 {dimension_numbers = #tpu.dot_dimension_numbers<[1], [0], [0], [1], [0, 0, 1, 1], [], []>} : vector<64x64xbf16>, vector<64x256xbf16>, vector<64x256xf32> -> vector<64x256xf32>
    %286 = arith.truncf %285 : vector<64x256xf32> to vector<64x256xbf16>
    %287 = tpu.concatenate %282, %278 in 1 : vector<64x256xbf16>, vector<64x256xbf16> -> vector<64x512xbf16>
    %c0_160 = arith.constant 0 : index
    %c0_161 = arith.constant 0 : index
    %c0_162 = arith.constant 0 : index
    %288 = vector.load %arg21[%c0_160, %c0_161, %c0_162] : memref<2x512x256xbf16, #tpu.memory_space<vmem>>, vector<1x512x256xbf16>
    %289 = vector.shape_cast %288 : vector<1x512x256xbf16> to vector<512x256xbf16>
    %cst_163 = arith.constant dense<0.000000e+00> : vector<64x256xf32>
    %290 = tpu.matmul %287, %289, %cst_163 {dimension_numbers = #tpu.dot_dimension_numbers<[1], [0], [0], [1], [0, 0, 1, 1], [], []>} : vector<64x512xbf16>, vector<512x256xbf16>, vector<64x256xf32> -> vector<64x256xf32>
    %291 = tpu.concatenate %286, %282 in 1 : vector<64x256xbf16>, vector<64x256xbf16> -> vector<64x512xbf16>
    %c1_164 = arith.constant 1 : index
    %c0_165 = arith.constant 0 : index
    %c0_166 = arith.constant 0 : index
    %292 = vector.load %arg21[%c1_164, %c0_165, %c0_166] : memref<2x512x256xbf16, #tpu.memory_space<vmem>>, vector<1x512x256xbf16>
    %293 = vector.shape_cast %292 : vector<1x512x256xbf16> to vector<512x256xbf16>
    %cst_167 = arith.constant dense<0.000000e+00> : vector<64x256xf32>
    %294 = tpu.matmul %291, %293, %cst_167 {dimension_numbers = #tpu.dot_dimension_numbers<[1], [0], [0], [1], [0, 0, 1, 1], [], []>} : vector<64x512xbf16>, vector<512x256xbf16>, vector<64x256xf32> -> vector<64x256xf32>
    %295 = math.tanh %290 : vector<64x256xf32>
    %c0_168 = arith.constant 0 : index
    %c0_169 = arith.constant 0 : index
    %c0_170 = arith.constant 0 : index
    %296 = vector.load %arg22[%c0_168, %c0_169, %c0_170] : memref<2x64x256xf32, #tpu.memory_space<vmem>>, vector<1x64x256xf32>
    %297 = vector.shape_cast %296 : vector<1x64x256xf32> to vector<64x256xf32>
    %298 = vector.shape_cast %295 : vector<64x256xf32> to vector<1x64x256xf32>
    tpu.vector_store %arg22[%c0_168, %c0_169, %c0_170], %298 {strides = array<i32>} : memref<2x64x256xf32, #tpu.memory_space<vmem>>, vector<1x64x256xf32>,
    %299 = math.tanh %294 : vector<64x256xf32>
    %c1_171 = arith.constant 1 : index
    %c0_172 = arith.constant 0 : index
    %c0_173 = arith.constant 0 : index
    %300 = vector.load %arg22[%c1_171, %c0_172, %c0_173] : memref<2x64x256xf32, #tpu.memory_space<vmem>>, vector<1x64x256xf32>
    %301 = vector.shape_cast %300 : vector<1x64x256xf32> to vector<64x256xf32>
    %302 = vector.shape_cast %299 : vector<64x256xf32> to vector<1x64x256xf32>
    tpu.vector_store %arg22[%c1_171, %c0_172, %c0_173], %302 {strides = array<i32>} : memref<2x64x256xf32, #tpu.memory_space<vmem>>, vector<1x64x256xf32>,
    return
  }
}

</mosaic_0001>

<bundles_post_ra>
// kernel: forward.1
= control target key start
LH: loop header
LB: loop body
LE: loop exit
PB: predicated region body
PF: predicated region fallthrough
CT: control target
= control target key end

     0   :  { %vm196_vm0 = vcmask 261120   ;;  %vm704_vm1 = vcmask 1043456   ;;  %vm700_vm2 = vcmask 64512   ;;  %vm2286_vm3 = vcmask 130048   ;;  %s12982_s1 = inlined_call_operand.vmem [shape: bf16[160,256], index: 1, kind: input, shape index: {}]   ;;  %s12983_s0 = inlined_call_operand.vmem [shape: f32[8,160], index: 0, kind: input, shape index: {}]   ;;  %s12984_s2 = inlined_call_operand.vmem [shape: bf16[256,256], index: 2, kind: input, shape index: {}]   ;;  %s12985_s6 = inlined_call_operand.vmem [shape: bf16[2,512,256], index: 6, kind: input, shape index: {}]   ;;  %s12986_s3 = inlined_call_operand.vmem [shape: f32[1,256], index: 3, kind: input, shape index: {}]   ;;  %s12987_s4 = inlined_call_operand.vmem [shape: f32[1,256], index: 4, kind: input, shape index: {}]   ;;  %s12988_s5 = inlined_call_operand.vmem [shape: bf16[3,8,8], index: 5, kind: input, shape index: {}]   ;;  %s12989_s7 = inlined_call_operand.vmem [shape: bf16[256,256], index: 7, kind: input, shape index: {}]   ;;  %s12990_s10 = inlined_call_operand.vmem [shape: bf16[3,16,16], index: 10, kind: input, shape index: {}]   ;;  %s12991_s11 = inlined_call_operand.vmem [shape: bf16[2,512,256], index: 11, kind: input, shape index: {}]   ;;  %s12992_s8 = inlined_call_operand.vmem [shape: f32[1,256], index: 8, kind: input, shape index: {}]   ;;  %s12993_s9 = inlined_call_operand.vmem [shape: f32[1,256], index: 9, kind: input, shape index: {}]   ;;  %s12994_s12 = inlined_call_operand.vmem [shape: bf16[256,256], index: 12, kind: input, shape index: {}]   ;;  %s12995_s15 = inlined_call_operand.vmem [shape: bf16[3,32,32], index: 15, kind: input, shape index: {}]   ;;  %s12996_s16 = inlined_call_operand.vmem [shape: bf16[2,512,256], index: 16, kind: input, shape index: {}]   ;;  %s12997_s13 = inlined_call_operand.vmem [shape: f32[1,256], index: 13, kind: input, shape index: {}]   ;;  %s12998_s14 = inlined_call_operand.vmem [shape: f32[1,256], index: 14, kind: input, shape index: {}]   ;;  %s12999_s17 = inlined_call_operand.vmem [shape: bf16[256,256], index: 17, kind: input, shape index: {}]   ;;  %s13000_s20 = inlined_call_operand.vmem [shape: bf16[3,64,64], index: 20, kind: input, shape index: {}]   ;;  %s13001_s21 = inlined_call_operand.vmem [shape: bf16[2,512,256], index: 21, kind: input, shape index: {}]   ;;  %s13002_s18 = inlined_call_operand.vmem [shape: f32[1,256], index: 18, kind: input, shape index: {}]   ;;  %s13003_s19 = inlined_call_operand.vmem [shape: f32[1,256], index: 19, kind: input, shape index: {}]   ;;  %s13004_s22 = inlined_call_operand.vmem [shape: f32[2,64,256], index: 22, kind: output, shape index: {}]  }
   0x1   :  { %13052 = sst [smem:[#allocation16_spill]] %s12982_s1  ;;  %vm5742_vm4 = vcmask 523264  }
   0x2   :  { %13053 = sst [smem:[#allocation17_spill]] %s12983_s0  ;;  %s13059_s29 = sld [smem:[#allocation16_spill]] }
   0x3   :  { %13054 = sst [smem:[#allocation18_spill]] %s12984_s2  ;;  %s13060_s24 = sld [smem:[#allocation17_spill]] }
   0x4   :  { %13055 = sst [smem:[#allocation19_spill]] %s12985_s6  ;;  %s13061_s26 = sld [smem:[#allocation18_spill]] }
   0x5   :  { %13056 = sst [smem:[#allocation20_spill]] %s12986_s3  ;;  %s13062_s23 = sld [smem:[#allocation19_spill]] }
   0x6   :  { %13057 = sst [smem:[#allocation21_spill]] %s12987_s4 }
   0x7   :  { %13058 = sst [smem:[#allocation22_spill]] %s12988_s5  ;;  %s13063_s5 = sld [smem:[#allocation20_spill]] }
   0x8   :  { %v8302_v0 = vld [vmem:[%s13059_s29 + $0x4] ss:$8 sps:$4 sm:$0xff]   ;;  %v8304_v1 = vld [vmem:[%s13059_s29] ss:$8 sps:$4 sm:$0xff]   ;;  %v8305_v2 = vld [vmem:[%s13059_s29 + $0x14] ss:$8 sps:$4 sm:$0xff]  }
   0x9   :  { %200 = vmatprep.subr.bf16.mxu0 %v8302_v0  ;;  %v8307_v3 = vld [vmem:[%s13059_s29 + $0x10] ss:$8 sps:$4 sm:$0xff]   ;;  %v8308_v4 = vld [vmem:[%s13059_s29 + $0x24] ss:$8 sps:$4 sm:$0xff]   ;;  %v8310_v5 = vld [vmem:[%s13059_s29 + $0x20] ss:$8 sps:$4 sm:$0xff]  }
   0xa   :  { %201 = vmatpush1.bf16.msra.mxu0 %v8304_v1  ;;  %v8311_v6 = vld [vmem:[%s13059_s29 + $0x34] ss:$8 sps:$4 sm:$0xff]   ;;  %v8313_v7 = vld [vmem:[%s13059_s29 + $0x30] ss:$8 sps:$4 sm:$0xff]   ;;  %v8314_v8 = vld [vmem:[%s13059_s29 + $0x44] ss:$8 sps:$4 sm:$0xff]  }
   0xb   :  { %202 = vmatprep.subr.bf16.mxu0 %v8305_v2  ;;  %v8316_v9 = vld [vmem:[%s13059_s29 + $0x40] ss:$8 sps:$4 sm:$0xff]   ;;  %v9545_v12 = vld [vmem:[%s13061_s26 + $0x4] ss:$8 sps:$4 sm:$0xff]   ;;  %v8317_v14 = vld [vmem:[%s13059_s29 + $0x54] ss:$8 sps:$4 sm:$0xff]  }
   0xc   :  { %v73_v10 = vld [vmem:[%s13060_s24 + $0x8] sm:$0xff]  ;;  %v9559_v15 = vld [vmem:[%s13061_s26 + $0x14] ss:$8 sps:$4 sm:$0xff]   ;;  %v8319_v16 = vld [vmem:[%s13059_s29 + $0x50] ss:$8 sps:$4 sm:$0xff]   ;;  %455 = vmatprep.subr.bf16.mxu1 %v9545_v12  ;;  %s13066_s6 = sld [smem:[#allocation22_spill]] }
   0xd   :  { %v75_v11 = vpack.c.bf16 %v73_v10, %v73_v10  ;;  %v9550_v13 = vld [vmem:[%s13061_s26] ss:$8 sps:$4 sm:$0xff]   ;;  %v9569_v17 = vld [vmem:[%s13061_s26 + $0x10] ss:$8 sps:$4 sm:$0xff]   ;;  %v9575_v18 = vld [vmem:[%s13061_s26 + $0x24] ss:$8 sps:$4 sm:$0xff]  }
   0xe   :  { %203 = vmatpush1.bf16.msra.mxu0 %v8307_v3  ;;  %456 = vmatpush1.bf16.msra.mxu1 %v9550_v13  ;;  %v8320_v19 = vld [vmem:[%s13059_s29 + $0x64] ss:$8 sps:$4 sm:$0xff]   ;;  %v8322_v20 = vld [vmem:[%s13059_s29 + $0x60] ss:$8 sps:$4 sm:$0xff]   ;;  %v9593_v22 = vld [vmem:[%s13061_s26 + $0x34] ss:$8 sps:$4 sm:$0xff]  }
   0xf   :  { %204 = vmatprep.subr.bf16.mxu0 %v8308_v4  ;;  %7230 = vmatprep.mubr.msk.bf16.mxu0 %vm196_vm0, %v75_v11  ;;  %v9587_v21 = vld [vmem:[%s13061_s26 + $0x20] ss:$8 sps:$4 sm:$0xff]   ;;  %v8323_v23 = vld [vmem:[%s13059_s29 + $0x74] ss:$8 sps:$4 sm:$0xff]   ;;  %v8325_v24 = vld [vmem:[%s13059_s29 + $0x70] ss:$8 sps:$4 sm:$0xff]  }
  0x10   :  { %457 = vmatprep.subr.bf16.mxu1 %v9559_v15  ;;  %v8326_v25 = vld [vmem:[%s13059_s29 + $0x84] ss:$8 sps:$4 sm:$0xff]   ;;  %v9608_v26 = vld [vmem:[%s13061_s26 + $0x30] ss:$8 sps:$4 sm:$0xff]   ;;  %v9619_v28 = vld [vmem:[%s13061_s26 + $0x40] ss:$8 sps:$4 sm:$0xff]  }
  0x11   :  { %v9614_v27 = vld [vmem:[%s13061_s26 + $0x44] ss:$8 sps:$4 sm:$0xff]   ;;  %v8328_v29 = vld [vmem:[%s13059_s29 + $0x80] ss:$8 sps:$4 sm:$0xff]   ;;  %v9629_v30 = vld [vmem:[%s13061_s26 + $0x54] ss:$8 sps:$4 sm:$0xff]  }
  0x12   :  { %205 = vmatpush1.bf16.msra.mxu0 %v8310_v5  ;;  %458 = vmatpush1.bf16.msra.mxu1 %v9569_v17  ;;  %v8329_v31 = vld [vmem:[%s13059_s29 + $0x94] ss:$8 sps:$4 sm:$0xff]   ;;  %v9638_v32 = vld [vmem:[%s13061_s26 + $0x50] ss:$8 sps:$4 sm:$0xff]   ;;  %v72_v34 = vld [vmem:[%s13060_s24] sm:$0xff]  ;;  %s13065_s24 = sld [smem:[#allocation21_spill]] }
  0x13   :  { %206 = vmatprep.subr.bf16.mxu0 %v8311_v6  ;;  %459 = vmatprep.subr.bf16.mxu1 %v9575_v18  ;;  %v8331_v33 = vld [vmem:[%s13059_s29 + $0x90] ss:$8 sps:$4 sm:$0xff]   ;;  %v9650_v35 = vld [vmem:[%s13061_s26 + $0x64] ss:$8 sps:$4 sm:$0xff]   ;;  %v74_v36 = vpack.c.bf16 %v72_v34, %v72_v34  ;;  %v9656_v37 = vld [vmem:[%s13061_s26 + $0x60] ss:$8 sps:$4 sm:$0xff]  }
  0x14   :  { %v9662_v38 = vld [vmem:[%s13061_s26 + $0x74] ss:$8 sps:$4 sm:$0xff]   ;;  %v9669_v39 = vld [vmem:[%s13061_s26 + $0x70] ss:$8 sps:$4 sm:$0xff]   ;;  %v9675_v40 = vld [vmem:[%s13061_s26 + $0x84] ss:$8 sps:$4 sm:$0xff]  }
  0x15   :  { %v9683_v41 = vld [vmem:[%s13061_s26 + $0x80] ss:$8 sps:$4 sm:$0xff]   ;;  %v9689_v42 = vld [vmem:[%s13061_s26 + $0x94] ss:$8 sps:$4 sm:$0xff]   ;;  %v9697_v43 = vld [vmem:[%s13061_s26 + $0x90] ss:$8 sps:$4 sm:$0xff]  }
  0x16   :  { %207 = vmatpush1.bf16.msra.mxu0 %v8313_v7  ;;  %460 = vmatpush1.bf16.msra.mxu1 %v9587_v21  ;;  %v9719_v44 = vld [vmem:[%s13061_s26 + $0xa4] ss:$8 sps:$4 sm:$0xff]   ;;  %v9724_v45 = vld [vmem:[%s13061_s26 + $0xa0] ss:$8 sps:$4 sm:$0xff]   ;;  %v9733_v46 = vld [vmem:[%s13061_s26 + $0xb4] ss:$8 sps:$4 sm:$0xff]  }
  0x17   :  { %208 = vmatprep.subr.bf16.mxu0 %v8314_v8  ;;  %461 = vmatprep.subr.bf16.mxu1 %v9593_v22  ;;  %v9738_v47 = vld [vmem:[%s13061_s26 + $0xb0] ss:$8 sps:$4 sm:$0xff]   ;;  %v9747_v48 = vld [vmem:[%s13061_s26 + $0xc4] ss:$8 sps:$4 sm:$0xff]   ;;  %v9752_v49 = vld [vmem:[%s13061_s26 + $0xc0] ss:$8 sps:$4 sm:$0xff]  }
  0x18   :  { %v9760_v50 = vld [vmem:[%s13061_s26 + $0xd4] ss:$8 sps:$4 sm:$0xff]   ;;  %v9765_v51 = vld [vmem:[%s13061_s26 + $0xd0] ss:$8 sps:$4 sm:$0xff]   ;;  %v9771_v52 = vld [vmem:[%s13061_s26 + $0xe4] ss:$8 sps:$4 sm:$0xff]  }
  0x19   :  { %v9779_v53 = vld [vmem:[%s13061_s26 + $0xe0] ss:$8 sps:$4 sm:$0xff]   ;;  %v9786_v54 = vld [vmem:[%s13061_s26 + $0xf4] ss:$8 sps:$4 sm:$0xff]   ;;  %v9793_v55 = vld [vmem:[%s13061_s26 + $0xf0] ss:$8 sps:$4 sm:$0xff]  }
  0x1a   :  { %209 = vmatpush1.bf16.msra.mxu0 %v8316_v9  ;;  %462 = vmatpush1.bf16.msra.mxu1 %v9608_v26 }
  0x1b   :  { %210 = vmatprep.subr.bf16.mxu0 %v8317_v14  ;;  %463 = vmatprep.subr.bf16.mxu1 %v9614_v27 }
  0x1e   :  { %211 = vmatpush1.bf16.msra.mxu0 %v8319_v16  ;;  %464 = vmatpush1.bf16.msra.mxu1 %v9619_v28 }
  0x1f   :  { %212 = vmatprep.subr.bf16.mxu0 %v8320_v19  ;;  %465 = vmatprep.subr.bf16.mxu1 %v9629_v30 }
  0x22   :  { %213 = vmatpush1.bf16.msra.mxu0 %v8322_v20  ;;  %466 = vmatpush1.bf16.msra.mxu1 %v9638_v32 }
  0x23   :  { %214 = vmatprep.subr.bf16.mxu0 %v8323_v23  ;;  %467 = vmatprep.subr.bf16.mxu1 %v9650_v35 }
  0x26   :  { %215 = vmatpush1.bf16.msra.mxu0 %v8325_v24  ;;  %468 = vmatpush1.bf16.msra.mxu1 %v9656_v37  ;;  %v537_v24 = vlaneseq }
  0x27   :  { %216 = vmatprep.subr.bf16.mxu0 %v8326_v25  ;;  %469 = vmatprep.subr.bf16.mxu1 %v9662_v38 }
  0x28   :  { %v9841_v25 = vshrl.u32 %v537_v24, 7 }
  0x2a   :  { %217 = vmatpush1.bf16.msra.mxu0 %v8328_v29  ;;  %470 = vmatpush1.bf16.msra.mxu1 %v9669_v39  ;;  %v9844_v29 = vsub.s32 0, %v9841_v25 }
  0x2b   :  { %218 = vmatprep.subr.bf16.mxu0 %v8329_v31  ;;  %471 = vmatprep.subr.bf16.mxu1 %v9675_v40 }
  0x2e   :  { %219 = vmatpush1.bf16.msra.mxu0 %v8331_v33  ;;  %472 = vmatpush1.bf16.msra.mxu1 %v9683_v41 }
  0x2f   :  { %571 = vmatprep.subr.bf16.mxu0 %v9545_v12  ;;  %473 = vmatprep.subr.bf16.mxu1 %v9689_v42 }
  0x31   :  { %233 = vmatmul.mubr.bf16.vlgmr.msra.gmra.mrb[0].mxu0 %v74_v36 }
  0x32   :  { %572 = vmatpush1.bf16.msra.mxu0 %v9550_v13  ;;  %474 = vmatpush1.bf16.msra.mxu1 %v9697_v43 }
  0x33   :  { %573 = vmatprep.subr.bf16.mxu0 %v9559_v15  ;;  %475 = vmatprep.subr.bf16.mxu1 %v9719_v44 }
  0x36   :  { %574 = vmatpush1.bf16.msra.mxu0 %v9569_v17  ;;  %476 = vmatpush1.bf16.msra.mxu1 %v9724_v45 }
  0x37   :  { %575 = vmatprep.subr.bf16.mxu0 %v9575_v18  ;;  %477 = vmatprep.subr.bf16.mxu1 %v9733_v46 }
  0x3a   :  { %576 = vmatpush1.bf16.msra.mxu0 %v9587_v21  ;;  %478 = vmatpush1.bf16.msra.mxu1 %v9738_v47 }
  0x3b   :  { %577 = vmatprep.subr.bf16.mxu0 %v9593_v22  ;;  %479 = vmatprep.subr.bf16.mxu1 %v9747_v48 }
  0x3e   :  { %578 = vmatpush1.bf16.msra.mxu0 %v9608_v26  ;;  %480 = vmatpush1.bf16.msra.mxu1 %v9752_v49 }
  0x3f   :  { %579 = vmatprep.subr.bf16.mxu0 %v9614_v27  ;;  %481 = vmatprep.subr.bf16.mxu1 %v9760_v50 }
  0x42   :  { %580 = vmatpush1.bf16.msra.mxu0 %v9619_v28  ;;  %482 = vmatpush1.bf16.msra.mxu1 %v9765_v51 }
  0x43   :  { %581 = vmatprep.subr.bf16.mxu0 %v9629_v30  ;;  %483 = vmatprep.subr.bf16.mxu1 %v9771_v52 }
  0x46   :  { %582 = vmatpush1.bf16.msra.mxu0 %v9638_v32  ;;  %484 = vmatpush1.bf16.msra.mxu1 %v9779_v53 }
  0x47   :  { %583 = vmatprep.subr.bf16.mxu0 %v9650_v35  ;;  %485 = vmatprep.subr.bf16.mxu1 %v9786_v54 }
  0x4a   :  { %584 = vmatpush1.bf16.msra.mxu0 %v9656_v37  ;;  %486 = vmatpush1.bf16.msra.mxu1 %v9793_v55 }
  0x4b   :  { %585 = vmatprep.subr.bf16.mxu0 %v9662_v38  ;;  %496 = vmatprep.subr.bf16.mxu1 %v9545_v12 }
  0x4e   :  { %586 = vmatpush1.bf16.msra.mxu0 %v9669_v39 }
  0x4f   :  { %587 = vmatprep.subr.bf16.mxu0 %v9675_v40 }
  0x52   :  { %588 = vmatpush1.bf16.msra.mxu0 %v9683_v41 }
  0x53   :  { %589 = vmatprep.subr.bf16.mxu0 %v9689_v42 }
  0x56   :  { %590 = vmatpush1.bf16.msra.mxu0 %v9697_v43 }
  0x57   :  { %591 = vmatprep.subr.bf16.mxu0 %v9719_v44 }
  0x5a   :  { %592 = vmatpush1.bf16.msra.mxu0 %v9724_v45 }
  0x5b   :  { %593 = vmatprep.subr.bf16.mxu0 %v9733_v46 }
  0x5e   :  { %594 = vmatpush1.bf16.msra.mxu0 %v9738_v47 }
  0x5f   :  { %595 = vmatprep.subr.bf16.mxu0 %v9747_v48 }
  0x62   :  { %596 = vmatpush1.bf16.msra.mxu0 %v9752_v49 }
  0x63   :  { %597 = vmatprep.subr.bf16.mxu0 %v9760_v50 }
  0x66   :  { %598 = vmatpush1.bf16.msra.mxu0 %v9765_v51 }
  0x67   :  { %599 = vmatprep.subr.bf16.mxu0 %v9771_v52 }
  0x6a   :  { %600 = vmatpush1.bf16.msra.mxu0 %v9779_v53 }
  0x6b   :  { %601 = vmatprep.subr.bf16.mxu0 %v9786_v54 }
  0x6e   :  { %602 = vmatpush1.bf16.msra.mxu0 %v9793_v55 }
  0x6f   :  { %612 = vmatprep.subr.bf16.mxu0 %v9545_v12 }
 0x104   :  { %v9802_v56 = vpop.f32.mrb[0].mxu0 }
 0x105   :  { %v241_v57 = vrot.slane %v9802_v56, 4  ;;  %v9805_v58 = vpop.f32.mrb[1].mxu0 }
 0x106   :  { %v247_v59 = vrot.slane %v9805_v58, 4  ;;  %v238_v60 = vpop.f32.mrb[2].mxu0 }
 0x107   :  { %v242_v61 = vadd.f32 %v241_v57, %v9802_v56  ;;  %v239_v62 = vpop.f32.mrb[3].mxu0 }
 0x108   :  { %v248_v63 = vadd.f32 %v247_v59, %v9805_v58 }
 0x109   :  { %v243_v0 = vrot.slane %v242_v61, 2 }
 0x10a   :  { %v249_v1 = vrot.slane %v248_v63, 2 }
 0x10b   :  { %v244_v2 = vadd.f32 %v243_v0, %v242_v61 }
 0x10c   :  { %v250_v3 = vadd.f32 %v249_v1, %v248_v63 }
 0x10d   :  { %v245_v4 = vrot.slane %v244_v2, 1 }
 0x10e   :  { %v251_v5 = vrot.slane %v250_v3, 1 }
 0x10f   :  { %v246_v6 = vadd.f32 %v245_v4, %v244_v2 }
 0x110   :  { %v252_v7 = vadd.f32 %v251_v5, %v250_v3 }
 0x111   :  { %v253_v8 = vmul.f32 0.03125, %v246_v6 }
 0x112   :  { %v254_v9 = vmul.f32 0.03125, %v252_v7 }
 0x113   :  { %v287_v10 = vpack.c.bf16 %v253_v8, %v253_v8 }
 0x114   :  { %v288_v11 = vpack.c.bf16 %v254_v9, %v254_v9 }
 0x115   :  { %v289_v12 = vunpack.c.l.bf16 %v287_v10 }
 0x116   :  { %v290_v14 = vunpack.c.l.bf16 %v288_v11 }
 0x117   :  { %v291_v16 = vsub.f32 %v253_v8, %v289_v12 }
 0x118   :  { %v292_v19 = vsub.f32 %v254_v9, %v290_v14 }
 0x119   :  { %v293_v23 = vpack.c.bf16 %v291_v16, %v291_v16 }
 0x11a   :  { %v294_v20 = vpack.c.bf16 %v292_v19, %v292_v19 }
 0x11c   :  { %487 = vmatprep.mubr.bf16.mxu1 %v294_v20 }
 0x11d   :  { %488 = vmatmul.mubr.bf16.vlgmr.msra.gmra.mrb[0].mxu1 %v293_v23 }
 0x11e   :  { %497 = vmatpush1.bf16.msra.mxu1 %v9550_v13  ;;  %528 = vmatprep.mubr.bf16.mxu1 %v288_v11 }
 0x11f   :  { %498 = vmatprep.subr.bf16.mxu1 %v9559_v15 }
 0x122   :  { %499 = vmatpush1.bf16.msra.mxu1 %v9569_v17 }
 0x123   :  { %500 = vmatprep.subr.bf16.mxu1 %v9575_v18 }
 0x126   :  { %501 = vmatpush1.bf16.msra.mxu1 %v9587_v21 }
 0x127   :  { %502 = vmatprep.subr.bf16.mxu1 %v9593_v22 }
 0x12a   :  { %503 = vmatpush1.bf16.msra.mxu1 %v9608_v26 }
 0x12b   :  { %504 = vmatprep.subr.bf16.mxu1 %v9614_v27 }
 0x12e   :  { %505 = vmatpush1.bf16.msra.mxu1 %v9619_v28 }
 0x12f   :  { %506 = vmatprep.subr.bf16.mxu1 %v9629_v30 }
 0x132   :  { %507 = vmatpush1.bf16.msra.mxu1 %v9638_v32 }
 0x133   :  { %508 = vmatprep.subr.bf16.mxu1 %v9650_v35 }
 0x136   :  { %509 = vmatpush1.bf16.msra.mxu1 %v9656_v37 }
 0x137   :  { %510 = vmatprep.subr.bf16.mxu1 %v9662_v38 }
 0x13a   :  { %511 = vmatpush1.bf16.msra.mxu1 %v9669_v39 }
 0x13b   :  { %512 = vmatprep.subr.bf16.mxu1 %v9675_v40 }
 0x13e   :  { %513 = vmatpush1.bf16.msra.mxu1 %v9683_v41 }
 0x13f   :  { %514 = vmatprep.subr.bf16.mxu1 %v9689_v42 }
 0x142   :  { %515 = vmatpush1.bf16.msra.mxu1 %v9697_v43 }
 0x143   :  { %516 = vmatprep.subr.bf16.mxu1 %v9719_v44 }
 0x146   :  { %517 = vmatpush1.bf16.msra.mxu1 %v9724_v45 }
 0x147   :  { %518 = vmatprep.subr.bf16.mxu1 %v9733_v46 }
 0x14a   :  { %519 = vmatpush1.bf16.msra.mxu1 %v9738_v47 }
 0x14b   :  { %520 = vmatprep.subr.bf16.mxu1 %v9747_v48 }
 0x14e   :  { %521 = vmatpush1.bf16.msra.mxu1 %v9752_v49 }
 0x14f   :  { %522 = vmatprep.subr.bf16.mxu1 %v9760_v50 }
 0x152   :  { %523 = vmatpush1.bf16.msra.mxu1 %v9765_v51 }
 0x153   :  { %524 = vmatprep.subr.bf16.mxu1 %v9771_v52 }
 0x156   :  { %525 = vmatpush1.bf16.msra.mxu1 %v9779_v53 }
 0x157   :  { %526 = vmatprep.subr.bf16.mxu1 %v9786_v54 }
 0x15a   :  { %527 = vmatpush1.bf16.msra.mxu1 %v9793_v55 }
 0x15d   :  { %529 = vmatmul.mubr.bf16.vlgmr.msra.gmra.mrb[0].mxu1 %v287_v10 }
 0x230   :  { %v530_v31 = vpop.f32.mrb[0].mxu1 }
 0x231   :  { %v540_v33 = vrot.slane %v530_v31, %v9844_v29  ;;  %v532_v34 = vpop.f32.mrb[1].mxu1 }
 0x232   :  { %v544_v36 = vrot.slane %v532_v34, %v9844_v29  ;;  %v534_v57 = vpop.f32.mrb[2].mxu1 }
 0x233   :  { %v9849_v59 = vsub.f32 %v9802_v56, %v540_v33  ;;  %v535_v60 = vpop.f32.mrb[3].mxu1 }
 0x234   :  { %v9852_v61 = vsub.f32 %v9805_v58, %v544_v36  ;;  %v657_v60 = vld [vmem:[%s13063_s5] sm:$0x3] }
 0x235   :  { %v547_v62 = vmul.f32 %v9849_v59, %v9849_v59 }
 0x236   :  { %v548_v63 = vmul.f32 %v9852_v61, %v9852_v61 }
 0x237   :  { %v549_v0 = vrot.slane %v547_v62, 4 }
 0x238   :  { %v555_v1 = vrot.slane %v548_v63, 4 }
 0x239   :  { %v550_v2 = vadd.f32 %v549_v0, %v547_v62  ;;  %v9960_v62 = vsub.s32 1, %v9841_v25 }
 0x23a   :  { %v556_v3 = vadd.f32 %v555_v1, %v548_v63  ;;  %v662_v63 = vrot.slane %v657_v60, %v9844_v29 }
 0x23b   :  { %v551_v4 = vrot.slane %v550_v2, 2  ;;  %13064 = vst [vmem:[#allocation2_spill] sm:$0xff] %v9960_v62  ;;  %v666_v0 = vrot.slane %v657_v60, %v9960_v62  ;;  %v8467_v60 = vld [vmem:[%s13062_s23 + $0x2d0] ss:$8 sps:$4 sm:$0xff]  }
 0x23c   :  { %v557_v5 = vrot.slane %v556_v3, 2 }
 0x23d   :  { %v552_v6 = vadd.f32 %v551_v4, %v550_v2  ;;  %v681_v2 = vld [vmem:[%s13065_s24] sm:$0x3] }
 0x23e   :  { %v558_v7 = vadd.f32 %v557_v5, %v556_v3  ;;  %v690_v25 = vrot.slane %v681_v2, %v9960_v62 }
 0x23f   :  { %v553_v56 = vrot.slane %v552_v6, 1 }
 0x240   :  { %v559_v8 = vrot.slane %v558_v7, 1 }
 0x241   :  { %v554_v9 = vadd.f32 %v553_v56, %v552_v6 }
 0x242   :  { %v560_v10 = vadd.f32 %v559_v8, %v558_v7  ;;  %v686_v7 = vrot.slane %v681_v2, %v9844_v29  ;;  %v8481_v2 = vld [vmem:[%s13062_s23 + $0x2f4] ss:$8 sps:$4 sm:$0xff]  }
 0x243   :  { %v561_v58 = vmul.f32 0.03125, %v554_v9 }
 0x244   :  { %v562_v11 = vmul.f32 0.03125, %v560_v10 }
 0x245   :  { %v563_v12 = vpack.c.bf16 %v561_v58, %v561_v58 }
 0x246   :  { %v564_v14 = vpack.c.bf16 %v562_v11, %v562_v11 }
 0x247   :  { %v565_v16 = vunpack.c.l.bf16 %v563_v12 }
 0x248   :  { %v566_v19 = vunpack.c.l.bf16 %v564_v14 }
 0x249   :  { %v567_v20 = vsub.f32 %v561_v58, %v565_v16 }
 0x24a   :  { %v568_v23 = vsub.f32 %v562_v11, %v566_v19 }
 0x24b   :  { %v569_v31 = vpack.c.bf16 %v567_v20, %v567_v20  ;;  %v699_v20 = vld [vmem:[%s13066_s6] sm:$0xf] }
 0x24c   :  { %v570_v24 = vpack.c.bf16 %v568_v23, %v568_v23  ;;  %v7268_v23 = vld [vmem:[%s13066_s6 + $0x8] sm:$0xf] }
 0x24e   :  { %603 = vmatprep.mubr.bf16.mxu0 %v570_v24  ;;  %v8380_v24 = vld [vmem:[%s13062_s23] ss:$8 sps:$4 sm:$0xff]  }
 0x24f   :  { %604 = vmatmul.mubr.bf16.vlgmr.msra.gmra.mrb[4].mxu0 %v569_v31  ;;  %v8385_v31 = vld [vmem:[%s13062_s23 + $0x14] ss:$8 sps:$4 sm:$0xff]  }
 0x250   :  { %613 = vmatpush1.bf16.msra.mxu0 %v9550_v13  ;;  %644 = vmatprep.mubr.bf16.mxu0 %v564_v14  ;;  %v13010_v13 = vmov 0  }
 0x251   :  { %614 = vmatprep.subr.bf16.mxu0 %v9559_v15  ;;  %743 = vmatprep.mubr.bf16.mxu1 %v13010_v13  ;;  %v8389_v15 = vld [vmem:[%s13062_s23 + $0x200] ss:$8 sps:$4 sm:$0xff]  }
 0x254   :  { %615 = vmatpush1.bf16.msra.mxu0 %v9569_v17  ;;  %v8391_v17 = vld [vmem:[%s13062_s23 + $0x204] ss:$8 sps:$4 sm:$0xff]  }
 0x255   :  { %616 = vmatprep.subr.bf16.mxu0 %v9575_v18  ;;  %v8395_v18 = vld [vmem:[%s13062_s23 + $0x210] ss:$8 sps:$4 sm:$0xff]  }
 0x258   :  { %617 = vmatpush1.bf16.msra.mxu0 %v9587_v21  ;;  %v8397_v21 = vld [vmem:[%s13062_s23 + $0x214] ss:$8 sps:$4 sm:$0xff]  }
 0x259   :  { %618 = vmatprep.subr.bf16.mxu0 %v9593_v22  ;;  %v8401_v22 = vld [vmem:[%s13062_s23 + $0x220] ss:$8 sps:$4 sm:$0xff]  }
 0x25c   :  { %619 = vmatpush1.bf16.msra.mxu0 %v9608_v26  ;;  %v8403_v26 = vld [vmem:[%s13062_s23 + $0x224] ss:$8 sps:$4 sm:$0xff]  }
 0x25d   :  { %620 = vmatprep.subr.bf16.mxu0 %v9614_v27 }
 0x260   :  { %621 = vmatpush1.bf16.msra.mxu0 %v9619_v28 }
 0x261   :  { %622 = vmatprep.subr.bf16.mxu0 %v9629_v30 }
 0x264   :  { %623 = vmatpush1.bf16.msra.mxu0 %v9638_v32 }
 0x265   :  { %624 = vmatprep.subr.bf16.mxu0 %v9650_v35  ;;  %v8407_v35 = vld [vmem:[%s13062_s23 + $0x230] ss:$8 sps:$4 sm:$0xff]  }
 0x268   :  { %625 = vmatpush1.bf16.msra.mxu0 %v9656_v37  ;;  %v8409_v37 = vld [vmem:[%s13062_s23 + $0x234] ss:$8 sps:$4 sm:$0xff]  }
 0x269   :  { %626 = vmatprep.subr.bf16.mxu0 %v9662_v38  ;;  %v8413_v38 = vld [vmem:[%s13062_s23 + $0x240] ss:$8 sps:$4 sm:$0xff]  }
 0x26c   :  { %627 = vmatpush1.bf16.msra.mxu0 %v9669_v39  ;;  %v8415_v39 = vld [vmem:[%s13062_s23 + $0x244] ss:$8 sps:$4 sm:$0xff]  }
 0x26d   :  { %628 = vmatprep.subr.bf16.mxu0 %v9675_v40  ;;  %v8419_v40 = vld [vmem:[%s13062_s23 + $0x250] ss:$8 sps:$4 sm:$0xff]  }
 0x270   :  { %629 = vmatpush1.bf16.msra.mxu0 %v9683_v41  ;;  %v8421_v41 = vld [vmem:[%s13062_s23 + $0x254] ss:$8 sps:$4 sm:$0xff]  }
 0x271   :  { %630 = vmatprep.subr.bf16.mxu0 %v9689_v42  ;;  %v8425_v42 = vld [vmem:[%s13062_s23 + $0x260] ss:$8 sps:$4 sm:$0xff]  }
 0x274   :  { %631 = vmatpush1.bf16.msra.mxu0 %v9697_v43  ;;  %v8427_v43 = vld [vmem:[%s13062_s23 + $0x264] ss:$8 sps:$4 sm:$0xff]  }
 0x275   :  { %632 = vmatprep.subr.bf16.mxu0 %v9719_v44  ;;  %v8431_v44 = vld [vmem:[%s13062_s23 + $0x270] ss:$8 sps:$4 sm:$0xff]  }
 0x278   :  { %633 = vmatpush1.bf16.msra.mxu0 %v9724_v45  ;;  %v8433_v45 = vld [vmem:[%s13062_s23 + $0x274] ss:$8 sps:$4 sm:$0xff]  }
 0x279   :  { %634 = vmatprep.subr.bf16.mxu0 %v9733_v46  ;;  %v8437_v46 = vld [vmem:[%s13062_s23 + $0x280] ss:$8 sps:$4 sm:$0xff]  }
 0x27c   :  { %635 = vmatpush1.bf16.msra.mxu0 %v9738_v47  ;;  %v8439_v47 = vld [vmem:[%s13062_s23 + $0x284] ss:$8 sps:$4 sm:$0xff]  }
 0x27d   :  { %636 = vmatprep.subr.bf16.mxu0 %v9747_v48  ;;  %v8443_v48 = vld [vmem:[%s13062_s23 + $0x290] ss:$8 sps:$4 sm:$0xff]  }
 0x280   :  { %637 = vmatpush1.bf16.msra.mxu0 %v9752_v49  ;;  %v8445_v49 = vld [vmem:[%s13062_s23 + $0x294] ss:$8 sps:$4 sm:$0xff]  }
 0x281   :  { %638 = vmatprep.subr.bf16.mxu0 %v9760_v50  ;;  %v8449_v50 = vld [vmem:[%s13062_s23 + $0x2a0] ss:$8 sps:$4 sm:$0xff]  }
 0x284   :  { %639 = vmatpush1.bf16.msra.mxu0 %v9765_v51  ;;  %v8451_v51 = vld [vmem:[%s13062_s23 + $0x2a4] ss:$8 sps:$4 sm:$0xff]  }
 0x285   :  { %640 = vmatprep.subr.bf16.mxu0 %v9771_v52 }
 0x288   :  { %641 = vmatpush1.bf16.msra.mxu0 %v9779_v53 }
 0x289   :  { %642 = vmatprep.subr.bf16.mxu0 %v9786_v54 }
 0x28c   :  { %643 = vmatpush1.bf16.msra.mxu0 %v9793_v55 }
 0x28d   :  { %1701 = vmatprep.subr.bf16.mxu0 %v8391_v17  ;;  %v8388_v17 = vld [vmem:[%s13062_s23 + $0x24] ss:$8 sps:$4 sm:$0xff]  }
 0x28f   :  { %645 = vmatmul.mubr.bf16.vlgmr.msra.gmra.mrb[8].mxu0 %v563_v12 }
 0x290   :  { %1702 = vmatpush1.bf16.msra.mxu0 %v8389_v15  ;;  %v8383_v15 = vld [vmem:[%s13062_s23 + $0x10] ss:$8 sps:$4 sm:$0xff]  }
 0x291   :  { %1703 = vmatprep.subr.bf16.mxu0 %v8397_v21  ;;  %v8394_v21 = vld [vmem:[%s13062_s23 + $0x34] ss:$8 sps:$4 sm:$0xff]  }
 0x294   :  { %1704 = vmatpush1.bf16.msra.mxu0 %v8395_v18  ;;  %v8386_v18 = vld [vmem:[%s13062_s23 + $0x20] ss:$8 sps:$4 sm:$0xff]  }
 0x295   :  { %1705 = vmatprep.subr.bf16.mxu0 %v8403_v26  ;;  %v8400_v26 = vld [vmem:[%s13062_s23 + $0x44] ss:$8 sps:$4 sm:$0xff]  }
 0x298   :  { %1706 = vmatpush1.bf16.msra.mxu0 %v8401_v22  ;;  %v8392_v22 = vld [vmem:[%s13062_s23 + $0x30] ss:$8 sps:$4 sm:$0xff]  }
 0x299   :  { %1707 = vmatprep.subr.bf16.mxu0 %v8409_v37  ;;  %v8418_v37 = vld [vmem:[%s13062_s23 + $0x74] ss:$8 sps:$4 sm:$0xff]  }
 0x29c   :  { %1708 = vmatpush1.bf16.msra.mxu0 %v8407_v35  ;;  %v8410_v35 = vld [vmem:[%s13062_s23 + $0x60] ss:$8 sps:$4 sm:$0xff]  }
 0x29d   :  { %1709 = vmatprep.subr.bf16.mxu0 %v8415_v39  ;;  %v8424_v39 = vld [vmem:[%s13062_s23 + $0x84] ss:$8 sps:$4 sm:$0xff]  }
 0x2a0   :  { %1710 = vmatpush1.bf16.msra.mxu0 %v8413_v38  ;;  %v8416_v38 = vld [vmem:[%s13062_s23 + $0x70] ss:$8 sps:$4 sm:$0xff]  }
 0x2a1   :  { %1711 = vmatprep.subr.bf16.mxu0 %v8421_v41  ;;  %v8430_v41 = vld [vmem:[%s13062_s23 + $0x94] ss:$8 sps:$4 sm:$0xff]  }
 0x2a4   :  { %1712 = vmatpush1.bf16.msra.mxu0 %v8419_v40  ;;  %v8422_v40 = vld [vmem:[%s13062_s23 + $0x80] ss:$8 sps:$4 sm:$0xff]  }
 0x2a5   :  { %1713 = vmatprep.subr.bf16.mxu0 %v8427_v43  ;;  %v8436_v43 = vld [vmem:[%s13062_s23 + $0xa4] ss:$8 sps:$4 sm:$0xff]  }
 0x2a8   :  { %1714 = vmatpush1.bf16.msra.mxu0 %v8425_v42  ;;  %v8428_v42 = vld [vmem:[%s13062_s23 + $0x90] ss:$8 sps:$4 sm:$0xff]  }
 0x2a9   :  { %1715 = vmatprep.subr.bf16.mxu0 %v8433_v45  ;;  %v8442_v45 = vld [vmem:[%s13062_s23 + $0xb4] ss:$8 sps:$4 sm:$0xff]  }
 0x2ac   :  { %1716 = vmatpush1.bf16.msra.mxu0 %v8431_v44  ;;  %v8434_v44 = vld [vmem:[%s13062_s23 + $0xa0] ss:$8 sps:$4 sm:$0xff]  }
 0x2ad   :  { %1717 = vmatprep.subr.bf16.mxu0 %v8439_v47  ;;  %v8448_v47 = vld [vmem:[%s13062_s23 + $0xc4] ss:$8 sps:$4 sm:$0xff]  }
 0x2b0   :  { %1718 = vmatpush1.bf16.msra.mxu0 %v8437_v46  ;;  %v8440_v46 = vld [vmem:[%s13062_s23 + $0xb0] ss:$8 sps:$4 sm:$0xff]  }
 0x2b1   :  { %1719 = vmatprep.subr.bf16.mxu0 %v8445_v49  ;;  %v8454_v49 = vld [vmem:[%s13062_s23 + $0xd4] ss:$8 sps:$4 sm:$0xff]  }
 0x2b4   :  { %1720 = vmatpush1.bf16.msra.mxu0 %v8443_v48  ;;  %v8446_v48 = vld [vmem:[%s13062_s23 + $0xc0] ss:$8 sps:$4 sm:$0xff]  }
 0x2b5   :  { %1721 = vmatprep.subr.bf16.mxu0 %v8451_v51  ;;  %v8452_v51 = vld [vmem:[%s13062_s23 + $0xd0] ss:$8 sps:$4 sm:$0xff]  }
 0x2b8   :  { %1722 = vmatpush1.bf16.msra.mxu0 %v8449_v50  ;;  %v8457_v50 = vld [vmem:[%s13062_s23 + $0x2b4] ss:$8 sps:$4 sm:$0xff]  }
 0x2b9   :  { %1723 = vmatprep.subr.bf16.mxu0 %v8457_v50  ;;  %v8523_v50 = vld [vmem:[%s13062_s23 + $0x364] ss:$8 sps:$4 sm:$0xff]  }
 0x322   :  { %v605_v27 = vpop.f32.mrb[4].mxu0 }
 0x323   :  { %v607_v28 = vpop.f32.mrb[5].mxu0 }
 0x324   :  { %v609_v30 = vpop.f32.mrb[6].mxu0 }
 0x325   :  { %v610_v32 = vpop.f32.mrb[7].mxu0  ;;  %v8404_v30 = vld [vmem:[%s13062_s23 + $0x50] ss:$8 sps:$4 sm:$0xff]  }
 0x326   :  { %v8412_v32 = vld [vmem:[%s13062_s23 + $0x64] ss:$8 sps:$4 sm:$0xff]  }
 0x362   :  { %v646_v52 = vpop.f32.mrb[8].mxu0 }
 0x363   :  { %v647_v53 = vadd.f32 %v646_v52, %v605_v27  ;;  %v648_v54 = vpop.f32.mrb[9].mxu0  ;;  %v8398_v27 = vld [vmem:[%s13062_s23 + $0x40] ss:$8 sps:$4 sm:$0xff]   ;;  %v8455_v52 = vld [vmem:[%s13062_s23 + $0x2b0] ss:$8 sps:$4 sm:$0xff]  }
 0x364   :  { %v649_v55 = vadd.f32 %v648_v54, %v607_v28  ;;  %v650_v33 = vpop.f32.mrb[10].mxu0  ;;  %v8406_v28 = vld [vmem:[%s13062_s23 + $0x54] ss:$8 sps:$4 sm:$0xff]   ;;  %1724 = vmatpush1.bf16.msra.mxu0 %v8455_v52  ;;  %v8460_v54 = vld [vmem:[%s13062_s23 + $0xe4] ss:$8 sps:$4 sm:$0xff]  }
 0x365   :  { %v653_v34 = vadd.f32 1e-05, %v647_v53  ;;  %v651_v36 = vpop.f32.mrb[11].mxu0  ;;  %v8458_v53 = vld [vmem:[%s13062_s23 + $0xe0] ss:$8 sps:$4 sm:$0xff]  }
 0x366   :  { %v654_v57 = vadd.f32 1e-05, %v649_v55  ;;  %v8461_v55 = vld [vmem:[%s13062_s23 + $0x2c0] ss:$8 sps:$4 sm:$0xff]   ;;  %v8463_v33 = vld [vmem:[%s13062_s23 + $0x2c4] ss:$8 sps:$4 sm:$0xff]  }
 0x367   :  { %9313 = vrsqrt.f32 %v653_v34  ;;  %1725 = vmatprep.subr.bf16.mxu0 %v8463_v33  ;;  %v8466_v34 = vld [vmem:[%s13062_s23 + $0xf4] ss:$8 sps:$4 sm:$0xff]   ;;  %v8521_v52 = vld [vmem:[%s13062_s23 + $0x360] ss:$8 sps:$4 sm:$0xff]   ;;  %v8527_v33 = vld [vmem:[%s13062_s23 + $0x370] ss:$8 sps:$4 sm:$0xff]  }
 0x368   :  { %9315 = vrsqrt.f32 %v654_v57  ;;  %1726 = vmatpush1.bf16.msra.mxu0 %v8461_v55  ;;  %v8469_v36 = vld [vmem:[%s13062_s23 + $0x2d4] ss:$8 sps:$4 sm:$0xff]   ;;  %v8464_v57 = vld [vmem:[%s13062_s23 + $0xf0] ss:$8 sps:$4 sm:$0xff]  }
 0x369   :  { %1727 = vmatprep.subr.bf16.mxu0 %v8469_v36  ;;  %v8524_v55 = vld [vmem:[%s13062_s23 + $0x190] ss:$8 sps:$4 sm:$0xff]   ;;  %v8535_v36 = vld [vmem:[%s13062_s23 + $0x384] ss:$8 sps:$4 sm:$0xff]  }
 0x36c   :  { %1728 = vmatpush1.bf16.msra.mxu0 %v8467_v60  ;;  %v8533_v60 = vld [vmem:[%s13062_s23 + $0x380] ss:$8 sps:$4 sm:$0xff]  }
 0x371   :  { %v9314_v1 = vpop.eup %9313 }
 0x372   :  { %v9316_v3 = vpop.eup %9315  ;;  %v669_v4 = vmul.f32 %v9314_v1, %v662_v63  ;;  %v8472_v63 = vld [vmem:[%s13062_s23 + $0x104] ss:$8 sps:$4 sm:$0xff]   ;;  %v8473_v1 = vld [vmem:[%s13062_s23 + $0x2e0] ss:$8 sps:$4 sm:$0xff]  }
 0x373   :  { %v670_v5 = vmul.f32 %v9316_v3, %v666_v0  ;;  %v8475_v0 = vld [vmem:[%s13062_s23 + $0x2e4] ss:$8 sps:$4 sm:$0xff]   ;;  %v8479_v3 = vld [vmem:[%s13062_s23 + $0x2f0] ss:$8 sps:$4 sm:$0xff]  }
 0x374   :  { %v674_v6 = vrot.slane %v669_v4, %v9844_v29  ;;  %1729 = vmatprep.subr.bf16.mxu0 %v8475_v0  ;;  %v8487_v4 = vld [vmem:[%s13062_s23 + $0x304] ss:$8 sps:$4 sm:$0xff]   ;;  %v8541_v0 = vld [vmem:[%s13062_s23 + $0x394] ss:$8 sps:$4 sm:$0xff]  }
 0x375   :  { %v678_v56 = vrot.slane %v670_v5, %v9844_v29  ;;  %1730 = vmatpush1.bf16.msra.mxu0 %v8473_v1  ;;  %v8536_v1 = vld [vmem:[%s13062_s23 + $0x1b0] ss:$8 sps:$4 sm:$0xff]  }
 0x376   :  { %v679_v8 = vmul.f32 %v674_v6, %v9849_v59  ;;  %v7265_v59 = vld [vmem:[%s13066_s6 + $0x4] sm:$0xf]  ;;  %1731 = vmatprep.subr.bf16.mxu0 %v8481_v2  ;;  %v8539_v2 = vld [vmem:[%s13062_s23 + $0x390] ss:$8 sps:$4 sm:$0xff]  }
 0x377   :  { %v680_v9 = vmul.f32 %v678_v56, %v9852_v61  ;;  %v8382_v61 = vld [vmem:[%s13062_s23 + $0x4] ss:$8 sps:$4 sm:$0xff]  }
 0x378   :  { %v693_v10 = vadd.f32 %v686_v7, %v679_v8 }
 0x379   :  { %v694_v58 = vadd.f32 %v690_v25, %v680_v9  ;;  %1732 = vmatpush1.bf16.msra.mxu0 %v8479_v3  ;;  %v8544_v3 = vld [vmem:[%s13062_s23 + $0x1c4] ss:$8 sps:$4 sm:$0xff]  }
 0x37a   :  { %v695_v11 = vmax.f32 %v693_v10, 0.0  ;;  %1742 = vmatprep.subr.bf16.mxu0 %v8487_v4  ;;  %v8547_v4 = vld [vmem:[%s13062_s23 + $0x3a4] ss:$8 sps:$4 sm:$0xff]  }
 0x37b   :  { %v696_v12 = vmax.f32 %v694_v58, 0.0  ;;  %v8470_v58 = vld [vmem:[%s13062_s23 + $0x100] ss:$8 sps:$4 sm:$0xff]  }
 0x37c   :  { %v697_v14 = vpack.c.bf16 %v695_v11, %v695_v11 }
 0x37d   :  { %v698_v16 = vpack.c.bf16 %v696_v12, %v696_v12 }
 0x37e   :  { %v706_v19 = vsel %vm704_vm1, %v697_v14, 0  ;;  %v8478_v14 = vld [vmem:[%s13062_s23 + $0x114] ss:$8 sps:$4 sm:$0xff]  }
 0x37f   :  { %7263 = vmatprep.subr.msk.bf16.mxu1 %vm704_vm1, %v698_v16 }
 0x380   :  { %712 = vmatpush1.bf16.msra.mxu1 %v706_v19 }
 0x381   :  { %7266 = vmatprep.subr.msk.bf16.mxu1 %vm704_vm1, %v698_v16 }
 0x383   :  { %7264 = vmatmul.mubr.msk.bf16.vlgmr.msra.gmra.mrb[4].mxu1 %vm700_vm2, %v699_v20  ;;  %v8484_v20 = vld [vmem:[%s13062_s23 + $0x124] ss:$8 sps:$4 sm:$0xff]  }
 0x384   :  { %760 = vmatpush1.bf16.msra.mxu1 %v706_v19  ;;  %791 = vmatprep.mubr.bf16.mxu1 %v13010_v13 }
 0x385   :  { %7269 = vmatprep.subr.msk.bf16.mxu1 %vm704_vm1, %v698_v16 }
 0x38b   :  { %7267 = vmatmul.mubr.msk.bf16.vlgmr.msra.gmra.mrb[8].mxu1 %vm700_vm2, %v7265_v59 }
 0x38c   :  { %808 = vmatpush1.bf16.msra.mxu1 %v706_v19  ;;  %839 = vmatprep.mubr.bf16.mxu1 %v13010_v13  ;;  %v8476_v19 = vld [vmem:[%s13062_s23 + $0x110] ss:$8 sps:$4 sm:$0xff]  }
 0x38d   :  { %1234 = vmatprep.subr.bf16.mxu1 %v8382_v61 }
 0x393   :  { %7270 = vmatmul.mubr.msk.bf16.vlgmr.msra.gmra.mrb[12].mxu1 %vm700_vm2, %v7268_v23 }
 0x394   :  { %1235 = vmatpush1.bf16.msra.mxu1 %v8380_v24 }
 0x395   :  { %1236 = vmatprep.subr.bf16.mxu1 %v8385_v31  ;;  %v8482_v31 = vld [vmem:[%s13062_s23 + $0x120] ss:$8 sps:$4 sm:$0xff]  }
 0x398   :  { %1237 = vmatpush1.bf16.msra.mxu1 %v8383_v15  ;;  %v8485_v15 = vld [vmem:[%s13062_s23 + $0x300] ss:$8 sps:$4 sm:$0xff]  }
 0x399   :  { %1238 = vmatprep.subr.bf16.mxu1 %v8388_v17 }
 0x39c   :  { %1239 = vmatpush1.bf16.msra.mxu1 %v8386_v18 }
 0x39d   :  { %1240 = vmatprep.subr.bf16.mxu1 %v8394_v21  ;;  %v8490_v21 = vld [vmem:[%s13062_s23 + $0x134] ss:$8 sps:$4 sm:$0xff]  }
 0x3a0   :  { %1241 = vmatpush1.bf16.msra.mxu1 %v8392_v22  ;;  %v8493_v22 = vld [vmem:[%s13062_s23 + $0x314] ss:$8 sps:$4 sm:$0xff]  }
 0x3a1   :  { %1242 = vmatprep.subr.bf16.mxu1 %v8400_v26  ;;  %v8488_v26 = vld [vmem:[%s13062_s23 + $0x130] ss:$8 sps:$4 sm:$0xff]  }
 0x3a4   :  { %1243 = vmatpush1.bf16.msra.mxu1 %v8398_v27  ;;  %v8491_v27 = vld [vmem:[%s13062_s23 + $0x310] ss:$8 sps:$4 sm:$0xff]  }
 0x3a5   :  { %1244 = vmatprep.subr.bf16.mxu1 %v8406_v28  ;;  %v8496_v28 = vld [vmem:[%s13062_s23 + $0x144] ss:$8 sps:$4 sm:$0xff]  }
 0x3a8   :  { %1245 = vmatpush1.bf16.msra.mxu1 %v8404_v30  ;;  %v8499_v30 = vld [vmem:[%s13062_s23 + $0x324] ss:$8 sps:$4 sm:$0xff]  }
 0x3a9   :  { %1246 = vmatprep.subr.bf16.mxu1 %v8412_v32  ;;  %v8494_v32 = vld [vmem:[%s13062_s23 + $0x140] ss:$8 sps:$4 sm:$0xff]  }
 0x3ac   :  { %1247 = vmatpush1.bf16.msra.mxu1 %v8410_v35  ;;  %v8497_v35 = vld [vmem:[%s13062_s23 + $0x320] ss:$8 sps:$4 sm:$0xff]  }
 0x3ad   :  { %1248 = vmatprep.subr.bf16.mxu1 %v8418_v37  ;;  %v8502_v37 = vld [vmem:[%s13062_s23 + $0x154] ss:$8 sps:$4 sm:$0xff]  }
 0x3b0   :  { %1249 = vmatpush1.bf16.msra.mxu1 %v8416_v38  ;;  %v8505_v38 = vld [vmem:[%s13062_s23 + $0x334] ss:$8 sps:$4 sm:$0xff]  }
 0x3b1   :  { %1250 = vmatprep.subr.bf16.mxu1 %v8424_v39  ;;  %v8500_v39 = vld [vmem:[%s13062_s23 + $0x150] ss:$8 sps:$4 sm:$0xff]  }
 0x3b4   :  { %1251 = vmatpush1.bf16.msra.mxu1 %v8422_v40  ;;  %v8503_v40 = vld [vmem:[%s13062_s23 + $0x330] ss:$8 sps:$4 sm:$0xff]  }
 0x3b5   :  { %1252 = vmatprep.subr.bf16.mxu1 %v8430_v41  ;;  %v8508_v41 = vld [vmem:[%s13062_s23 + $0x164] ss:$8 sps:$4 sm:$0xff]  }
 0x3b8   :  { %1253 = vmatpush1.bf16.msra.mxu1 %v8428_v42  ;;  %v8511_v42 = vld [vmem:[%s13062_s23 + $0x344] ss:$8 sps:$4 sm:$0xff]  }
 0x3b9   :  { %1254 = vmatprep.subr.bf16.mxu1 %v8436_v43  ;;  %v8506_v43 = vld [vmem:[%s13062_s23 + $0x160] ss:$8 sps:$4 sm:$0xff]  }
 0x3bc   :  { %1255 = vmatpush1.bf16.msra.mxu1 %v8434_v44  ;;  %v8509_v44 = vld [vmem:[%s13062_s23 + $0x340] ss:$8 sps:$4 sm:$0xff]  }
 0x3bd   :  { %1256 = vmatprep.subr.bf16.mxu1 %v8442_v45  ;;  %v8514_v45 = vld [vmem:[%s13062_s23 + $0x174] ss:$8 sps:$4 sm:$0xff]  }
 0x3c0   :  { %1257 = vmatpush1.bf16.msra.mxu1 %v8440_v46  ;;  %v8517_v46 = vld [vmem:[%s13062_s23 + $0x354] ss:$8 sps:$4 sm:$0xff]  }
 0x3c1   :  { %1258 = vmatprep.subr.bf16.mxu1 %v8448_v47  ;;  %v8512_v47 = vld [vmem:[%s13062_s23 + $0x170] ss:$8 sps:$4 sm:$0xff]  }
 0x3c4   :  { %1259 = vmatpush1.bf16.msra.mxu1 %v8446_v48  ;;  %v8515_v48 = vld [vmem:[%s13062_s23 + $0x350] ss:$8 sps:$4 sm:$0xff]  }
 0x3c5   :  { %1260 = vmatprep.subr.bf16.mxu1 %v8454_v49  ;;  %v8520_v49 = vld [vmem:[%s13062_s23 + $0x184] ss:$8 sps:$4 sm:$0xff]  }
 0x3c8   :  { %1261 = vmatpush1.bf16.msra.mxu1 %v8452_v51  ;;  %v8518_v51 = vld [vmem:[%s13062_s23 + $0x180] ss:$8 sps:$4 sm:$0xff]  }
 0x3c9   :  { %1262 = vmatprep.subr.bf16.mxu1 %v8460_v54  ;;  %v8529_v54 = vld [vmem:[%s13062_s23 + $0x374] ss:$8 sps:$4 sm:$0xff]  }
 0x3cc   :  { %1263 = vmatpush1.bf16.msra.mxu1 %v8458_v53  ;;  %v8526_v53 = vld [vmem:[%s13062_s23 + $0x194] ss:$8 sps:$4 sm:$0xff]  }
 0x3cd   :  { %1264 = vmatprep.subr.bf16.mxu1 %v8466_v34  ;;  %v8532_v34 = vld [vmem:[%s13062_s23 + $0x1a4] ss:$8 sps:$4 sm:$0xff]  }
 0x3d0   :  { %1265 = vmatpush1.bf16.msra.mxu1 %v8464_v57  ;;  %v8530_v57 = vld [vmem:[%s13062_s23 + $0x1a0] ss:$8 sps:$4 sm:$0xff]  }
 0x3d1   :  { %1275 = vmatprep.subr.bf16.mxu1 %v8472_v63  ;;  %v8538_v63 = vld [vmem:[%s13062_s23 + $0x1b4] ss:$8 sps:$4 sm:$0xff]  }
 0x456   :  { %v10116_v5 = vpop.f32.mrb[4].mxu1 }
 0x457   :  { %v747_v6 = vpop.f32.mrb[5].mxu1 }
 0x458   :  { %v749_v7 = vpop.f32.mrb[6].mxu1  ;;  %v753_v16 = vpack.c.bf16 %v747_v6, %v747_v6  ;;  %v8542_v6 = vld [vmem:[%s13062_s23 + $0x1c0] ss:$8 sps:$4 sm:$0xff]  }
 0x459   :  { %v750_v56 = vpop.f32.mrb[7].mxu1  ;;  %v8545_v7 = vld [vmem:[%s13062_s23 + $0x3a0] ss:$8 sps:$4 sm:$0xff]  }
 0x45a   :  { %v8550_v56 = vld [vmem:[%s13062_s23 + $0x1d4] ss:$8 sps:$4 sm:$0xff]  }
 0x45e   :  { %v793_v25 = vpop.f32.mrb[8].mxu1 }
 0x45f   :  { %v795_v8 = vpop.f32.mrb[9].mxu1  ;;  %v10121_v11 = vpack.c.bf16 %v793_v25, %v793_v25  ;;  %v8553_v25 = vld [vmem:[%s13062_s23 + $0x3b4] ss:$8 sps:$4 sm:$0xff]  }
 0x460   :  { %v801_v9 = vpack.c.bf16 %v795_v8, %v795_v8  ;;  %v797_v10 = vpop.f32.mrb[10].mxu1  ;;  %v8548_v8 = vld [vmem:[%s13062_s23 + $0x1d0] ss:$8 sps:$4 sm:$0xff]  }
 0x461   :  { %v798_v12 = vpop.f32.mrb[11].mxu1  ;;  %v8556_v10 = vld [vmem:[%s13062_s23 + $0x1e4] ss:$8 sps:$4 sm:$0xff]  }
 0x462   :  { %1266 = vmatprep.mubr.bf16.mxu1 %v801_v9  ;;  %v8554_v12 = vld [vmem:[%s13062_s23 + $0x1e0] ss:$8 sps:$4 sm:$0xff]  }
 0x463   :  { %1267 = vmatmul.mubr.bf16.vlgmr.msra.gmra.mrb[16].mxu1 %v10121_v11 }
 0x464   :  { %1276 = vmatpush1.bf16.msra.mxu1 %v8470_v58  ;;  %1307 = vmatprep.mubr.bf16.mxu1 %v753_v16  ;;  %v8559_v58 = vld [vmem:[%s13062_s23 + $0x3c4] ss:$8 sps:$4 sm:$0xff]   ;;  %v8562_v16 = vld [vmem:[%s13062_s23 + $0x1f4] ss:$8 sps:$4 sm:$0xff]  }
 0x465   :  { %1277 = vmatprep.subr.bf16.mxu1 %v8478_v14  ;;  %v8557_v14 = vld [vmem:[%s13062_s23 + $0x3c0] ss:$8 sps:$4 sm:$0xff]  }
 0x466   :  { %v841_v59 = vpop.f32.mrb[12].mxu1 }
 0x467   :  { %v843_v61 = vpop.f32.mrb[13].mxu1  ;;  %v848_v17 = vpack.c.bf16 %v841_v59, %v841_v59  ;;  %v8563_v59 = vld [vmem:[%s13062_s23 + $0x3d0] ss:$8 sps:$4 sm:$0xff]  }
 0x468   :  { %v849_v23 = vpack.c.bf16 %v843_v61, %v843_v61  ;;  %1278 = vmatpush1.bf16.msra.mxu1 %v8476_v19  ;;  %v845_v24 = vpop.f32.mrb[14].mxu1  ;;  %v8565_v19 = vld [vmem:[%s13062_s23 + $0x3d4] ss:$8 sps:$4 sm:$0xff]   ;;  %v8568_v61 = vld [vmem:[%s13062_s23 + $0x3e4] ss:$8 sps:$4 sm:$0xff]  }
 0x469   :  { %v846_v18 = vpop.f32.mrb[15].mxu1  ;;  %1279 = vmatprep.subr.bf16.mxu1 %v8484_v20  ;;  %v8560_v20 = vld [vmem:[%s13062_s23 + $0x1f0] ss:$8 sps:$4 sm:$0xff]   ;;  %v8566_v24 = vld [vmem:[%s13062_s23 + $0x3e0] ss:$8 sps:$4 sm:$0xff]  }
 0x46a   :  { %1733 = vmatprep.mubr.bf16.mxu0 %v849_v23  ;;  %v10301_v23 = vld [vmem:[%s12989_s7 + $0x4] ss:$8 sps:$4 sm:$0xff]   ;;  %v10320_v18 = vld [vmem:[%s12989_s7 + $0x14] ss:$8 sps:$4 sm:$0xff]  }
 0x46b   :  { %1734 = vmatmul.mubr.bf16.vlgmr.msra.gmra.mrb[12].mxu0 %v848_v17  ;;  %v8571_v17 = vld [vmem:[%s13062_s23 + $0x3f4] ss:$8 sps:$4 sm:$0xff]  }
 0x46c   :  { %1280 = vmatpush1.bf16.msra.mxu1 %v8482_v31  ;;  %1743 = vmatpush1.bf16.msra.mxu0 %v8485_v15  ;;  %v10309_v31 = vld [vmem:[%s12989_s7] ss:$8 sps:$4 sm:$0xff]   ;;  %v752_v15 = vpack.c.bf16 %v10116_v5, %v10116_v5  ;;  %v10329_v5 = vld [vmem:[%s12989_s7 + $0x10] ss:$8 sps:$4 sm:$0xff]  }
 0x46d   :  { %1774 = vmatprep.mubr.bf16.mxu0 %v801_v9  ;;  %1281 = vmatprep.subr.bf16.mxu1 %v8490_v21  ;;  %v8551_v9 = vld [vmem:[%s13062_s23 + $0x3b0] ss:$8 sps:$4 sm:$0xff]  }
 0x46e   :  { %1744 = vmatprep.subr.bf16.mxu0 %v8493_v22  ;;  %v8569_v21 = vld [vmem:[%s13062_s23 + $0x3f0] ss:$8 sps:$4 sm:$0xff]   ;;  %v10335_v22 = vld [vmem:[%s12989_s7 + $0x24] ss:$8 sps:$4 sm:$0xff]  }
 0x470   :  { %1282 = vmatpush1.bf16.msra.mxu1 %v8488_v26  ;;  %1745 = vmatpush1.bf16.msra.mxu0 %v8491_v27  ;;  %v10341_v26 = vld [vmem:[%s12989_s7 + $0x20] ss:$8 sps:$4 sm:$0xff]   ;;  %v10347_v27 = vld [vmem:[%s12989_s7 + $0x34] ss:$8 sps:$4 sm:$0xff]  }
 0x471   :  { %1283 = vmatprep.subr.bf16.mxu1 %v8496_v28  ;;  %1746 = vmatprep.subr.bf16.mxu0 %v8499_v30  ;;  %v10355_v28 = vld [vmem:[%s12989_s7 + $0x30] ss:$8 sps:$4 sm:$0xff]   ;;  %v10362_v30 = vld [vmem:[%s12989_s7 + $0x44] ss:$8 sps:$4 sm:$0xff]  }
 0x474   :  { %1284 = vmatpush1.bf16.msra.mxu1 %v8494_v32  ;;  %1747 = vmatpush1.bf16.msra.mxu0 %v8497_v35  ;;  %v10376_v32 = vld [vmem:[%s12989_s7 + $0x54] ss:$8 sps:$4 sm:$0xff]   ;;  %v10383_v35 = vld [vmem:[%s12989_s7 + $0x50] ss:$8 sps:$4 sm:$0xff]  }
 0x475   :  { %1285 = vmatprep.subr.bf16.mxu1 %v8502_v37  ;;  %1748 = vmatprep.subr.bf16.mxu0 %v8505_v38  ;;  %v10390_v37 = vld [vmem:[%s12989_s7 + $0x64] ss:$8 sps:$4 sm:$0xff]   ;;  %v10397_v38 = vld [vmem:[%s12989_s7 + $0x60] ss:$8 sps:$4 sm:$0xff]  }
 0x478   :  { %1286 = vmatpush1.bf16.msra.mxu1 %v8500_v39  ;;  %1749 = vmatpush1.bf16.msra.mxu0 %v8503_v40  ;;  %v10404_v39 = vld [vmem:[%s12989_s7 + $0x74] ss:$8 sps:$4 sm:$0xff]   ;;  %v10411_v40 = vld [vmem:[%s12989_s7 + $0x70] ss:$8 sps:$4 sm:$0xff]  }
 0x479   :  { %1287 = vmatprep.subr.bf16.mxu1 %v8508_v41  ;;  %1750 = vmatprep.subr.bf16.mxu0 %v8511_v42  ;;  %v10425_v41 = vld [vmem:[%s12989_s7 + $0x84] ss:$8 sps:$4 sm:$0xff]   ;;  %v10430_v42 = vld [vmem:[%s12989_s7 + $0x80] ss:$8 sps:$4 sm:$0xff]  }
 0x47c   :  { %1288 = vmatpush1.bf16.msra.mxu1 %v8506_v43  ;;  %1751 = vmatpush1.bf16.msra.mxu0 %v8509_v44  ;;  %v10439_v43 = vld [vmem:[%s12989_s7 + $0x94] ss:$8 sps:$4 sm:$0xff]   ;;  %v10444_v44 = vld [vmem:[%s12989_s7 + $0x90] ss:$8 sps:$4 sm:$0xff]  }
 0x47d   :  { %1289 = vmatprep.subr.bf16.mxu1 %v8514_v45  ;;  %1752 = vmatprep.subr.bf16.mxu0 %v8517_v46  ;;  %v10453_v45 = vld [vmem:[%s12989_s7 + $0xa4] ss:$8 sps:$4 sm:$0xff]   ;;  %v10458_v46 = vld [vmem:[%s12989_s7 + $0xa0] ss:$8 sps:$4 sm:$0xff]  }
 0x480   :  { %1290 = vmatpush1.bf16.msra.mxu1 %v8512_v47  ;;  %1753 = vmatpush1.bf16.msra.mxu0 %v8515_v48  ;;  %v10467_v47 = vld [vmem:[%s12989_s7 + $0xb4] ss:$8 sps:$4 sm:$0xff]   ;;  %v10472_v48 = vld [vmem:[%s12989_s7 + $0xb0] ss:$8 sps:$4 sm:$0xff]  }
 0x481   :  { %1291 = vmatprep.subr.bf16.mxu1 %v8520_v49  ;;  %1754 = vmatprep.subr.bf16.mxu0 %v8523_v50  ;;  %v10481_v49 = vld [vmem:[%s12989_s7 + $0xc4] ss:$8 sps:$4 sm:$0xff]   ;;  %v10486_v50 = vld [vmem:[%s12989_s7 + $0xc0] ss:$8 sps:$4 sm:$0xff]  }
 0x484   :  { %1292 = vmatpush1.bf16.msra.mxu1 %v8518_v51  ;;  %1755 = vmatpush1.bf16.msra.mxu0 %v8521_v52  ;;  %v10495_v51 = vld [vmem:[%s12989_s7 + $0xd4] ss:$8 sps:$4 sm:$0xff]   ;;  %v10500_v52 = vld [vmem:[%s12989_s7 + $0xd0] ss:$8 sps:$4 sm:$0xff]  }
 0x485   :  { %1293 = vmatprep.subr.bf16.mxu1 %v8526_v53  ;;  %1756 = vmatprep.subr.bf16.mxu0 %v8529_v54  ;;  %v10505_v53 = vld [vmem:[%s12989_s7 + $0xe4] ss:$8 sps:$4 sm:$0xff]   ;;  %v10513_v54 = vld [vmem:[%s12989_s7 + $0xe0] ss:$8 sps:$4 sm:$0xff]  }
 0x488   :  { %1294 = vmatpush1.bf16.msra.mxu1 %v8524_v55  ;;  %1757 = vmatpush1.bf16.msra.mxu0 %v8527_v33  ;;  %v10520_v55 = vld [vmem:[%s12989_s7 + $0xf4] ss:$8 sps:$4 sm:$0xff]   ;;  %v10527_v33 = vld [vmem:[%s12989_s7 + $0xf0] ss:$8 sps:$4 sm:$0xff]  }
 0x489   :  { %1295 = vmatprep.subr.bf16.mxu1 %v8532_v34  ;;  %1758 = vmatprep.subr.bf16.mxu0 %v8535_v36 }
 0x48c   :  { %1296 = vmatpush1.bf16.msra.mxu1 %v8530_v57  ;;  %1759 = vmatpush1.bf16.msra.mxu0 %v8533_v60 }
 0x48d   :  { %1297 = vmatprep.subr.bf16.mxu1 %v8538_v63  ;;  %1760 = vmatprep.subr.bf16.mxu0 %v8541_v0 }
 0x490   :  { %1298 = vmatpush1.bf16.msra.mxu1 %v8536_v1  ;;  %1761 = vmatpush1.bf16.msra.mxu0 %v8539_v2 }
 0x491   :  { %1299 = vmatprep.subr.bf16.mxu1 %v8544_v3  ;;  %1762 = vmatprep.subr.bf16.mxu0 %v8547_v4 }
 0x494   :  { %1300 = vmatpush1.bf16.msra.mxu1 %v8542_v6  ;;  %1763 = vmatpush1.bf16.msra.mxu0 %v8545_v7 }
 0x495   :  { %1301 = vmatprep.subr.bf16.mxu1 %v8550_v56  ;;  %1764 = vmatprep.subr.bf16.mxu0 %v8553_v25 }
 0x498   :  { %1302 = vmatpush1.bf16.msra.mxu1 %v8548_v8  ;;  %1765 = vmatpush1.bf16.msra.mxu0 %v8551_v9 }
 0x499   :  { %1303 = vmatprep.subr.bf16.mxu1 %v8556_v10  ;;  %1766 = vmatprep.subr.bf16.mxu0 %v8559_v58 }
 0x49c   :  { %1304 = vmatpush1.bf16.msra.mxu1 %v8554_v12  ;;  %1767 = vmatpush1.bf16.msra.mxu0 %v8557_v14 }
 0x49d   :  { %1305 = vmatprep.subr.bf16.mxu1 %v8562_v16  ;;  %1768 = vmatprep.subr.bf16.mxu0 %v8565_v19 }
 0x4a0   :  { %1306 = vmatpush1.bf16.msra.mxu1 %v8560_v20  ;;  %1769 = vmatpush1.bf16.msra.mxu0 %v8563_v59 }
 0x4a1   :  { %1770 = vmatprep.subr.bf16.mxu0 %v8568_v61  ;;  %2011 = vmatprep.subr.bf16.mxu1 %v10301_v23 }
 0x4a3   :  { %1308 = vmatmul.mubr.bf16.vlgmr.msra.gmra.mrb[16].mxu1 %v752_v15 }
 0x4a4   :  { %1771 = vmatpush1.bf16.msra.mxu0 %v8566_v24  ;;  %2012 = vmatpush1.bf16.msra.mxu1 %v10309_v31 }
 0x4a5   :  { %1772 = vmatprep.subr.bf16.mxu0 %v8571_v17  ;;  %2013 = vmatprep.subr.bf16.mxu1 %v10320_v18 }
 0x4a8   :  { %1773 = vmatpush1.bf16.msra.mxu0 %v8569_v21  ;;  %2014 = vmatpush1.bf16.msra.mxu1 %v10329_v5 }
 0x4a9   :  { %2015 = vmatprep.subr.bf16.mxu1 %v10335_v22  ;;  %2145 = vmatprep.subr.bf16.mxu0 %v10301_v23 }
 0x4ab   :  { %1775 = vmatmul.mubr.bf16.vlgmr.msra.gmra.mrb[12].mxu0 %v10121_v11  ;;  %v10369_v11 = vld [vmem:[%s12989_s7 + $0x40] ss:$8 sps:$4 sm:$0xff]  }
 0x4ac   :  { %2016 = vmatpush1.bf16.msra.mxu1 %v10341_v26  ;;  %2146 = vmatpush1.bf16.msra.mxu0 %v10309_v31 }
 0x4ad   :  { %2017 = vmatprep.subr.bf16.mxu1 %v10347_v27  ;;  %2147 = vmatprep.subr.bf16.mxu0 %v10320_v18 }
 0x4b0   :  { %2018 = vmatpush1.bf16.msra.mxu1 %v10355_v28  ;;  %2148 = vmatpush1.bf16.msra.mxu0 %v10329_v5 }
 0x4b1   :  { %2019 = vmatprep.subr.bf16.mxu1 %v10362_v30  ;;  %2149 = vmatprep.subr.bf16.mxu0 %v10335_v22 }
 0x4b4   :  { %2020 = vmatpush1.bf16.msra.mxu1 %v10369_v11  ;;  %2150 = vmatpush1.bf16.msra.mxu0 %v10341_v26 }
 0x4b5   :  { %2021 = vmatprep.subr.bf16.mxu1 %v10376_v32  ;;  %2151 = vmatprep.subr.bf16.mxu0 %v10347_v27 }
 0x4b8   :  { %2022 = vmatpush1.bf16.msra.mxu1 %v10383_v35  ;;  %2152 = vmatpush1.bf16.msra.mxu0 %v10355_v28 }
 0x4b9   :  { %2023 = vmatprep.subr.bf16.mxu1 %v10390_v37  ;;  %2153 = vmatprep.subr.bf16.mxu0 %v10362_v30 }
 0x4bc   :  { %2024 = vmatpush1.bf16.msra.mxu1 %v10397_v38  ;;  %2154 = vmatpush1.bf16.msra.mxu0 %v10369_v11 }
 0x4bd   :  { %2025 = vmatprep.subr.bf16.mxu1 %v10404_v39  ;;  %2155 = vmatprep.subr.bf16.mxu0 %v10376_v32 }
 0x4c0   :  { %2026 = vmatpush1.bf16.msra.mxu1 %v10411_v40  ;;  %2156 = vmatpush1.bf16.msra.mxu0 %v10383_v35 }
 0x4c1   :  { %2157 = vmatprep.subr.bf16.mxu0 %v10390_v37  ;;  %2027 = vmatprep.subr.bf16.mxu1 %v10425_v41 }
 0x4c4   :  { %2158 = vmatpush1.bf16.msra.mxu0 %v10397_v38  ;;  %2028 = vmatpush1.bf16.msra.mxu1 %v10430_v42 }
 0x4c5   :  { %2159 = vmatprep.subr.bf16.mxu0 %v10404_v39  ;;  %2029 = vmatprep.subr.bf16.mxu1 %v10439_v43 }
 0x4c8   :  { %2160 = vmatpush1.bf16.msra.mxu0 %v10411_v40  ;;  %2030 = vmatpush1.bf16.msra.mxu1 %v10444_v44 }
 0x4c9   :  { %2161 = vmatprep.subr.bf16.mxu0 %v10425_v41  ;;  %2031 = vmatprep.subr.bf16.mxu1 %v10453_v45 }
 0x4cc   :  { %2162 = vmatpush1.bf16.msra.mxu0 %v10430_v42  ;;  %2032 = vmatpush1.bf16.msra.mxu1 %v10458_v46 }
 0x4cd   :  { %2163 = vmatprep.subr.bf16.mxu0 %v10439_v43  ;;  %2033 = vmatprep.subr.bf16.mxu1 %v10467_v47 }
 0x4d0   :  { %2164 = vmatpush1.bf16.msra.mxu0 %v10444_v44  ;;  %2034 = vmatpush1.bf16.msra.mxu1 %v10472_v48 }
 0x4d1   :  { %2165 = vmatprep.subr.bf16.mxu0 %v10453_v45  ;;  %2035 = vmatprep.subr.bf16.mxu1 %v10481_v49 }
 0x4d4   :  { %2166 = vmatpush1.bf16.msra.mxu0 %v10458_v46  ;;  %2036 = vmatpush1.bf16.msra.mxu1 %v10486_v50 }
 0x4d5   :  { %2167 = vmatprep.subr.bf16.mxu0 %v10467_v47  ;;  %2037 = vmatprep.subr.bf16.mxu1 %v10495_v51 }
 0x4d8   :  { %2168 = vmatpush1.bf16.msra.mxu0 %v10472_v48  ;;  %2038 = vmatpush1.bf16.msra.mxu1 %v10500_v52 }
 0x4d9   :  { %2169 = vmatprep.subr.bf16.mxu0 %v10481_v49  ;;  %2039 = vmatprep.subr.bf16.mxu1 %v10505_v53 }
 0x4dc   :  { %2170 = vmatpush1.bf16.msra.mxu0 %v10486_v50  ;;  %2040 = vmatpush1.bf16.msra.mxu1 %v10513_v54 }
 0x4dd   :  { %2171 = vmatprep.subr.bf16.mxu0 %v10495_v51  ;;  %2041 = vmatprep.subr.bf16.mxu1 %v10520_v55 }
 0x4e0   :  { %2172 = vmatpush1.bf16.msra.mxu0 %v10500_v52  ;;  %2042 = vmatpush1.bf16.msra.mxu1 %v10527_v33 }
 0x4e1   :  { %2173 = vmatprep.subr.bf16.mxu0 %v10505_v53  ;;  %2052 = vmatprep.subr.bf16.mxu1 %v10301_v23 }
 0x4e4   :  { %2174 = vmatpush1.bf16.msra.mxu0 %v10513_v54 }
 0x4e5   :  { %2175 = vmatprep.subr.bf16.mxu0 %v10520_v55 }
 0x4e8   :  { %2176 = vmatpush1.bf16.msra.mxu0 %v10527_v33 }
 0x4e9   :  { %2186 = vmatprep.subr.bf16.mxu0 %v10301_v23 }
 0x576   :  { %v10536_v34 = vpop.f32.mrb[16].mxu1 }
 0x577   :  { %v1783_v36 = vrot.slane %v10536_v34, 4  ;;  %v10539_v57 = vpop.f32.mrb[17].mxu1 }
 0x578   :  { %v1789_v60 = vrot.slane %v10539_v57, 4  ;;  %v1313_v63 = vpop.f32.mrb[18].mxu1 }
 0x579   :  { %v1784_v0 = vadd.f32 %v1783_v36, %v10536_v34  ;;  %v1314_v1 = vpop.f32.mrb[19].mxu1 }
 0x57a   :  { %v1790_v2 = vadd.f32 %v1789_v60, %v10539_v57 }
 0x57b   :  { %v1785_v3 = vrot.slane %v1784_v0, 2 }
 0x57c   :  { %v1791_v4 = vrot.slane %v1790_v2, 2 }
 0x57d   :  { %v1786_v9 = vadd.f32 %v1785_v3, %v1784_v0 }
 0x57e   :  { %v10544_v6 = vpop.f32.mrb[12].mxu0  ;;  %v1792_v12 = vadd.f32 %v1791_v4, %v1790_v2 }
 0x57f   :  { %v1795_v7 = vrot.slane %v10544_v6, 4  ;;  %v10547_v56 = vpop.f32.mrb[13].mxu0  ;;  %v1787_v20 = vrot.slane %v1786_v9, 1 }
 0x580   :  { %v1801_v25 = vrot.slane %v10547_v56, 4  ;;  %v1780_v8 = vpop.f32.mrb[14].mxu0  ;;  %v1793_v61 = vrot.slane %v1792_v12, 1 }
 0x581   :  { %v1796_v10 = vadd.f32 %v1795_v7, %v10544_v6  ;;  %v1781_v58 = vpop.f32.mrb[15].mxu0  ;;  %v1788_v17 = vadd.f32 %v1787_v20, %v1786_v9 }
 0x582   :  { %v1802_v14 = vadd.f32 %v1801_v25, %v10547_v56  ;;  %v1794_v36 = vadd.f32 %v1793_v61, %v1792_v12 }
 0x583   :  { %v1797_v16 = vrot.slane %v1796_v10, 2 }
 0x584   :  { %v1803_v19 = vrot.slane %v1802_v14, 2 }
 0x585   :  { %v1798_v59 = vadd.f32 %v1797_v16, %v1796_v10 }
 0x586   :  { %v1804_v23 = vadd.f32 %v1803_v19, %v1802_v14 }
 0x587   :  { %v1799_v24 = vrot.slane %v1798_v59, 1 }
 0x588   :  { %v1805_v15 = vrot.slane %v1804_v23, 1 }
 0x589   :  { %v1800_v21 = vadd.f32 %v1799_v24, %v1798_v59 }
 0x58a   :  { %v1806_v60 = vadd.f32 %v1805_v15, %v1804_v23 }
 0x58b   :  { %v1807_v63 = vadd.f32 %v1800_v21, %v1788_v17 }
 0x58c   :  { %v1808_v0 = vadd.f32 %v1806_v60, %v1794_v36 }
 0x58d   :  { %v1809_v1 = vmul.f32 0.0078125, %v1807_v63 }
 0x58e   :  { %v1810_v3 = vmul.f32 0.0078125, %v1808_v0 }
 0x58f   :  { %v1843_v7 = vpack.c.bf16 %v1809_v1, %v1809_v1 }
 0x590   :  { %v1844_v2 = vpack.c.bf16 %v1810_v3, %v1810_v3 }
 0x591   :  { %v1845_v4 = vunpack.c.l.bf16 %v1843_v7 }
 0x592   :  { %v1846_v25 = vunpack.c.l.bf16 %v1844_v2 }
 0x593   :  { %v1847_v8 = vsub.f32 %v1809_v1, %v1845_v4 }
 0x594   :  { %v1848_v58 = vsub.f32 %v1810_v3, %v1846_v25 }
 0x595   :  { %v1849_v10 = vpack.c.bf16 %v1847_v8, %v1847_v8 }
 0x596   :  { %v1850_v13 = vpack.c.bf16 %v1848_v58, %v1848_v58 }
 0x598   :  { %2043 = vmatprep.mubr.bf16.mxu1 %v1850_v13  ;;  %v13067_v13 = vmov 0  }
 0x599   :  { %2044 = vmatmul.mubr.bf16.vlgmr.msra.gmra.mrb[20].mxu1 %v1849_v10 }
 0x59a   :  { %2053 = vmatpush1.bf16.msra.mxu1 %v10309_v31  ;;  %2084 = vmatprep.mubr.bf16.mxu1 %v1844_v2 }
 0x59b   :  { %2054 = vmatprep.subr.bf16.mxu1 %v10320_v18 }
 0x59e   :  { %2055 = vmatpush1.bf16.msra.mxu1 %v10329_v5 }
 0x59f   :  { %2056 = vmatprep.subr.bf16.mxu1 %v10335_v22 }
 0x5a2   :  { %2057 = vmatpush1.bf16.msra.mxu1 %v10341_v26 }
 0x5a3   :  { %2058 = vmatprep.subr.bf16.mxu1 %v10347_v27 }
 0x5a6   :  { %2059 = vmatpush1.bf16.msra.mxu1 %v10355_v28 }
 0x5a7   :  { %2060 = vmatprep.subr.bf16.mxu1 %v10362_v30 }
 0x5aa   :  { %2061 = vmatpush1.bf16.msra.mxu1 %v10369_v11 }
 0x5ab   :  { %2062 = vmatprep.subr.bf16.mxu1 %v10376_v32 }
 0x5ae   :  { %2063 = vmatpush1.bf16.msra.mxu1 %v10383_v35 }
 0x5af   :  { %2064 = vmatprep.subr.bf16.mxu1 %v10390_v37 }
 0x5b2   :  { %2065 = vmatpush1.bf16.msra.mxu1 %v10397_v38 }
 0x5b3   :  { %2066 = vmatprep.subr.bf16.mxu1 %v10404_v39 }
 0x5b6   :  { %2067 = vmatpush1.bf16.msra.mxu1 %v10411_v40 }
 0x5b7   :  { %2068 = vmatprep.subr.bf16.mxu1 %v10425_v41 }
 0x5ba   :  { %2069 = vmatpush1.bf16.msra.mxu1 %v10430_v42 }
 0x5bb   :  { %2070 = vmatprep.subr.bf16.mxu1 %v10439_v43 }
 0x5be   :  { %2071 = vmatpush1.bf16.msra.mxu1 %v10444_v44 }
 0x5bf   :  { %2072 = vmatprep.subr.bf16.mxu1 %v10453_v45 }
 0x5c2   :  { %2073 = vmatpush1.bf16.msra.mxu1 %v10458_v46 }
 0x5c3   :  { %2074 = vmatprep.subr.bf16.mxu1 %v10467_v47 }
 0x5c6   :  { %2075 = vmatpush1.bf16.msra.mxu1 %v10472_v48 }
 0x5c7   :  { %2076 = vmatprep.subr.bf16.mxu1 %v10481_v49 }
 0x5ca   :  { %2077 = vmatpush1.bf16.msra.mxu1 %v10486_v50 }
 0x5cb   :  { %2078 = vmatprep.subr.bf16.mxu1 %v10495_v51 }
 0x5ce   :  { %2079 = vmatpush1.bf16.msra.mxu1 %v10500_v52 }
 0x5cf   :  { %2080 = vmatprep.subr.bf16.mxu1 %v10505_v53 }
 0x5d2   :  { %2081 = vmatpush1.bf16.msra.mxu1 %v10513_v54 }
 0x5d3   :  { %2082 = vmatprep.subr.bf16.mxu1 %v10520_v55 }
 0x5d6   :  { %2083 = vmatpush1.bf16.msra.mxu1 %v10527_v33 }
 0x5d9   :  { %2085 = vmatmul.mubr.bf16.vlgmr.msra.gmra.mrb[20].mxu1 %v1843_v7 }
 0x5da   :  { %2322 = vmatprep.mubr.bf16.mxu1 %v13067_v13 }
 0x6ac   :  { %v2086_v9 = vpop.f32.mrb[20].mxu1 }
 0x6ad   :  { %v2096_v12 = vrot.slane %v2086_v9, %v9844_v29  ;;  %v2088_v14 = vpop.f32.mrb[21].mxu1 }
 0x6ae   :  { %v2100_v16 = vrot.slane %v2088_v14, %v9844_v29  ;;  %v2090_v19 = vpop.f32.mrb[22].mxu1 }
 0x6af   :  { %v10587_v20 = vsub.f32 %v10536_v34, %v2096_v12  ;;  %v10590_v59 = vsub.f32 %v10544_v6, %v2096_v12  ;;  %v2091_v61 = vpop.f32.mrb[23].mxu1 }
 0x6b0   :  { %v10593_v23 = vsub.f32 %v10539_v57, %v2100_v16  ;;  %v10596_v24 = vsub.f32 %v10547_v56, %v2100_v16 }
 0x6b1   :  { %v2105_v15 = vmul.f32 %v10587_v20, %v10587_v20  ;;  %v2119_v17 = vmul.f32 %v10590_v59, %v10590_v59 }
 0x6b2   :  { %13068 = vst [vmem:[#allocation3_spill] sm:$0xff] %v10596_v24  ;;  %v2106_v34 = vmul.f32 %v10593_v23, %v10593_v23  ;;  %v2120_v6 = vmul.f32 %v10596_v24, %v10596_v24 }
 0x6b3   :  { %v2107_v21 = vrot.slane %v2105_v15, 4  ;;  %v2121_v36 = vrot.slane %v2119_v17, 4 }
 0x6b4   :  { %v2113_v60 = vrot.slane %v2106_v34, 4  ;;  %v2127_v57 = vrot.slane %v2120_v6, 4 }
 0x6b5   :  { %v2108_v63 = vadd.f32 %v2107_v21, %v2105_v15  ;;  %v2122_v0 = vadd.f32 %v2121_v36, %v2119_v17 }
 0x6b6   :  { %v2114_v56 = vadd.f32 %v2113_v60, %v2106_v34  ;;  %v2128_v1 = vadd.f32 %v2127_v57, %v2120_v6 }
 0x6b7   :  { %v2109_v3 = vrot.slane %v2108_v63, 2  ;;  %v2123_v7 = vrot.slane %v2122_v0, 2 }
 0x6b8   :  { %v2115_v2 = vrot.slane %v2114_v56, 2  ;;  %v2129_v4 = vrot.slane %v2128_v1, 2 }
 0x6b9   :  { %v2110_v25 = vadd.f32 %v2109_v3, %v2108_v63  ;;  %v2124_v8 = vadd.f32 %v2123_v7, %v2122_v0  ;;  %v2231_v7 = vld [vmem:[%s12992_s8] sm:$0x3] }
 0x6ba   :  { %v2116_v58 = vadd.f32 %v2115_v2, %v2114_v56  ;;  %v2130_v10 = vadd.f32 %v2129_v4, %v2128_v1  ;;  %v2236_v2 = vrot.slane %v2231_v7, %v9844_v29  ;;  %v2240_v4 = vrot.slane %v2231_v7, %v9960_v62  ;;  %v8703_v7 = vld [vmem:[%s12991_s11 + $0xe4] ss:$8 sps:$4 sm:$0xff]  }
 0x6bb   :  { %v2111_v9 = vrot.slane %v2110_v25, 1  ;;  %v2125_v12 = vrot.slane %v2124_v8, 1 }
 0x6bc   :  { %v2117_v14 = vrot.slane %v2116_v58, 1  ;;  %v2131_v16 = vrot.slane %v2130_v10, 1 }
 0x6bd   :  { %v2112_v19 = vadd.f32 %v2111_v9, %v2110_v25  ;;  %v2126_v61 = vadd.f32 %v2125_v12, %v2124_v8  ;;  %v2255_v8 = vld [vmem:[%s12993_s9] sm:$0x3] }
 0x6be   :  { %v2118_v13 = vadd.f32 %v2117_v14, %v2116_v58  ;;  %v2132_v24 = vadd.f32 %v2131_v16, %v2130_v10  ;;  %v2260_v12 = vrot.slane %v2255_v8, %v9844_v29 }
 0x6bf   :  { %v2133_v15 = vadd.f32 %v2126_v61, %v2112_v19  ;;  %v2264_v19 = vrot.slane %v2255_v8, %v9960_v62  ;;  %v8712_v8 = vld [vmem:[%s12991_s11 + $0x2d4] ss:$8 sps:$4 sm:$0xff]  }
 0x6c0   :  { %v2134_v17 = vadd.f32 %v2132_v24, %v2118_v13 }
 0x6c1   :  { %v2135_v34 = vmul.f32 0.0078125, %v2133_v15 }
 0x6c2   :  { %v2136_v6 = vmul.f32 0.0078125, %v2134_v17 }
 0x6c3   :  { %v2137_v21 = vpack.c.bf16 %v2135_v34, %v2135_v34 }
 0x6c4   :  { %v2138_v36 = vpack.c.bf16 %v2136_v6, %v2136_v6 }
 0x6c5   :  { %v2139_v60 = vunpack.c.l.bf16 %v2137_v21 }
 0x6c6   :  { %v2140_v57 = vunpack.c.l.bf16 %v2138_v36 }
 0x6c7   :  { %v2141_v63 = vsub.f32 %v2135_v34, %v2139_v60  ;;  %v13069_v34 = vld [vmem:[#allocation3_spill] sm:$0xff] }
 0x6c8   :  { %v2142_v0 = vsub.f32 %v2136_v6, %v2140_v57 }
 0x6c9   :  { %v2143_v1 = vpack.c.bf16 %v2141_v63, %v2141_v63 }
 0x6ca   :  { %v2144_v56 = vpack.c.bf16 %v2142_v0, %v2142_v0 }
 0x6cc   :  { %2177 = vmatprep.mubr.bf16.mxu0 %v2144_v56 }
 0x6cd   :  { %2178 = vmatmul.mubr.bf16.vlgmr.msra.gmra.mrb[16].mxu0 %v2143_v1 }
 0x6ce   :  { %2187 = vmatpush1.bf16.msra.mxu0 %v10309_v31  ;;  %2218 = vmatprep.mubr.bf16.mxu0 %v2138_v36  ;;  %v8632_v31 = vld [vmem:[%s12991_s11 + $0x200] ss:$8 sps:$4 sm:$0xff]  }
 0x6cf   :  { %2188 = vmatprep.subr.bf16.mxu0 %v10320_v18  ;;  %v8634_v18 = vld [vmem:[%s12991_s11 + $0x204] ss:$8 sps:$4 sm:$0xff]  }
 0x6d2   :  { %2189 = vmatpush1.bf16.msra.mxu0 %v10329_v5  ;;  %v8638_v5 = vld [vmem:[%s12991_s11 + $0x210] ss:$8 sps:$4 sm:$0xff]  }
 0x6d3   :  { %2190 = vmatprep.subr.bf16.mxu0 %v10335_v22  ;;  %v8640_v22 = vld [vmem:[%s12991_s11 + $0x214] ss:$8 sps:$4 sm:$0xff]  }
 0x6d6   :  { %2191 = vmatpush1.bf16.msra.mxu0 %v10341_v26  ;;  %v8644_v26 = vld [vmem:[%s12991_s11 + $0x220] ss:$8 sps:$4 sm:$0xff]  }
 0x6d7   :  { %2192 = vmatprep.subr.bf16.mxu0 %v10347_v27  ;;  %v8646_v27 = vld [vmem:[%s12991_s11 + $0x224] ss:$8 sps:$4 sm:$0xff]  }
 0x6da   :  { %2193 = vmatpush1.bf16.msra.mxu0 %v10355_v28 }
 0x6db   :  { %2194 = vmatprep.subr.bf16.mxu0 %v10362_v30 }
 0x6de   :  { %2195 = vmatpush1.bf16.msra.mxu0 %v10369_v11 }
 0x6df   :  { %2196 = vmatprep.subr.bf16.mxu0 %v10376_v32 }
 0x6e2   :  { %2197 = vmatpush1.bf16.msra.mxu0 %v10383_v35  ;;  %v8650_v35 = vld [vmem:[%s12991_s11 + $0x230] ss:$8 sps:$4 sm:$0xff]  }
 0x6e3   :  { %2198 = vmatprep.subr.bf16.mxu0 %v10390_v37  ;;  %v8652_v37 = vld [vmem:[%s12991_s11 + $0x234] ss:$8 sps:$4 sm:$0xff]  }
 0x6e6   :  { %2199 = vmatpush1.bf16.msra.mxu0 %v10397_v38  ;;  %v8656_v38 = vld [vmem:[%s12991_s11 + $0x240] ss:$8 sps:$4 sm:$0xff]  }
 0x6e7   :  { %2200 = vmatprep.subr.bf16.mxu0 %v10404_v39  ;;  %v8658_v39 = vld [vmem:[%s12991_s11 + $0x244] ss:$8 sps:$4 sm:$0xff]  }
 0x6ea   :  { %2201 = vmatpush1.bf16.msra.mxu0 %v10411_v40  ;;  %v8662_v40 = vld [vmem:[%s12991_s11 + $0x250] ss:$8 sps:$4 sm:$0xff]  }
 0x6eb   :  { %2202 = vmatprep.subr.bf16.mxu0 %v10425_v41  ;;  %v8664_v41 = vld [vmem:[%s12991_s11 + $0x254] ss:$8 sps:$4 sm:$0xff]  }
 0x6ee   :  { %2203 = vmatpush1.bf16.msra.mxu0 %v10430_v42  ;;  %v8668_v42 = vld [vmem:[%s12991_s11 + $0x260] ss:$8 sps:$4 sm:$0xff]  }
 0x6ef   :  { %2204 = vmatprep.subr.bf16.mxu0 %v10439_v43  ;;  %v8670_v43 = vld [vmem:[%s12991_s11 + $0x264] ss:$8 sps:$4 sm:$0xff]  }
 0x6f2   :  { %2205 = vmatpush1.bf16.msra.mxu0 %v10444_v44  ;;  %v8674_v44 = vld [vmem:[%s12991_s11 + $0x270] ss:$8 sps:$4 sm:$0xff]  }
 0x6f3   :  { %2206 = vmatprep.subr.bf16.mxu0 %v10453_v45  ;;  %v8676_v45 = vld [vmem:[%s12991_s11 + $0x274] ss:$8 sps:$4 sm:$0xff]  }
 0x6f6   :  { %2207 = vmatpush1.bf16.msra.mxu0 %v10458_v46  ;;  %v8680_v46 = vld [vmem:[%s12991_s11 + $0x280] ss:$8 sps:$4 sm:$0xff]  }
 0x6f7   :  { %2208 = vmatprep.subr.bf16.mxu0 %v10467_v47  ;;  %v8682_v47 = vld [vmem:[%s12991_s11 + $0x284] ss:$8 sps:$4 sm:$0xff]  }
 0x6fa   :  { %2209 = vmatpush1.bf16.msra.mxu0 %v10472_v48  ;;  %v8686_v48 = vld [vmem:[%s12991_s11 + $0x290] ss:$8 sps:$4 sm:$0xff]  }
 0x6fb   :  { %2210 = vmatprep.subr.bf16.mxu0 %v10481_v49  ;;  %v8688_v49 = vld [vmem:[%s12991_s11 + $0x294] ss:$8 sps:$4 sm:$0xff]  }
 0x6fe   :  { %2211 = vmatpush1.bf16.msra.mxu0 %v10486_v50  ;;  %v8692_v50 = vld [vmem:[%s12991_s11 + $0x2a0] ss:$8 sps:$4 sm:$0xff]  }
 0x6ff   :  { %2212 = vmatprep.subr.bf16.mxu0 %v10495_v51  ;;  %v8694_v51 = vld [vmem:[%s12991_s11 + $0x2a4] ss:$8 sps:$4 sm:$0xff]  }
 0x702   :  { %2213 = vmatpush1.bf16.msra.mxu0 %v10500_v52 }
 0x703   :  { %2214 = vmatprep.subr.bf16.mxu0 %v10505_v53 }
 0x706   :  { %2215 = vmatpush1.bf16.msra.mxu0 %v10513_v54 }
 0x707   :  { %2216 = vmatprep.subr.bf16.mxu0 %v10520_v55 }
 0x70a   :  { %2217 = vmatpush1.bf16.msra.mxu0 %v10527_v33 }
 0x70b   :  { %3302 = vmatprep.subr.bf16.mxu0 %v8634_v18 }
 0x70d   :  { %2219 = vmatmul.mubr.bf16.vlgmr.msra.gmra.mrb[20].mxu0 %v2137_v21 }
 0x70e   :  { %3303 = vmatpush1.bf16.msra.mxu0 %v8632_v31 }
 0x70f   :  { %3304 = vmatprep.subr.bf16.mxu0 %v8640_v22  ;;  %v8622_v22 = vld [vmem:[%s12990_s10 + $0x10] sm:$0xff]  }
 0x712   :  { %3305 = vmatpush1.bf16.msra.mxu0 %v8638_v5  ;;  %v8625_v5 = vld [vmem:[%s12991_s11 + $0x4] ss:$8 sps:$4 sm:$0xff]  }
 0x713   :  { %3306 = vmatprep.subr.bf16.mxu0 %v8646_v27  ;;  %v8628_v27 = vld [vmem:[%s12991_s11 + $0x14] ss:$8 sps:$4 sm:$0xff]  }
 0x716   :  { %3307 = vmatpush1.bf16.msra.mxu0 %v8644_v26  ;;  %v8623_v26 = vld [vmem:[%s12991_s11] ss:$8 sps:$4 sm:$0xff]  }
 0x717   :  { %3308 = vmatprep.subr.bf16.mxu0 %v8652_v37  ;;  %v8643_v37 = vld [vmem:[%s12991_s11 + $0x44] ss:$8 sps:$4 sm:$0xff]  }
 0x71a   :  { %3309 = vmatpush1.bf16.msra.mxu0 %v8650_v35  ;;  %v8635_v35 = vld [vmem:[%s12991_s11 + $0x30] ss:$8 sps:$4 sm:$0xff]  }
 0x71b   :  { %3310 = vmatprep.subr.bf16.mxu0 %v8658_v39  ;;  %v8649_v39 = vld [vmem:[%s12991_s11 + $0x54] ss:$8 sps:$4 sm:$0xff]  }
 0x71e   :  { %3311 = vmatpush1.bf16.msra.mxu0 %v8656_v38  ;;  %v8641_v38 = vld [vmem:[%s12991_s11 + $0x40] ss:$8 sps:$4 sm:$0xff]  }
 0x71f   :  { %3312 = vmatprep.subr.bf16.mxu0 %v8664_v41  ;;  %v8655_v41 = vld [vmem:[%s12991_s11 + $0x64] ss:$8 sps:$4 sm:$0xff]  }
 0x722   :  { %3313 = vmatpush1.bf16.msra.mxu0 %v8662_v40  ;;  %v8647_v40 = vld [vmem:[%s12991_s11 + $0x50] ss:$8 sps:$4 sm:$0xff]  }
 0x723   :  { %3314 = vmatprep.subr.bf16.mxu0 %v8670_v43  ;;  %v8661_v43 = vld [vmem:[%s12991_s11 + $0x74] ss:$8 sps:$4 sm:$0xff]  }
 0x726   :  { %3315 = vmatpush1.bf16.msra.mxu0 %v8668_v42  ;;  %v8653_v42 = vld [vmem:[%s12991_s11 + $0x60] ss:$8 sps:$4 sm:$0xff]  }
 0x727   :  { %3316 = vmatprep.subr.bf16.mxu0 %v8676_v45  ;;  %v8667_v45 = vld [vmem:[%s12991_s11 + $0x84] ss:$8 sps:$4 sm:$0xff]  }
 0x72a   :  { %3317 = vmatpush1.bf16.msra.mxu0 %v8674_v44  ;;  %v8659_v44 = vld [vmem:[%s12991_s11 + $0x70] ss:$8 sps:$4 sm:$0xff]  }
 0x72b   :  { %3318 = vmatprep.subr.bf16.mxu0 %v8682_v47  ;;  %v8673_v47 = vld [vmem:[%s12991_s11 + $0x94] ss:$8 sps:$4 sm:$0xff]  }
 0x72e   :  { %3319 = vmatpush1.bf16.msra.mxu0 %v8680_v46  ;;  %v8665_v46 = vld [vmem:[%s12991_s11 + $0x80] ss:$8 sps:$4 sm:$0xff]  }
 0x72f   :  { %3320 = vmatprep.subr.bf16.mxu0 %v8688_v49  ;;  %v8679_v49 = vld [vmem:[%s12991_s11 + $0xa4] ss:$8 sps:$4 sm:$0xff]  }
 0x732   :  { %3321 = vmatpush1.bf16.msra.mxu0 %v8686_v48  ;;  %v8671_v48 = vld [vmem:[%s12991_s11 + $0x90] ss:$8 sps:$4 sm:$0xff]  }
 0x733   :  { %3322 = vmatprep.subr.bf16.mxu0 %v8694_v51  ;;  %v8685_v51 = vld [vmem:[%s12991_s11 + $0xb4] ss:$8 sps:$4 sm:$0xff]  }
 0x736   :  { %3323 = vmatpush1.bf16.msra.mxu0 %v8692_v50  ;;  %v8677_v50 = vld [vmem:[%s12991_s11 + $0xa0] ss:$8 sps:$4 sm:$0xff]  }
 0x7a0   :  { %v2179_v28 = vpop.f32.mrb[16].mxu0 }
 0x7a1   :  { %v2181_v30 = vpop.f32.mrb[17].mxu0 }
 0x7a2   :  { %v2183_v11 = vpop.f32.mrb[18].mxu0 }
 0x7a3   :  { %v2184_v32 = vpop.f32.mrb[19].mxu0  ;;  %v8629_v11 = vld [vmem:[%s12991_s11 + $0x20] ss:$8 sps:$4 sm:$0xff]  }
 0x7a4   :  { %v8637_v32 = vld [vmem:[%s12991_s11 + $0x34] ss:$8 sps:$4 sm:$0xff]  }
 0x7e0   :  { %v2220_v52 = vpop.f32.mrb[20].mxu0 }
 0x7e1   :  { %v2221_v53 = vadd.f32 %v2220_v52, %v2179_v28  ;;  %v2222_v54 = vpop.f32.mrb[21].mxu0  ;;  %v8626_v28 = vld [vmem:[%s12991_s11 + $0x10] ss:$8 sps:$4 sm:$0xff]  }
 0x7e2   :  { %v2223_v55 = vadd.f32 %v2222_v54, %v2181_v30  ;;  %v2224_v33 = vpop.f32.mrb[22].mxu0  ;;  %v8631_v30 = vld [vmem:[%s12991_s11 + $0x24] ss:$8 sps:$4 sm:$0xff]   ;;  %v8683_v52 = vld [vmem:[%s12991_s11 + $0xb0] ss:$8 sps:$4 sm:$0xff]  }
 0x7e3   :  { %v2227_v13 = vadd.f32 1e-05, %v2221_v53  ;;  %v2225_v24 = vpop.f32.mrb[23].mxu0  ;;  %v8691_v53 = vld [vmem:[%s12991_s11 + $0xc4] ss:$8 sps:$4 sm:$0xff]  }
 0x7e4   :  { %v2228_v3 = vadd.f32 1e-05, %v2223_v55  ;;  %v8689_v54 = vld [vmem:[%s12991_s11 + $0xc0] ss:$8 sps:$4 sm:$0xff]   ;;  %v8695_v55 = vld [vmem:[%s12991_s11 + $0xd0] ss:$8 sps:$4 sm:$0xff]  }
 0x7e5   :  { %9317 = vrsqrt.f32 %v2227_v13  ;;  %v8697_v33 = vld [vmem:[%s12991_s11 + $0xd4] ss:$8 sps:$4 sm:$0xff]   ;;  %v8698_v13 = vld [vmem:[%s12991_s11 + $0x2b0] ss:$8 sps:$4 sm:$0xff]  }
 0x7e6   :  { %9319 = vrsqrt.f32 %v2228_v3  ;;  %v8700_v24 = vld [vmem:[%s12991_s11 + $0x2b4] ss:$8 sps:$4 sm:$0xff]   ;;  %v8701_v3 = vld [vmem:[%s12991_s11 + $0xe0] ss:$8 sps:$4 sm:$0xff]  }
 0x7e7   :  { %3324 = vmatprep.subr.bf16.mxu0 %v8700_v24  ;;  %v8761_v24 = vld [vmem:[%s12991_s11 + $0x180] ss:$8 sps:$4 sm:$0xff]  }
 0x7e8   :  { %3325 = vmatpush1.bf16.msra.mxu0 %v8698_v13  ;;  %v8766_v13 = vld [vmem:[%s12991_s11 + $0x364] ss:$8 sps:$4 sm:$0xff]  }
 0x7ef   :  { %v9318_v25 = vpop.eup %9317 }
 0x7f0   :  { %v9320_v58 = vpop.eup %9319  ;;  %v2243_v10 = vmul.f32 %v9318_v25, %v2236_v2  ;;  %v8704_v2 = vld [vmem:[%s12991_s11 + $0x2c0] ss:$8 sps:$4 sm:$0xff]   ;;  %v8709_v25 = vld [vmem:[%s12991_s11 + $0xf4] ss:$8 sps:$4 sm:$0xff]  }
 0x7f1   :  { %v2244_v9 = vmul.f32 %v9320_v58, %v2240_v4  ;;  %v8706_v4 = vld [vmem:[%s12991_s11 + $0x2c4] ss:$8 sps:$4 sm:$0xff]   ;;  %v8707_v58 = vld [vmem:[%s12991_s11 + $0xf0] ss:$8 sps:$4 sm:$0xff]  }
 0x7f2   :  { %v2248_v14 = vrot.slane %v2243_v10, %v9844_v29  ;;  %3326 = vmatprep.subr.bf16.mxu0 %v8706_v4  ;;  %v8710_v10 = vld [vmem:[%s12991_s11 + $0x2d0] ss:$8 sps:$4 sm:$0xff]  }
 0x7f3   :  { %v2252_v16 = vrot.slane %v2244_v9, %v9844_v29  ;;  %3327 = vmatpush1.bf16.msra.mxu0 %v8704_v2  ;;  %v8715_v9 = vld [vmem:[%s12991_s11 + $0x104] ss:$8 sps:$4 sm:$0xff]   ;;  %v8772_v2 = vld [vmem:[%s12991_s11 + $0x374] ss:$8 sps:$4 sm:$0xff]   ;;  %v8767_v4 = vld [vmem:[%s12991_s11 + $0x190] ss:$8 sps:$4 sm:$0xff]  }
 0x7f4   :  { %v2253_v61 = vmul.f32 %v2248_v14, %v10587_v20  ;;  %v2271_v15 = vmul.f32 %v2248_v14, %v10590_v59  ;;  %v8620_v20 = vld [vmem:[%s12990_s10] sm:$0xff]   ;;  %v13070_v59 = vmov 0   ;;  %3328 = vmatprep.subr.bf16.mxu0 %v8712_v8 }
 0x7f5   :  { %v2254_v17 = vmul.f32 %v2252_v16, %v10593_v23  ;;  %v2272_v6 = vmul.f32 %v2252_v16, %v13069_v34  ;;  %v8621_v23 = vld [vmem:[%s12990_s10 + $0x8] sm:$0xff]   ;;  %v8724_v16 = vld [vmem:[%s12991_s11 + $0x2f4] ss:$8 sps:$4 sm:$0xff]  }
 0x7f6   :  { %v2267_v21 = vadd.f32 %v2260_v12, %v2253_v61  ;;  %v2273_v36 = vadd.f32 %v2271_v15, %v2260_v12  ;;  %v8718_v12 = vld [vmem:[%s12991_s11 + $0x2e4] ss:$8 sps:$4 sm:$0xff]   ;;  %v8716_v14 = vld [vmem:[%s12991_s11 + $0x2e0] ss:$8 sps:$4 sm:$0xff]  }
 0x7f7   :  { %v2268_v60 = vadd.f32 %v2264_v19, %v2254_v17  ;;  %v2274_v57 = vadd.f32 %v2272_v6, %v2264_v19  ;;  %3329 = vmatpush1.bf16.msra.mxu0 %v8710_v10  ;;  %v8722_v19 = vld [vmem:[%s12991_s11 + $0x2f0] ss:$8 sps:$4 sm:$0xff]   ;;  %v8730_v61 = vld [vmem:[%s12991_s11 + $0x304] ss:$8 sps:$4 sm:$0xff]   ;;  %v8773_v10 = vld [vmem:[%s12991_s11 + $0x1a0] ss:$8 sps:$4 sm:$0xff]  }
 0x7f8   :  { %v2269_v63 = vmax.f32 %v2267_v21, 0.0  ;;  %v2275_v0 = vmax.f32 %v2273_v36, 0.0  ;;  %3330 = vmatprep.subr.bf16.mxu0 %v8718_v12  ;;  %v8775_v8 = vld [vmem:[%s12991_s11 + $0x1a4] ss:$8 sps:$4 sm:$0xff]   ;;  %v8781_v12 = vld [vmem:[%s12991_s11 + $0x1b4] ss:$8 sps:$4 sm:$0xff]  }
 0x7f9   :  { %v2270_v56 = vmax.f32 %v2268_v60, 0.0  ;;  %v2276_v1 = vmax.f32 %v2274_v57, 0.0 }
 0x7fa   :  { %v2277_v18 = vpack.c.bf16 %v2275_v0, %v2269_v63 }
 0x7fb   :  { %v2278_v31 = vpack.c.bf16 %v2276_v1, %v2270_v56  ;;  %3331 = vmatpush1.bf16.msra.mxu0 %v8716_v14  ;;  %v8784_v14 = vld [vmem:[%s12991_s11 + $0x394] ss:$8 sps:$4 sm:$0xff]  }
 0x7fc   :  { %3332 = vmatprep.subr.bf16.mxu0 %v8724_v16  ;;  %v8779_v16 = vld [vmem:[%s12991_s11 + $0x1b0] ss:$8 sps:$4 sm:$0xff]  }
 0x7fd   :  { %2290 = vmatprep.subr.bf16.mxu1 %v2278_v31 }
 0x7fe   :  { %2291 = vmatpush1.bf16.msra.mxu1 %v2277_v18 }
 0x7ff   :  { %2346 = vmatprep.subr.bf16.mxu1 %v2278_v31  ;;  %3333 = vmatpush1.bf16.msra.mxu0 %v8722_v19  ;;  %v8782_v19 = vld [vmem:[%s12991_s11 + $0x390] ss:$8 sps:$4 sm:$0xff]  }
 0x800   :  { %3345 = vmatprep.subr.bf16.mxu0 %v8730_v61  ;;  %v8787_v61 = vld [vmem:[%s12991_s11 + $0x1c4] ss:$8 sps:$4 sm:$0xff]  }
 0x801   :  { %7496 = vmatmul.mubr.msk.bf16.vlgmr.msra.gmra.mrb[24].mxu1 %vm2286_vm3, %v8620_v20 }
 0x802   :  { %2347 = vmatpush1.bf16.msra.mxu1 %v2277_v18  ;;  %2378 = vmatprep.mubr.bf16.mxu1 %v13070_v59 }
 0x803   :  { %2402 = vmatprep.subr.bf16.mxu1 %v2278_v31  ;;  %v8713_v31 = vld [vmem:[%s12991_s11 + $0x100] ss:$8 sps:$4 sm:$0xff]  }
 0x809   :  { %7500 = vmatmul.mubr.msk.bf16.vlgmr.msra.gmra.mrb[28].mxu1 %vm2286_vm3, %v8621_v23  ;;  %v8719_v23 = vld [vmem:[%s12991_s11 + $0x110] ss:$8 sps:$4 sm:$0xff]  }
 0x80a   :  { %2403 = vmatpush1.bf16.msra.mxu1 %v2277_v18  ;;  %2434 = vmatprep.mubr.bf16.mxu1 %v13070_v59  ;;  %v8721_v18 = vld [vmem:[%s12991_s11 + $0x114] ss:$8 sps:$4 sm:$0xff]  }
 0x80b   :  { %2831 = vmatprep.subr.bf16.mxu1 %v8625_v5 }
 0x811   :  { %7504 = vmatmul.mubr.msk.bf16.vlgmr.msra.gmra.mrb[32].mxu1 %vm2286_vm3, %v8622_v22  ;;  %v8727_v22 = vld [vmem:[%s12991_s11 + $0x124] ss:$8 sps:$4 sm:$0xff]  }
 0x812   :  { %2832 = vmatpush1.bf16.msra.mxu1 %v8623_v26 }
 0x813   :  { %2833 = vmatprep.subr.bf16.mxu1 %v8628_v27 }
 0x816   :  { %2834 = vmatpush1.bf16.msra.mxu1 %v8626_v28 }
 0x817   :  { %2835 = vmatprep.subr.bf16.mxu1 %v8631_v30 }
 0x81a   :  { %2836 = vmatpush1.bf16.msra.mxu1 %v8629_v11  ;;  %v8725_v11 = vld [vmem:[%s12991_s11 + $0x120] ss:$8 sps:$4 sm:$0xff]  }
 0x81b   :  { %2837 = vmatprep.subr.bf16.mxu1 %v8637_v32  ;;  %v8728_v32 = vld [vmem:[%s12991_s11 + $0x300] ss:$8 sps:$4 sm:$0xff]  }
 0x81e   :  { %2838 = vmatpush1.bf16.msra.mxu1 %v8635_v35  ;;  %v8733_v35 = vld [vmem:[%s12991_s11 + $0x134] ss:$8 sps:$4 sm:$0xff]  }
 0x81f   :  { %2839 = vmatprep.subr.bf16.mxu1 %v8643_v37  ;;  %v8736_v37 = vld [vmem:[%s12991_s11 + $0x314] ss:$8 sps:$4 sm:$0xff]  }
 0x822   :  { %2840 = vmatpush1.bf16.msra.mxu1 %v8641_v38  ;;  %v8731_v38 = vld [vmem:[%s12991_s11 + $0x130] ss:$8 sps:$4 sm:$0xff]  }
 0x823   :  { %2841 = vmatprep.subr.bf16.mxu1 %v8649_v39  ;;  %v8734_v39 = vld [vmem:[%s12991_s11 + $0x310] ss:$8 sps:$4 sm:$0xff]  }
 0x826   :  { %2842 = vmatpush1.bf16.msra.mxu1 %v8647_v40  ;;  %v8739_v40 = vld [vmem:[%s12991_s11 + $0x144] ss:$8 sps:$4 sm:$0xff]  }
 0x827   :  { %2843 = vmatprep.subr.bf16.mxu1 %v8655_v41  ;;  %v8742_v41 = vld [vmem:[%s12991_s11 + $0x324] ss:$8 sps:$4 sm:$0xff]  }
 0x82a   :  { %2844 = vmatpush1.bf16.msra.mxu1 %v8653_v42  ;;  %v8737_v42 = vld [vmem:[%s12991_s11 + $0x140] ss:$8 sps:$4 sm:$0xff]  }
 0x82b   :  { %2845 = vmatprep.subr.bf16.mxu1 %v8661_v43  ;;  %v8740_v43 = vld [vmem:[%s12991_s11 + $0x320] ss:$8 sps:$4 sm:$0xff]  }
 0x82e   :  { %2846 = vmatpush1.bf16.msra.mxu1 %v8659_v44  ;;  %v8745_v44 = vld [vmem:[%s12991_s11 + $0x154] ss:$8 sps:$4 sm:$0xff]  }
 0x82f   :  { %2847 = vmatprep.subr.bf16.mxu1 %v8667_v45  ;;  %v8748_v45 = vld [vmem:[%s12991_s11 + $0x334] ss:$8 sps:$4 sm:$0xff]  }
 0x832   :  { %2848 = vmatpush1.bf16.msra.mxu1 %v8665_v46  ;;  %v8743_v46 = vld [vmem:[%s12991_s11 + $0x150] ss:$8 sps:$4 sm:$0xff]  }
 0x833   :  { %2849 = vmatprep.subr.bf16.mxu1 %v8673_v47  ;;  %v8746_v47 = vld [vmem:[%s12991_s11 + $0x330] ss:$8 sps:$4 sm:$0xff]  }
 0x836   :  { %2850 = vmatpush1.bf16.msra.mxu1 %v8671_v48  ;;  %v8751_v48 = vld [vmem:[%s12991_s11 + $0x164] ss:$8 sps:$4 sm:$0xff]  }
 0x837   :  { %2851 = vmatprep.subr.bf16.mxu1 %v8679_v49  ;;  %v8754_v49 = vld [vmem:[%s12991_s11 + $0x344] ss:$8 sps:$4 sm:$0xff]  }
 0x83a   :  { %2852 = vmatpush1.bf16.msra.mxu1 %v8677_v50  ;;  %v8749_v50 = vld [vmem:[%s12991_s11 + $0x160] ss:$8 sps:$4 sm:$0xff]  }
 0x83b   :  { %2853 = vmatprep.subr.bf16.mxu1 %v8685_v51  ;;  %v8752_v51 = vld [vmem:[%s12991_s11 + $0x340] ss:$8 sps:$4 sm:$0xff]  }
 0x83e   :  { %2854 = vmatpush1.bf16.msra.mxu1 %v8683_v52  ;;  %v8757_v52 = vld [vmem:[%s12991_s11 + $0x174] ss:$8 sps:$4 sm:$0xff]  }
 0x83f   :  { %2855 = vmatprep.subr.bf16.mxu1 %v8691_v53  ;;  %v8760_v53 = vld [vmem:[%s12991_s11 + $0x354] ss:$8 sps:$4 sm:$0xff]  }
 0x842   :  { %2856 = vmatpush1.bf16.msra.mxu1 %v8689_v54  ;;  %v8755_v54 = vld [vmem:[%s12991_s11 + $0x170] ss:$8 sps:$4 sm:$0xff]  }
 0x843   :  { %2857 = vmatprep.subr.bf16.mxu1 %v8697_v33  ;;  %v8763_v33 = vld [vmem:[%s12991_s11 + $0x184] ss:$8 sps:$4 sm:$0xff]  }
 0x846   :  { %2858 = vmatpush1.bf16.msra.mxu1 %v8695_v55  ;;  %v8758_v55 = vld [vmem:[%s12991_s11 + $0x350] ss:$8 sps:$4 sm:$0xff]  }
 0x847   :  { %2859 = vmatprep.subr.bf16.mxu1 %v8703_v7  ;;  %v8769_v7 = vld [vmem:[%s12991_s11 + $0x194] ss:$8 sps:$4 sm:$0xff]  }
 0x84a   :  { %2860 = vmatpush1.bf16.msra.mxu1 %v8701_v3  ;;  %v8764_v3 = vld [vmem:[%s12991_s11 + $0x360] ss:$8 sps:$4 sm:$0xff]  }
 0x84b   :  { %2861 = vmatprep.subr.bf16.mxu1 %v8709_v25  ;;  %v8770_v25 = vld [vmem:[%s12991_s11 + $0x370] ss:$8 sps:$4 sm:$0xff]  }
 0x84e   :  { %2862 = vmatpush1.bf16.msra.mxu1 %v8707_v58  ;;  %v8778_v58 = vld [vmem:[%s12991_s11 + $0x384] ss:$8 sps:$4 sm:$0xff]  }
 0x84f   :  { %2874 = vmatprep.subr.bf16.mxu1 %v8715_v9  ;;  %v8776_v9 = vld [vmem:[%s12991_s11 + $0x380] ss:$8 sps:$4 sm:$0xff]  }
 0x8d4   :  { %v10862_v15 = vpop.f32.mrb[24].mxu1 }
 0x8d5   :  { %v2326_v17 = vpop.f32.mrb[25].mxu1 }
 0x8d6   :  { %v10864_v34 = vpop.f32.mrb[26].mxu1 }
 0x8d7   :  { %v2333_v6 = vpack.c.bf16 %v10864_v34, %v10862_v15  ;;  %v2330_v21 = vpop.f32.mrb[27].mxu1  ;;  %v11086_v15 = vld [vmem:[%s12994_s12 + $0x24] ss:$8 sps:$4 sm:$0xff]   ;;  %v11092_v34 = vld [vmem:[%s12994_s12 + $0x20] ss:$8 sps:$4 sm:$0xff]  }
 0x8d8   :  { %v2334_v36 = vpack.c.bf16 %v2330_v21, %v2326_v17  ;;  %v8790_v17 = vld [vmem:[%s12991_s11 + $0x3a4] ss:$8 sps:$4 sm:$0xff]   ;;  %v8785_v21 = vld [vmem:[%s12991_s11 + $0x1c0] ss:$8 sps:$4 sm:$0xff]  }
 0x8dc   :  { %v2380_v60 = vpop.f32.mrb[28].mxu1 }
 0x8dd   :  { %v2382_v57 = vpop.f32.mrb[29].mxu1 }
 0x8de   :  { %v2384_v63 = vpop.f32.mrb[30].mxu1 }
 0x8df   :  { %v10868_v0 = vpack.c.bf16 %v2384_v63, %v2380_v60  ;;  %v2386_v56 = vpop.f32.mrb[31].mxu1  ;;  %v8793_v60 = vld [vmem:[%s12991_s11 + $0x1d4] ss:$8 sps:$4 sm:$0xff]   ;;  %v8791_v63 = vld [vmem:[%s12991_s11 + $0x1d0] ss:$8 sps:$4 sm:$0xff]  }
 0x8e0   :  { %v2390_v1 = vpack.c.bf16 %v2386_v56, %v2382_v57  ;;  %v8796_v57 = vld [vmem:[%s12991_s11 + $0x3b4] ss:$8 sps:$4 sm:$0xff]   ;;  %v8794_v56 = vld [vmem:[%s12991_s11 + $0x3b0] ss:$8 sps:$4 sm:$0xff]  }
 0x8e2   :  { %2863 = vmatprep.mubr.bf16.mxu1 %v2390_v1 }
 0x8e3   :  { %2864 = vmatmul.mubr.bf16.vlgmr.msra.gmra.mrb[36].mxu1 %v10868_v0 }
 0x8e4   :  { %2875 = vmatpush1.bf16.msra.mxu1 %v8713_v31  ;;  %v2436_v20 = vpop.f32.mrb[32].mxu1  ;;  %2906 = vmatprep.mubr.bf16.mxu1 %v2334_v36  ;;  %v8788_v36 = vld [vmem:[%s12991_s11 + $0x3a0] ss:$8 sps:$4 sm:$0xff]   ;;  %v8802_v31 = vld [vmem:[%s12991_s11 + $0x3c4] ss:$8 sps:$4 sm:$0xff]  }
 0x8e5   :  { %v2438_v5 = vpop.f32.mrb[33].mxu1  ;;  %2876 = vmatprep.subr.bf16.mxu1 %v8721_v18  ;;  %v8797_v18 = vld [vmem:[%s12991_s11 + $0x1e0] ss:$8 sps:$4 sm:$0xff]  }
 0x8e6   :  { %v2440_v26 = vpop.f32.mrb[34].mxu1 }
 0x8e7   :  { %v2445_v27 = vpack.c.bf16 %v2440_v26, %v2436_v20  ;;  %v2442_v28 = vpop.f32.mrb[35].mxu1  ;;  %v8800_v20 = vld [vmem:[%s12991_s11 + $0x3c0] ss:$8 sps:$4 sm:$0xff]   ;;  %v8806_v26 = vld [vmem:[%s12991_s11 + $0x3d0] ss:$8 sps:$4 sm:$0xff]  }
 0x8e8   :  { %v2446_v30 = vpack.c.bf16 %v2442_v28, %v2438_v5  ;;  %2877 = vmatpush1.bf16.msra.mxu1 %v8719_v23  ;;  %v8805_v23 = vld [vmem:[%s12991_s11 + $0x1f4] ss:$8 sps:$4 sm:$0xff]   ;;  %v11051_v28 = vld [vmem:[%s12994_s12 + $0x4] ss:$8 sps:$4 sm:$0xff]  }
 0x8e9   :  { %2878 = vmatprep.subr.bf16.mxu1 %v8727_v22  ;;  %v8808_v5 = vld [vmem:[%s12991_s11 + $0x3d4] ss:$8 sps:$4 sm:$0xff]   ;;  %v8803_v22 = vld [vmem:[%s12991_s11 + $0x1f0] ss:$8 sps:$4 sm:$0xff]  }
 0x8ea   :  { %3334 = vmatprep.mubr.bf16.mxu0 %v2446_v30  ;;  %v8809_v30 = vld [vmem:[%s12991_s11 + $0x3e0] ss:$8 sps:$4 sm:$0xff]  }
 0x8eb   :  { %3335 = vmatmul.mubr.bf16.vlgmr.msra.gmra.mrb[24].mxu0 %v2445_v27  ;;  %v8811_v27 = vld [vmem:[%s12991_s11 + $0x3e4] ss:$8 sps:$4 sm:$0xff]  }
 0x8ec   :  { %2879 = vmatpush1.bf16.msra.mxu1 %v8725_v11  ;;  %3346 = vmatpush1.bf16.msra.mxu0 %v8728_v32  ;;  %v11059_v11 = vld [vmem:[%s12994_s12] ss:$8 sps:$4 sm:$0xff]   ;;  %v8814_v32 = vld [vmem:[%s12991_s11 + $0x3f4] ss:$8 sps:$4 sm:$0xff]  }
 0x8ed   :  { %3377 = vmatprep.mubr.bf16.mxu0 %v2390_v1  ;;  %2880 = vmatprep.subr.bf16.mxu1 %v8733_v35  ;;  %v8799_v1 = vld [vmem:[%s12991_s11 + $0x1e4] ss:$8 sps:$4 sm:$0xff]   ;;  %v11068_v35 = vld [vmem:[%s12994_s12 + $0x14] ss:$8 sps:$4 sm:$0xff]  }
 0x8ee   :  { %3347 = vmatprep.subr.bf16.mxu0 %v8736_v37  ;;  %v8812_v37 = vld [vmem:[%s12991_s11 + $0x3f0] ss:$8 sps:$4 sm:$0xff]  }
 0x8f0   :  { %2881 = vmatpush1.bf16.msra.mxu1 %v8731_v38  ;;  %3348 = vmatpush1.bf16.msra.mxu0 %v8734_v39  ;;  %v11080_v38 = vld [vmem:[%s12994_s12 + $0x10] ss:$8 sps:$4 sm:$0xff]  }
 0x8f1   :  { %2882 = vmatprep.subr.bf16.mxu1 %v8739_v40  ;;  %3349 = vmatprep.subr.bf16.mxu0 %v8742_v41  ;;  %v11106_v39 = vld [vmem:[%s12994_s12 + $0x30] ss:$8 sps:$4 sm:$0xff]   ;;  %v11113_v40 = vld [vmem:[%s12994_s12 + $0x44] ss:$8 sps:$4 sm:$0xff]   ;;  %v11127_v41 = vld [vmem:[%s12994_s12 + $0x54] ss:$8 sps:$4 sm:$0xff]  }
 0x8f4   :  { %2883 = vmatpush1.bf16.msra.mxu1 %v8737_v42  ;;  %3350 = vmatpush1.bf16.msra.mxu0 %v8740_v43  ;;  %v11134_v42 = vld [vmem:[%s12994_s12 + $0x50] ss:$8 sps:$4 sm:$0xff]   ;;  %v11141_v43 = vld [vmem:[%s12994_s12 + $0x64] ss:$8 sps:$4 sm:$0xff]  }
 0x8f5   :  { %2884 = vmatprep.subr.bf16.mxu1 %v8745_v44  ;;  %3351 = vmatprep.subr.bf16.mxu0 %v8748_v45  ;;  %v11148_v44 = vld [vmem:[%s12994_s12 + $0x60] ss:$8 sps:$4 sm:$0xff]   ;;  %v11162_v45 = vld [vmem:[%s12994_s12 + $0x74] ss:$8 sps:$4 sm:$0xff]  }
 0x8f8   :  { %2885 = vmatpush1.bf16.msra.mxu1 %v8743_v46  ;;  %3352 = vmatpush1.bf16.msra.mxu0 %v8746_v47  ;;  %v11167_v46 = vld [vmem:[%s12994_s12 + $0x70] ss:$8 sps:$4 sm:$0xff]   ;;  %v11176_v47 = vld [vmem:[%s12994_s12 + $0x84] ss:$8 sps:$4 sm:$0xff]  }
 0x8f9   :  { %2886 = vmatprep.subr.bf16.mxu1 %v8751_v48  ;;  %3353 = vmatprep.subr.bf16.mxu0 %v8754_v49  ;;  %v11181_v48 = vld [vmem:[%s12994_s12 + $0x80] ss:$8 sps:$4 sm:$0xff]   ;;  %v11190_v49 = vld [vmem:[%s12994_s12 + $0x94] ss:$8 sps:$4 sm:$0xff]  }
 0x8fc   :  { %2887 = vmatpush1.bf16.msra.mxu1 %v8749_v50  ;;  %3354 = vmatpush1.bf16.msra.mxu0 %v8752_v51  ;;  %v11195_v50 = vld [vmem:[%s12994_s12 + $0x90] ss:$8 sps:$4 sm:$0xff]   ;;  %v11204_v51 = vld [vmem:[%s12994_s12 + $0xa4] ss:$8 sps:$4 sm:$0xff]  }
 0x8fd   :  { %2888 = vmatprep.subr.bf16.mxu1 %v8757_v52  ;;  %3355 = vmatprep.subr.bf16.mxu0 %v8760_v53  ;;  %v11209_v52 = vld [vmem:[%s12994_s12 + $0xa0] ss:$8 sps:$4 sm:$0xff]   ;;  %v11218_v53 = vld [vmem:[%s12994_s12 + $0xb4] ss:$8 sps:$4 sm:$0xff]  }
 0x900   :  { %2889 = vmatpush1.bf16.msra.mxu1 %v8755_v54  ;;  %3356 = vmatpush1.bf16.msra.mxu0 %v8758_v55  ;;  %v11223_v54 = vld [vmem:[%s12994_s12 + $0xb0] ss:$8 sps:$4 sm:$0xff]   ;;  %v11232_v55 = vld [vmem:[%s12994_s12 + $0xc4] ss:$8 sps:$4 sm:$0xff]  }
 0x901   :  { %2890 = vmatprep.subr.bf16.mxu1 %v8763_v33  ;;  %3357 = vmatprep.subr.bf16.mxu0 %v8766_v13  ;;  %v11237_v33 = vld [vmem:[%s12994_s12 + $0xc0] ss:$8 sps:$4 sm:$0xff]   ;;  %v11246_v13 = vld [vmem:[%s12994_s12 + $0xd4] ss:$8 sps:$4 sm:$0xff]  }
 0x904   :  { %2891 = vmatpush1.bf16.msra.mxu1 %v8761_v24  ;;  %3358 = vmatpush1.bf16.msra.mxu0 %v8764_v3  ;;  %v11251_v24 = vld [vmem:[%s12994_s12 + $0xd0] ss:$8 sps:$4 sm:$0xff]   ;;  %v11256_v3 = vld [vmem:[%s12994_s12 + $0xe4] ss:$8 sps:$4 sm:$0xff]  }
 0x905   :  { %2892 = vmatprep.subr.bf16.mxu1 %v8769_v7  ;;  %3359 = vmatprep.subr.bf16.mxu0 %v8772_v2  ;;  %v11264_v7 = vld [vmem:[%s12994_s12 + $0xe0] ss:$8 sps:$4 sm:$0xff]   ;;  %v11271_v2 = vld [vmem:[%s12994_s12 + $0xf4] ss:$8 sps:$4 sm:$0xff]  }
 0x908   :  { %2893 = vmatpush1.bf16.msra.mxu1 %v8767_v4  ;;  %3360 = vmatpush1.bf16.msra.mxu0 %v8770_v25  ;;  %v11278_v4 = vld [vmem:[%s12994_s12 + $0xf0] ss:$8 sps:$4 sm:$0xff]  }
 0x909   :  { %2894 = vmatprep.subr.bf16.mxu1 %v8775_v8  ;;  %3361 = vmatprep.subr.bf16.mxu0 %v8778_v58 }
 0x90c   :  { %2895 = vmatpush1.bf16.msra.mxu1 %v8773_v10  ;;  %3362 = vmatpush1.bf16.msra.mxu0 %v8776_v9 }
 0x90d   :  { %2896 = vmatprep.subr.bf16.mxu1 %v8781_v12  ;;  %3363 = vmatprep.subr.bf16.mxu0 %v8784_v14 }
 0x910   :  { %2897 = vmatpush1.bf16.msra.mxu1 %v8779_v16  ;;  %3364 = vmatpush1.bf16.msra.mxu0 %v8782_v19 }
 0x911   :  { %2898 = vmatprep.subr.bf16.mxu1 %v8787_v61  ;;  %3365 = vmatprep.subr.bf16.mxu0 %v8790_v17 }
 0x914   :  { %2899 = vmatpush1.bf16.msra.mxu1 %v8785_v21  ;;  %3366 = vmatpush1.bf16.msra.mxu0 %v8788_v36 }
 0x915   :  { %2900 = vmatprep.subr.bf16.mxu1 %v8793_v60  ;;  %3367 = vmatprep.subr.bf16.mxu0 %v8796_v57 }
 0x918   :  { %2901 = vmatpush1.bf16.msra.mxu1 %v8791_v63  ;;  %3368 = vmatpush1.bf16.msra.mxu0 %v8794_v56 }
 0x919   :  { %2902 = vmatprep.subr.bf16.mxu1 %v8799_v1  ;;  %3369 = vmatprep.subr.bf16.mxu0 %v8802_v31 }
 0x91c   :  { %2903 = vmatpush1.bf16.msra.mxu1 %v8797_v18  ;;  %3370 = vmatpush1.bf16.msra.mxu0 %v8800_v20 }
 0x91d   :  { %2904 = vmatprep.subr.bf16.mxu1 %v8805_v23  ;;  %3371 = vmatprep.subr.bf16.mxu0 %v8808_v5 }
 0x920   :  { %2905 = vmatpush1.bf16.msra.mxu1 %v8803_v22  ;;  %3372 = vmatpush1.bf16.msra.mxu0 %v8806_v26 }
 0x921   :  { %3373 = vmatprep.subr.bf16.mxu0 %v8811_v27  ;;  %3620 = vmatprep.subr.bf16.mxu1 %v11051_v28 }
 0x923   :  { %2907 = vmatmul.mubr.bf16.vlgmr.msra.gmra.mrb[36].mxu1 %v2333_v6  ;;  %v11098_v6 = vld [vmem:[%s12994_s12 + $0x34] ss:$8 sps:$4 sm:$0xff]  }
 0x924   :  { %3374 = vmatpush1.bf16.msra.mxu0 %v8809_v30  ;;  %3621 = vmatpush1.bf16.msra.mxu1 %v11059_v11 }
 0x925   :  { %3375 = vmatprep.subr.bf16.mxu0 %v8814_v32  ;;  %3622 = vmatprep.subr.bf16.mxu1 %v11068_v35 }
 0x928   :  { %3376 = vmatpush1.bf16.msra.mxu0 %v8812_v37  ;;  %3623 = vmatpush1.bf16.msra.mxu1 %v11080_v38 }
 0x929   :  { %3624 = vmatprep.subr.bf16.mxu1 %v11086_v15  ;;  %3766 = vmatprep.subr.bf16.mxu0 %v11051_v28 }
 0x92b   :  { %3378 = vmatmul.mubr.bf16.vlgmr.msra.gmra.mrb[24].mxu0 %v10868_v0  ;;  %v11120_v0 = vld [vmem:[%s12994_s12 + $0x40] ss:$8 sps:$4 sm:$0xff]  }
 0x92c   :  { %3625 = vmatpush1.bf16.msra.mxu1 %v11092_v34  ;;  %3767 = vmatpush1.bf16.msra.mxu0 %v11059_v11 }
 0x92d   :  { %3626 = vmatprep.subr.bf16.mxu1 %v11098_v6  ;;  %3768 = vmatprep.subr.bf16.mxu0 %v11068_v35 }
 0x930   :  { %3627 = vmatpush1.bf16.msra.mxu1 %v11106_v39  ;;  %3769 = vmatpush1.bf16.msra.mxu0 %v11080_v38 }
 0x931   :  { %3628 = vmatprep.subr.bf16.mxu1 %v11113_v40  ;;  %3770 = vmatprep.subr.bf16.mxu0 %v11086_v15 }
 0x934   :  { %3629 = vmatpush1.bf16.msra.mxu1 %v11120_v0  ;;  %3771 = vmatpush1.bf16.msra.mxu0 %v11092_v34 }
 0x935   :  { %3630 = vmatprep.subr.bf16.mxu1 %v11127_v41  ;;  %3772 = vmatprep.subr.bf16.mxu0 %v11098_v6 }
 0x938   :  { %3631 = vmatpush1.bf16.msra.mxu1 %v11134_v42  ;;  %3773 = vmatpush1.bf16.msra.mxu0 %v11106_v39 }
 0x939   :  { %3632 = vmatprep.subr.bf16.mxu1 %v11141_v43  ;;  %3774 = vmatprep.subr.bf16.mxu0 %v11113_v40 }
 0x93c   :  { %3633 = vmatpush1.bf16.msra.mxu1 %v11148_v44  ;;  %3775 = vmatpush1.bf16.msra.mxu0 %v11120_v0 }
 0x93d   :  { %3776 = vmatprep.subr.bf16.mxu0 %v11127_v41  ;;  %3634 = vmatprep.subr.bf16.mxu1 %v11162_v45 }
 0x940   :  { %3777 = vmatpush1.bf16.msra.mxu0 %v11134_v42  ;;  %3635 = vmatpush1.bf16.msra.mxu1 %v11167_v46 }
 0x941   :  { %3778 = vmatprep.subr.bf16.mxu0 %v11141_v43  ;;  %3636 = vmatprep.subr.bf16.mxu1 %v11176_v47 }
 0x944   :  { %3779 = vmatpush1.bf16.msra.mxu0 %v11148_v44  ;;  %3637 = vmatpush1.bf16.msra.mxu1 %v11181_v48 }
 0x945   :  { %3780 = vmatprep.subr.bf16.mxu0 %v11162_v45  ;;  %3638 = vmatprep.subr.bf16.mxu1 %v11190_v49 }
 0x948   :  { %3781 = vmatpush1.bf16.msra.mxu0 %v11167_v46  ;;  %3639 = vmatpush1.bf16.msra.mxu1 %v11195_v50 }
 0x949   :  { %3782 = vmatprep.subr.bf16.mxu0 %v11176_v47  ;;  %3640 = vmatprep.subr.bf16.mxu1 %v11204_v51 }
 0x94c   :  { %3783 = vmatpush1.bf16.msra.mxu0 %v11181_v48  ;;  %3641 = vmatpush1.bf16.msra.mxu1 %v11209_v52 }
 0x94d   :  { %3784 = vmatprep.subr.bf16.mxu0 %v11190_v49  ;;  %3642 = vmatprep.subr.bf16.mxu1 %v11218_v53 }
 0x950   :  { %3785 = vmatpush1.bf16.msra.mxu0 %v11195_v50  ;;  %3643 = vmatpush1.bf16.msra.mxu1 %v11223_v54 }
 0x951   :  { %3786 = vmatprep.subr.bf16.mxu0 %v11204_v51  ;;  %3644 = vmatprep.subr.bf16.mxu1 %v11232_v55 }
 0x954   :  { %3787 = vmatpush1.bf16.msra.mxu0 %v11209_v52  ;;  %3645 = vmatpush1.bf16.msra.mxu1 %v11237_v33 }
 0x955   :  { %3788 = vmatprep.subr.bf16.mxu0 %v11218_v53  ;;  %3646 = vmatprep.subr.bf16.mxu1 %v11246_v13 }
 0x958   :  { %3789 = vmatpush1.bf16.msra.mxu0 %v11223_v54  ;;  %3647 = vmatpush1.bf16.msra.mxu1 %v11251_v24 }
 0x959   :  { %3790 = vmatprep.subr.bf16.mxu0 %v11232_v55  ;;  %3648 = vmatprep.subr.bf16.mxu1 %v11256_v3 }
 0x95c   :  { %3791 = vmatpush1.bf16.msra.mxu0 %v11237_v33  ;;  %3649 = vmatpush1.bf16.msra.mxu1 %v11264_v7 }
 0x95d   :  { %3792 = vmatprep.subr.bf16.mxu0 %v11246_v13  ;;  %3650 = vmatprep.subr.bf16.mxu1 %v11271_v2 }
 0x960   :  { %3793 = vmatpush1.bf16.msra.mxu0 %v11251_v24  ;;  %3651 = vmatpush1.bf16.msra.mxu1 %v11278_v4 }
 0x961   :  { %3794 = vmatprep.subr.bf16.mxu0 %v11256_v3  ;;  %3661 = vmatprep.subr.bf16.mxu1 %v11051_v28 }
 0x964   :  { %3795 = vmatpush1.bf16.msra.mxu0 %v11264_v7 }
 0x965   :  { %3796 = vmatprep.subr.bf16.mxu0 %v11271_v2 }
 0x968   :  { %3797 = vmatpush1.bf16.msra.mxu0 %v11278_v4 }
 0x969   :  { %3807 = vmatprep.subr.bf16.mxu0 %v11051_v28 }
 0x9f6   :  { %v11287_v25 = vpop.f32.mrb[36].mxu1 }
 0x9f7   :  { %v11289_v8 = vpop.f32.mrb[37].mxu1 }
 0x9f8   :  { %13071 = vst [vmem:[#allocation3_spill] sm:$0xff] %v11289_v8  ;;  %v11291_v58 = vpop.f32.mrb[38].mxu1 }
 0x9f9   :  { %v3388_v10 = vadd.f32 %v11291_v58, %v11287_v25  ;;  %v11295_v9 = vpop.f32.mrb[39].mxu1 }
 0x9fa   :  { %13072 = vst [vmem:[#allocation4_spill] sm:$0xff] %v11295_v9  ;;  %v3395_v12 = vadd.f32 %v11295_v9, %v11289_v8 }
 0x9fb   :  { %v3389_v14 = vrot.slane %v3388_v10, 4 }
 0x9fc   :  { %v3396_v16 = vrot.slane %v3395_v12, 4 }
 0x9fd   :  { %v3390_v19 = vadd.f32 %v3389_v14, %v3388_v10 }
 0x9fe   :  { %v3397_v61 = vadd.f32 %v3396_v16, %v3395_v12  ;;  %v11299_v17 = vpop.f32.mrb[24].mxu0 }
 0x9ff   :  { %v11301_v21 = vpop.f32.mrb[25].mxu0  ;;  %v3391_v60 = vrot.slane %v3390_v19, 2 }
 0xa00   :  { %13073 = vst [vmem:[#allocation5_spill] sm:$0xff] %v11301_v21  ;;  %v11303_v36 = vpop.f32.mrb[26].mxu0  ;;  %v3398_v56 = vrot.slane %v3397_v61, 2 }
 0xa01   :  { %13074 = vst [vmem:[#allocation6_spill] sm:$0xff] %v11303_v36  ;;  %v3402_v57 = vadd.f32 %v11303_v36, %v11299_v17  ;;  %v11307_v63 = vpop.f32.mrb[27].mxu0  ;;  %v3392_v20 = vadd.f32 %v3391_v60, %v3390_v19 }
 0xa02   :  { %13075 = vst [vmem:[#allocation7_spill] sm:$0xff] %v11307_v63  ;;  %v3409_v1 = vadd.f32 %v11307_v63, %v11301_v21  ;;  %v3399_v5 = vadd.f32 %v3398_v56, %v3397_v61 }
 0xa03   :  { %v3403_v31 = vrot.slane %v3402_v57, 4  ;;  %v3393_v28 = vrot.slane %v3392_v20, 1 }
 0xa04   :  { %v3410_v18 = vrot.slane %v3409_v1, 4  ;;  %v3400_v32 = vrot.slane %v3399_v5, 1 }
 0xa05   :  { %v3404_v23 = vadd.f32 %v3403_v31, %v3402_v57  ;;  %v3394_v14 = vadd.f32 %v3393_v28, %v3392_v20 }
 0xa06   :  { %v3411_v22 = vadd.f32 %v3410_v18, %v3409_v1  ;;  %v3401_v62 = vadd.f32 %v3400_v32, %v3399_v5 }
 0xa07   :  { %v3405_v26 = vrot.slane %v3404_v23, 2 }
 0xa08   :  { %v3412_v27 = vrot.slane %v3411_v22, 2  ;;  %v13076_v5 = vld [vmem:[#allocation6_spill] sm:$0xff] }
 0xa09   :  { %v3406_v30 = vadd.f32 %v3405_v26, %v3404_v23 }
 0xa0a   :  { %v3413_v37 = vadd.f32 %v3412_v27, %v3411_v22  ;;  %v13078_v27 = vld [vmem:[#allocation3_spill] sm:$0xff] }
 0xa0b   :  { %v3407_v10 = vrot.slane %v3406_v30, 1 }
 0xa0c   :  { %v3414_v12 = vrot.slane %v3413_v37, 1 }
 0xa0d   :  { %v3408_v16 = vadd.f32 %v3407_v10, %v3406_v30  ;;  %v13080_v30 = vld [vmem:[#allocation4_spill] sm:$0xff] }
 0xa0e   :  { %v3415_v9 = vadd.f32 %v3414_v12, %v3413_v37  ;;  %v13082_v37 = vld [vmem:[#allocation5_spill] sm:$0xff] }
 0xa0f   :  { %v3416_v8 = vadd.f32 %v3408_v16, %v3394_v14 }
 0xa10   :  { %v3417_v63 = vadd.f32 %v3415_v9, %v3401_v62 }
 0xa11   :  { %v3418_v21 = vmul.f32 0.001953125, %v3416_v8 }
 0xa12   :  { %v3419_v36 = vmul.f32 0.001953125, %v3417_v63 }
 0xa13   :  { %v3452_v19 = vpack.c.bf16 %v3418_v21, %v3418_v21 }
 0xa14   :  { %v3453_v60 = vpack.c.bf16 %v3419_v36, %v3419_v36 }
 0xa15   :  { %v3454_v61 = vunpack.c.l.bf16 %v3452_v19 }
 0xa16   :  { %v3455_v57 = vunpack.c.l.bf16 %v3453_v60 }
 0xa17   :  { %v3456_v56 = vsub.f32 %v3418_v21, %v3454_v61 }
 0xa18   :  { %v3457_v1 = vsub.f32 %v3419_v36, %v3455_v57 }
 0xa19   :  { %v3458_v18 = vpack.c.bf16 %v3456_v56, %v3456_v56 }
 0xa1a   :  { %v3459_v31 = vpack.c.bf16 %v3457_v1, %v3457_v1 }
 0xa1c   :  { %3652 = vmatprep.mubr.bf16.mxu1 %v3459_v31 }
 0xa1d   :  { %3653 = vmatmul.mubr.bf16.vlgmr.msra.gmra.mrb[40].mxu1 %v3458_v18 }
 0xa1e   :  { %3662 = vmatpush1.bf16.msra.mxu1 %v11059_v11  ;;  %3693 = vmatprep.mubr.bf16.mxu1 %v3453_v60 }
 0xa1f   :  { %3663 = vmatprep.subr.bf16.mxu1 %v11068_v35 }
 0xa22   :  { %3664 = vmatpush1.bf16.msra.mxu1 %v11080_v38 }
 0xa23   :  { %3665 = vmatprep.subr.bf16.mxu1 %v11086_v15 }
 0xa26   :  { %3666 = vmatpush1.bf16.msra.mxu1 %v11092_v34 }
 0xa27   :  { %3667 = vmatprep.subr.bf16.mxu1 %v11098_v6 }
 0xa2a   :  { %3668 = vmatpush1.bf16.msra.mxu1 %v11106_v39 }
 0xa2b   :  { %3669 = vmatprep.subr.bf16.mxu1 %v11113_v40 }
 0xa2e   :  { %3670 = vmatpush1.bf16.msra.mxu1 %v11120_v0 }
 0xa2f   :  { %3671 = vmatprep.subr.bf16.mxu1 %v11127_v41 }
 0xa32   :  { %3672 = vmatpush1.bf16.msra.mxu1 %v11134_v42 }
 0xa33   :  { %3673 = vmatprep.subr.bf16.mxu1 %v11141_v43 }
 0xa36   :  { %3674 = vmatpush1.bf16.msra.mxu1 %v11148_v44 }
 0xa37   :  { %3675 = vmatprep.subr.bf16.mxu1 %v11162_v45 }
 0xa3a   :  { %3676 = vmatpush1.bf16.msra.mxu1 %v11167_v46 }
 0xa3b   :  { %3677 = vmatprep.subr.bf16.mxu1 %v11176_v47 }
 0xa3e   :  { %3678 = vmatpush1.bf16.msra.mxu1 %v11181_v48 }
 0xa3f   :  { %3679 = vmatprep.subr.bf16.mxu1 %v11190_v49 }
 0xa42   :  { %3680 = vmatpush1.bf16.msra.mxu1 %v11195_v50 }
 0xa43   :  { %3681 = vmatprep.subr.bf16.mxu1 %v11204_v51 }
 0xa46   :  { %3682 = vmatpush1.bf16.msra.mxu1 %v11209_v52 }
 0xa47   :  { %3683 = vmatprep.subr.bf16.mxu1 %v11218_v53 }
 0xa4a   :  { %3684 = vmatpush1.bf16.msra.mxu1 %v11223_v54 }
 0xa4b   :  { %3685 = vmatprep.subr.bf16.mxu1 %v11232_v55 }
 0xa4e   :  { %3686 = vmatpush1.bf16.msra.mxu1 %v11237_v33 }
 0xa4f   :  { %3687 = vmatprep.subr.bf16.mxu1 %v11246_v13 }
 0xa52   :  { %3688 = vmatpush1.bf16.msra.mxu1 %v11251_v24 }
 0xa53   :  { %3689 = vmatprep.subr.bf16.mxu1 %v11256_v3 }
 0xa56   :  { %3690 = vmatpush1.bf16.msra.mxu1 %v11264_v7 }
 0xa57   :  { %3691 = vmatprep.subr.bf16.mxu1 %v11271_v2 }
 0xa5a   :  { %3692 = vmatpush1.bf16.msra.mxu1 %v11278_v4 }
 0xa5d   :  { %3694 = vmatmul.mubr.bf16.vlgmr.msra.gmra.mrb[40].mxu1 %v3452_v19 }
 0xa5e   :  { %3966 = vmatprep.mubr.bf16.mxu1 %v13070_v59 }
 0xb30   :  { %v3695_v62 = vpop.f32.mrb[40].mxu1 }
 0xb31   :  { %v3705_v8 = vrot.slane %v3695_v62, %v9844_v29  ;;  %v3697_v9 = vpop.f32.mrb[41].mxu1 }
 0xb32   :  { %v3709_v21 = vrot.slane %v3697_v9, %v9844_v29  ;;  %v3699_v36 = vpop.f32.mrb[42].mxu1 }
 0xb33   :  { %v11346_v63 = vsub.f32 %v11287_v25, %v3705_v8  ;;  %v11349_v20 = vsub.f32 %v11291_v58, %v3705_v8  ;;  %v11352_v23 = vsub.f32 %v11299_v17, %v3705_v8  ;;  %v11355_v22 = vsub.f32 %v13076_v5, %v3705_v8  ;;  %v3700_v26 = vpop.f32.mrb[43].mxu1  ;;  %v13084_v25 = vld [vmem:[#allocation7_spill] sm:$0xff] }
 0xb34   :  { %v11358_v28 = vsub.f32 %v13078_v27, %v3709_v21  ;;  %v11361_v32 = vsub.f32 %v13080_v30, %v3709_v21  ;;  %v11364_v10 = vsub.f32 %v13082_v37, %v3709_v21  ;;  %v11367_v12 = vsub.f32 %v13084_v25, %v3709_v21 }
 0xb35   :  { %13077 = vst [vmem:[#allocation6_spill] sm:$0xff] %v11355_v22  ;;  %v3718_v58 = vmul.f32 %v11346_v63, %v11346_v63  ;;  %v3720_v17 = vmul.f32 %v11349_v20, %v11349_v20  ;;  %v3736_v14 = vmul.f32 %v11352_v23, %v11352_v23  ;;  %v3738_v16 = vmul.f32 %v11355_v22, %v11355_v22 }
 0xb36   :  { %13079 = vst [vmem:[#allocation3_spill] sm:$0xff] %v11358_v28  ;;  %13081 = vst [vmem:[#allocation4_spill] sm:$0xff] %v11361_v32  ;;  %v3719_v19 = vmul.f32 %v11358_v28, %v11358_v28  ;;  %v3721_v60 = vmul.f32 %v11361_v32, %v11361_v32  ;;  %v3737_v61 = vmul.f32 %v11364_v10, %v11364_v10 }
 0xb37   :  { %13083 = vst [vmem:[#allocation5_spill] sm:$0xff] %v11364_v10  ;;  %13085 = vst [vmem:[#allocation7_spill] sm:$0xff] %v11367_v12  ;;  %v3739_v57 = vmul.f32 %v11367_v12, %v11367_v12  ;;  %v3722_v56 = vadd.f32 %v3720_v17, %v3718_v58  ;;  %v3740_v1 = vadd.f32 %v3738_v16, %v3736_v14 }
 0xb38   :  { %v3729_v31 = vadd.f32 %v3721_v60, %v3719_v19 }
 0xb39   :  { %v3747_v18 = vadd.f32 %v3739_v57, %v3737_v61  ;;  %v3723_v62 = vrot.slane %v3722_v56, 4  ;;  %v3741_v8 = vrot.slane %v3740_v1, 4 }
 0xb3a   :  { %v3730_v9 = vrot.slane %v3729_v31, 4 }
 0xb3b   :  { %v3748_v21 = vrot.slane %v3747_v18, 4  ;;  %v3724_v36 = vadd.f32 %v3723_v62, %v3722_v56  ;;  %v3742_v5 = vadd.f32 %v3741_v8, %v3740_v1 }
 0xb3c   :  { %v3731_v26 = vadd.f32 %v3730_v9, %v3729_v31 }
 0xb3d   :  { %v3749_v27 = vadd.f32 %v3748_v21, %v3747_v18  ;;  %v3725_v30 = vrot.slane %v3724_v36, 2  ;;  %v3743_v37 = vrot.slane %v3742_v5, 2 }
 0xb3e   :  { %v3732_v25 = vrot.slane %v3731_v26, 2 }
 0xb3f   :  { %v3750_v32 = vrot.slane %v3749_v27, 2  ;;  %v3726_v10 = vadd.f32 %v3725_v30, %v3724_v36  ;;  %v3744_v28 = vadd.f32 %v3743_v37, %v3742_v5  ;;  %v13091_v30 = vld [vmem:[#allocation7_spill] sm:$0xff] }
 0xb40   :  { %v3733_v22 = vadd.f32 %v3732_v25, %v3731_v26 }
 0xb41   :  { %v3751_v12 = vadd.f32 %v3750_v32, %v3749_v27  ;;  %v3727_v58 = vrot.slane %v3726_v10, 1  ;;  %v3745_v17 = vrot.slane %v3744_v28, 1 }
 0xb42   :  { %v3734_v14 = vrot.slane %v3733_v22, 1 }
 0xb43   :  { %v3752_v16 = vrot.slane %v3751_v12, 1  ;;  %v3728_v19 = vadd.f32 %v3727_v58, %v3726_v10  ;;  %v3746_v60 = vadd.f32 %v3745_v17, %v3744_v28  ;;  %v13089_v28 = vld [vmem:[#allocation4_spill] sm:$0xff] }
 0xb44   :  { %v3735_v61 = vadd.f32 %v3734_v14, %v3733_v22 }
 0xb45   :  { %v3753_v57 = vadd.f32 %v3752_v16, %v3751_v12  ;;  %v3754_v56 = vadd.f32 %v3746_v60, %v3728_v19  ;;  %v13090_v12 = vld [vmem:[#allocation5_spill] sm:$0xff] }
 0xb47   :  { %v3755_v1 = vadd.f32 %v3753_v57, %v3735_v61  ;;  %v3756_v31 = vmul.f32 0.001953125, %v3754_v56 }
 0xb49   :  { %v3757_v18 = vmul.f32 0.001953125, %v3755_v1  ;;  %v3758_v62 = vpack.c.bf16 %v3756_v31, %v3756_v31 }
 0xb4b   :  { %v3759_v8 = vpack.c.bf16 %v3757_v18, %v3757_v18  ;;  %v3760_v9 = vunpack.c.l.bf16 %v3758_v62 }
 0xb4d   :  { %v3761_v21 = vunpack.c.l.bf16 %v3759_v8  ;;  %v3762_v36 = vsub.f32 %v3756_v31, %v3760_v9 }
 0xb4f   :  { %v3763_v5 = vsub.f32 %v3757_v18, %v3761_v21  ;;  %v3764_v32 = vpack.c.bf16 %v3762_v36, %v3762_v36  ;;  %v8871_v21 = vld [vmem:[%s12996_s16 + $0x4] ss:$8 sps:$4 sm:$0xff]  }
 0xb51   :  { %v3765_v26 = vpack.c.bf16 %v3763_v5, %v3763_v5  ;;  %v8863_v5 = vld [vmem:[%s12995_s15] sm:$0xff]  }
 0xb53   :  { %3798 = vmatprep.mubr.bf16.mxu0 %v3765_v26  ;;  %v8864_v26 = vld [vmem:[%s12995_s15 + $0x10] sm:$0xff]  }
 0xb54   :  { %3799 = vmatmul.mubr.bf16.vlgmr.msra.gmra.mrb[28].mxu0 %v3764_v32  ;;  %v8869_v32 = vld [vmem:[%s12996_s16] ss:$8 sps:$4 sm:$0xff]  }
 0xb55   :  { %3808 = vmatpush1.bf16.msra.mxu0 %v11059_v11  ;;  %3839 = vmatprep.mubr.bf16.mxu0 %v3759_v8 }
 0xb56   :  { %3809 = vmatprep.subr.bf16.mxu0 %v11068_v35 }
 0xb59   :  { %3810 = vmatpush1.bf16.msra.mxu0 %v11080_v38 }
 0xb5a   :  { %3811 = vmatprep.subr.bf16.mxu0 %v11086_v15 }
 0xb5d   :  { %3812 = vmatpush1.bf16.msra.mxu0 %v11092_v34 }
 0xb5e   :  { %3813 = vmatprep.subr.bf16.mxu0 %v11098_v6 }
 0xb61   :  { %3814 = vmatpush1.bf16.msra.mxu0 %v11106_v39 }
 0xb62   :  { %3815 = vmatprep.subr.bf16.mxu0 %v11113_v40 }
 0xb65   :  { %3816 = vmatpush1.bf16.msra.mxu0 %v11120_v0 }
 0xb66   :  { %3817 = vmatprep.subr.bf16.mxu0 %v11127_v41 }
 0xb69   :  { %3818 = vmatpush1.bf16.msra.mxu0 %v11134_v42 }
 0xb6a   :  { %3819 = vmatprep.subr.bf16.mxu0 %v11141_v43 }
 0xb6d   :  { %3820 = vmatpush1.bf16.msra.mxu0 %v11148_v44  ;;  %v3852_v44 = vld [vmem:[%s12997_s13] sm:$0x3] }
 0xb6e   :  { %3821 = vmatprep.subr.bf16.mxu0 %v11162_v45  ;;  %v3857_v45 = vrot.slane %v3852_v44, %v9844_v29 }
 0xb71   :  { %3822 = vmatpush1.bf16.msra.mxu0 %v11167_v46  ;;  %v13086_v46 = vld [vmem:[#allocation2_spill] sm:$0xff] }
 0xb72   :  { %3823 = vmatprep.subr.bf16.mxu0 %v11176_v47  ;;  %v3861_v47 = vrot.slane %v3852_v44, %v13086_v46  ;;  %v8892_v44 = vld [vmem:[%s12996_s16 + $0x214] ss:$8 sps:$4 sm:$0xff]  }
 0xb75   :  { %3824 = vmatpush1.bf16.msra.mxu0 %v11181_v48 }
 0xb76   :  { %3825 = vmatprep.subr.bf16.mxu0 %v11190_v49  ;;  %v3878_v49 = vld [vmem:[%s12998_s14] sm:$0x3] }
 0xb79   :  { %3826 = vmatpush1.bf16.msra.mxu0 %v11195_v50 }
 0xb7a   :  { %3827 = vmatprep.subr.bf16.mxu0 %v11204_v51 }
 0xb7d   :  { %3828 = vmatpush1.bf16.msra.mxu0 %v11209_v52 }
 0xb7e   :  { %3829 = vmatprep.subr.bf16.mxu0 %v11218_v53 }
 0xb81   :  { %3830 = vmatpush1.bf16.msra.mxu0 %v11223_v54  ;;  %v3883_v54 = vrot.slane %v3878_v49, %v9844_v29 }
 0xb82   :  { %3831 = vmatprep.subr.bf16.mxu0 %v11232_v55 }
 0xb85   :  { %3832 = vmatpush1.bf16.msra.mxu0 %v11237_v33  ;;  %v3887_v33 = vrot.slane %v3878_v49, %v13086_v46  ;;  %v8898_v49 = vld [vmem:[%s12996_s16 + $0x224] ss:$8 sps:$4 sm:$0xff]  }
 0xb86   :  { %3833 = vmatprep.subr.bf16.mxu0 %v11246_v13 }
 0xb89   :  { %3834 = vmatpush1.bf16.msra.mxu0 %v11251_v24 }
 0xb8a   :  { %3835 = vmatprep.subr.bf16.mxu0 %v11256_v3 }
 0xb8d   :  { %3836 = vmatpush1.bf16.msra.mxu0 %v11264_v7  ;;  %v13087_v7 = vld [vmem:[#allocation6_spill] sm:$0xff] }
 0xb8e   :  { %3837 = vmatprep.subr.bf16.mxu0 %v11271_v2 }
 0xb91   :  { %3838 = vmatpush1.bf16.msra.mxu0 %v11278_v4  ;;  %v13088_v4 = vld [vmem:[#allocation3_spill] sm:$0xff] }
 0xb94   :  { %3840 = vmatmul.mubr.bf16.vlgmr.msra.gmra.mrb[32].mxu0 %v3758_v62 }
 0xb95   :  { %4044 = vmatprep.mubr.bf16.mxu0 %v13070_v59 }
 0xc27   :  { %v3800_v11 = vpop.f32.mrb[28].mxu0 }
 0xc28   :  { %v3802_v35 = vpop.f32.mrb[29].mxu0 }
 0xc29   :  { %v3804_v38 = vpop.f32.mrb[30].mxu0 }
 0xc2a   :  { %v3805_v15 = vpop.f32.mrb[31].mxu0  ;;  %v8872_v38 = vld [vmem:[%s12996_s16 + $0x10] ss:$8 sps:$4 sm:$0xff]  }
 0xc2b   :  { %v8865_v15 = vld [vmem:[%s12995_s15 + $0x8] sm:$0xff]  }
 0xc67   :  { %v3841_v34 = vpop.f32.mrb[32].mxu0 }
 0xc68   :  { %v3842_v6 = vadd.f32 %v3841_v34, %v3800_v11  ;;  %v3843_v39 = vpop.f32.mrb[33].mxu0  ;;  %v8874_v11 = vld [vmem:[%s12996_s16 + $0x14] ss:$8 sps:$4 sm:$0xff]  }
 0xc69   :  { %v3844_v40 = vadd.f32 %v3843_v39, %v3802_v35  ;;  %v3845_v0 = vpop.f32.mrb[34].mxu0  ;;  %v8886_v35 = vld [vmem:[%s12996_s16 + $0x204] ss:$8 sps:$4 sm:$0xff]   ;;  %v8866_v34 = vld [vmem:[%s12995_s15 + $0x18] sm:$0xff]   ;;  %v8875_v39 = vld [vmem:[%s12996_s16 + $0x20] ss:$8 sps:$4 sm:$0xff]  }
 0xc6a   :  { %v3848_v41 = vadd.f32 1e-05, %v3842_v6  ;;  %v3846_v42 = vpop.f32.mrb[35].mxu0  ;;  %v8877_v6 = vld [vmem:[%s12996_s16 + $0x24] ss:$8 sps:$4 sm:$0xff]  }
 0xc6b   :  { %v3849_v43 = vadd.f32 1e-05, %v3844_v40  ;;  %v8880_v40 = vld [vmem:[%s12996_s16 + $0x34] ss:$8 sps:$4 sm:$0xff]   ;;  %v8878_v0 = vld [vmem:[%s12996_s16 + $0x30] ss:$8 sps:$4 sm:$0xff]  }
 0xc6c   :  { %9321 = vrsqrt.f32 %v3848_v41  ;;  %v8867_v41 = vld [vmem:[%s12995_s15 + $0x20] sm:$0xff]  }
 0xc6d   :  { %9323 = vrsqrt.f32 %v3849_v43  ;;  %v8883_v42 = vld [vmem:[%s12996_s16 + $0x44] ss:$8 sps:$4 sm:$0xff]   ;;  %v8884_v43 = vld [vmem:[%s12996_s16 + $0x200] ss:$8 sps:$4 sm:$0xff]  }
 0xc76   :  { %v9322_v48 = vpop.eup %9321 }
 0xc77   :  { %v9324_v50 = vpop.eup %9323  ;;  %v3864_v51 = vmul.f32 %v9322_v48, %v3857_v45  ;;  %v8881_v45 = vld [vmem:[%s12996_s16 + $0x40] ss:$8 sps:$4 sm:$0xff]   ;;  %v8890_v48 = vld [vmem:[%s12996_s16 + $0x210] ss:$8 sps:$4 sm:$0xff]  }
 0xc78   :  { %v3865_v52 = vmul.f32 %v9324_v50, %v3861_v47  ;;  %v8889_v47 = vld [vmem:[%s12996_s16 + $0x54] ss:$8 sps:$4 sm:$0xff]   ;;  %v8887_v50 = vld [vmem:[%s12996_s16 + $0x50] ss:$8 sps:$4 sm:$0xff]  }
 0xc79   :  { %v3869_v53 = vrot.slane %v3864_v51, %v9844_v29  ;;  %v8868_v51 = vld [vmem:[%s12995_s15 + $0x28] sm:$0xff]  }
 0xc7a   :  { %v3873_v55 = vrot.slane %v3865_v52, %v9844_v29  ;;  %v8895_v52 = vld [vmem:[%s12996_s16 + $0x64] ss:$8 sps:$4 sm:$0xff]  }
 0xc7b   :  { %v3874_v13 = vmul.f32 %v3869_v53, %v11346_v63  ;;  %v3876_v24 = vmul.f32 %v3869_v53, %v11349_v20  ;;  %v3898_v3 = vmul.f32 %v3869_v53, %v11352_v23  ;;  %v3900_v2 = vmul.f32 %v3869_v53, %v13087_v7  ;;  %v8896_v53 = vld [vmem:[%s12996_s16 + $0x220] ss:$8 sps:$4 sm:$0xff]   ;;  %v8907_v7 = vld [vmem:[%s12996_s16 + $0x84] ss:$8 sps:$4 sm:$0xff]  }
 0xc7c   :  { %v3875_v22 = vmul.f32 %v3873_v55, %v13088_v4  ;;  %v3877_v10 = vmul.f32 %v3873_v55, %v13089_v28  ;;  %v3899_v27 = vmul.f32 %v3873_v55, %v13090_v12  ;;  %v3901_v37 = vmul.f32 %v3873_v55, %v13091_v30  ;;  %v8893_v55 = vld [vmem:[%s12996_s16 + $0x60] ss:$8 sps:$4 sm:$0xff]   ;;  %v8916_v4 = vld [vmem:[%s12996_s16 + $0x254] ss:$8 sps:$4 sm:$0xff]   ;;  %v8922_v12 = vld [vmem:[%s12996_s16 + $0x264] ss:$8 sps:$4 sm:$0xff]  }
 0xc7d   :  { %v3890_v25 = vadd.f32 %v3883_v54, %v3874_v13  ;;  %v3892_v58 = vadd.f32 %v3883_v54, %v3876_v24  ;;  %v3902_v60 = vadd.f32 %v3898_v3, %v3883_v54  ;;  %v3904_v23 = vadd.f32 %v3900_v2, %v3883_v54  ;;  %v8904_v54 = vld [vmem:[%s12996_s16 + $0x234] ss:$8 sps:$4 sm:$0xff]   ;;  %v8902_v13 = vld [vmem:[%s12996_s16 + $0x230] ss:$8 sps:$4 sm:$0xff]   ;;  %v8910_v24 = vld [vmem:[%s12996_s16 + $0x244] ss:$8 sps:$4 sm:$0xff]  }
 0xc7e   :  { %v3891_v17 = vadd.f32 %v3887_v33, %v3875_v22  ;;  %v3893_v14 = vadd.f32 %v3887_v33, %v3877_v10  ;;  %v3903_v16 = vadd.f32 %v3899_v27, %v3887_v33  ;;  %v3905_v63 = vadd.f32 %v3901_v37, %v3887_v33  ;;  %v8901_v33 = vld [vmem:[%s12996_s16 + $0x74] ss:$8 sps:$4 sm:$0xff]   ;;  %v8899_v3 = vld [vmem:[%s12996_s16 + $0x70] ss:$8 sps:$4 sm:$0xff]   ;;  %v8908_v2 = vld [vmem:[%s12996_s16 + $0x240] ss:$8 sps:$4 sm:$0xff]  }
 0xc7f   :  { %v3894_v19 = vmax.f32 %v3890_v25, 0.0  ;;  %v3896_v20 = vmax.f32 %v3892_v58, 0.0  ;;  %v3906_v62 = vmax.f32 %v3902_v60, 0.0  ;;  %v3908_v8 = vmax.f32 %v3904_v23, 0.0  ;;  %v8905_v22 = vld [vmem:[%s12996_s16 + $0x80] ss:$8 sps:$4 sm:$0xff]  }
 0xc80   :  { %v3895_v61 = vmax.f32 %v3891_v17, 0.0  ;;  %v3897_v57 = vmax.f32 %v3893_v14, 0.0  ;;  %v3907_v56 = vmax.f32 %v3903_v16, 0.0  ;;  %v3909_v1 = vmax.f32 %v3905_v63, 0.0  ;;  %v8913_v28 = vld [vmem:[%s12996_s16 + $0x94] ss:$8 sps:$4 sm:$0xff]  }
 0xc81   :  { %v3910_v18 = vpack.c.bf16 %v3896_v20, %v3894_v19  ;;  %v3912_v36 = vpack.c.bf16 %v3908_v8, %v3906_v62  ;;  %v8914_v10 = vld [vmem:[%s12996_s16 + $0x250] ss:$8 sps:$4 sm:$0xff]   ;;  %v8919_v30 = vld [vmem:[%s12996_s16 + $0xa4] ss:$8 sps:$4 sm:$0xff]   ;;  %v8920_v37 = vld [vmem:[%s12996_s16 + $0x260] ss:$8 sps:$4 sm:$0xff]  }
 0xc82   :  { %v3911_v31 = vpack.c.bf16 %v3897_v57, %v3895_v61  ;;  %v3913_v9 = vpack.c.bf16 %v3909_v1, %v3907_v56  ;;  %v8911_v27 = vld [vmem:[%s12996_s16 + $0x90] ss:$8 sps:$4 sm:$0xff]   ;;  %v8928_v25 = vld [vmem:[%s12996_s16 + $0x274] ss:$8 sps:$4 sm:$0xff]   ;;  %v8917_v58 = vld [vmem:[%s12996_s16 + $0xa0] ss:$8 sps:$4 sm:$0xff]  }
 0xc83   :  { %v8925_v17 = vld [vmem:[%s12996_s16 + $0xb4] ss:$8 sps:$4 sm:$0xff]   ;;  %v8926_v14 = vld [vmem:[%s12996_s16 + $0x270] ss:$8 sps:$4 sm:$0xff]   ;;  %v8934_v16 = vld [vmem:[%s12996_s16 + $0x284] ss:$8 sps:$4 sm:$0xff]  }
 0xc84   :  { %3934 = vmatprep.subr.bf16.mxu1 %v3911_v31  ;;  %4012 = vmatprep.subr.bf16.mxu0 %v3911_v31  ;;  %v8923_v63 = vld [vmem:[%s12996_s16 + $0xb0] ss:$8 sps:$4 sm:$0xff]   ;;  %v8931_v19 = vld [vmem:[%s12996_s16 + $0xc4] ss:$8 sps:$4 sm:$0xff]   ;;  %v8932_v20 = vld [vmem:[%s12996_s16 + $0x280] ss:$8 sps:$4 sm:$0xff]  }
 0xc85   :  { %3935 = vmatpush1.bf16.msra.mxu1 %v3910_v18  ;;  %4013 = vmatpush1.bf16.msra.mxu0 %v3910_v18  ;;  %v8940_v60 = vld [vmem:[%s12996_s16 + $0x294] ss:$8 sps:$4 sm:$0xff]   ;;  %v8929_v23 = vld [vmem:[%s12996_s16 + $0xc0] ss:$8 sps:$4 sm:$0xff]   ;;  %v8938_v57 = vld [vmem:[%s12996_s16 + $0x290] ss:$8 sps:$4 sm:$0xff]  }
 0xc86   :  { %3936 = vmatprep.subr.bf16.mxu1 %v3913_v9  ;;  %4014 = vmatprep.subr.bf16.mxu0 %v3913_v9  ;;  %v8937_v61 = vld [vmem:[%s12996_s16 + $0xd4] ss:$8 sps:$4 sm:$0xff]   ;;  %v8946_v56 = vld [vmem:[%s12996_s16 + $0x2a4] ss:$8 sps:$4 sm:$0xff]   ;;  %v8935_v1 = vld [vmem:[%s12996_s16 + $0xd0] ss:$8 sps:$4 sm:$0xff]  }
 0xc87   :  { %v8941_v62 = vld [vmem:[%s12996_s16 + $0xe0] ss:$8 sps:$4 sm:$0xff]   ;;  %v8949_v8 = vld [vmem:[%s12996_s16 + $0xf4] ss:$8 sps:$4 sm:$0xff]  }
 0xc89   :  { %3937 = vmatpush1.bf16.msra.mxu1 %v3912_v36  ;;  %4015 = vmatpush1.bf16.msra.mxu0 %v3912_v36 }
 0xc8a   :  { %4090 = vmatprep.subr.bf16.mxu1 %v3911_v31  ;;  %4531 = vmatprep.subr.bf16.mxu0 %v8871_v21  ;;  %v8943_v31 = vld [vmem:[%s12996_s16 + $0xe4] ss:$8 sps:$4 sm:$0xff]   ;;  %v8947_v21 = vld [vmem:[%s12996_s16 + $0xf0] ss:$8 sps:$4 sm:$0xff]  }
 0xc8c   :  { %7731 = vmatmul.mubr.msk.bf16.vlgmr.msra.gmra.mrb[44].mxu1 %vm196_vm0, %v8863_v5  ;;  %7739 = vmatmul.mubr.msk.bf16.vlgmr.msra.gmra.mrb[36].mxu0 %vm196_vm0, %v8864_v26  ;;  %v8955_v5 = vld [vmem:[%s12996_s16 + $0x104] ss:$8 sps:$4 sm:$0xff]  }
 0xc8d   :  { %4091 = vmatpush1.bf16.msra.mxu1 %v3910_v18  ;;  %3976 = vmatprep.mubr.bf16.mxu1 %v13070_v59  ;;  %v8944_v18 = vld [vmem:[%s12996_s16 + $0x2a0] ss:$8 sps:$4 sm:$0xff]   ;;  %v8958_v26 = vld [vmem:[%s12996_s16 + $0x2c4] ss:$8 sps:$4 sm:$0xff]  }
 0xc8e   :  { %4092 = vmatprep.subr.bf16.mxu1 %v3913_v9  ;;  %4054 = vmatprep.mubr.bf16.mxu0 %v13070_v59  ;;  %v8952_v9 = vld [vmem:[%s12996_s16 + $0x2b4] ss:$8 sps:$4 sm:$0xff]  }
 0xc8f   :  { %4532 = vmatpush1.bf16.msra.mxu0 %v8869_v32  ;;  %v8956_v32 = vld [vmem:[%s12996_s16 + $0x2c0] ss:$8 sps:$4 sm:$0xff]  }
 0xc90   :  { %4533 = vmatprep.subr.bf16.mxu0 %v8874_v11  ;;  %v8964_v11 = vld [vmem:[%s12996_s16 + $0x2d4] ss:$8 sps:$4 sm:$0xff]  }
 0xc91   :  { %4093 = vmatpush1.bf16.msra.mxu1 %v3912_v36  ;;  %v8950_v36 = vld [vmem:[%s12996_s16 + $0x2b0] ss:$8 sps:$4 sm:$0xff]  }
 0xc92   :  { %5022 = vmatprep.subr.bf16.mxu1 %v8886_v35  ;;  %v8962_v35 = vld [vmem:[%s12996_s16 + $0x2d0] ss:$8 sps:$4 sm:$0xff]  }
 0xc93   :  { %4534 = vmatpush1.bf16.msra.mxu0 %v8872_v38  ;;  %v8970_v38 = vld [vmem:[%s12996_s16 + $0x2e4] ss:$8 sps:$4 sm:$0xff]  }
 0xc94   :  { %7732 = vmatmul.mubr.msk.bf16.gmra.mrb[48].mxu1 %vm196_vm0, %v8865_v15  ;;  %7740 = vmatmul.mubr.msk.bf16.gmra.mrb[40].mxu0 %vm196_vm0, %v8866_v34  ;;  %v8968_v15 = vld [vmem:[%s12996_s16 + $0x2e0] ss:$8 sps:$4 sm:$0xff]   ;;  %v8976_v34 = vld [vmem:[%s12996_s16 + $0x2f4] ss:$8 sps:$4 sm:$0xff]  }
 0xc95   :  { %4122 = vmatprep.mubr.bf16.mxu1 %v13070_v59  ;;  %4535 = vmatprep.subr.bf16.mxu0 %v8877_v6  ;;  %v8974_v6 = vld [vmem:[%s12996_s16 + $0x2f0] ss:$8 sps:$4 sm:$0xff]  }
 0xc97   :  { %4536 = vmatpush1.bf16.msra.mxu0 %v8875_v39  ;;  %v8982_v39 = vld [vmem:[%s12996_s16 + $0x304] ss:$8 sps:$4 sm:$0xff]  }
 0xc98   :  { %4537 = vmatprep.subr.bf16.mxu0 %v8880_v40 }
 0xc9b   :  { %4538 = vmatpush1.bf16.msra.mxu0 %v8878_v0 }
 0xc9c   :  { %7747 = vmatmul.mubr.msk.bf16.vlgmr.msra.gmra.mrb[52].mxu1 %vm196_vm0, %v8867_v41  ;;  %4539 = vmatprep.subr.bf16.mxu0 %v8883_v42 }
 0xc9d   :  { %4132 = vmatprep.mubr.bf16.mxu1 %v13070_v59  ;;  %5023 = vmatpush1.bf16.msra.mxu1 %v8884_v43 }
 0xc9e   :  { %5024 = vmatprep.subr.bf16.mxu1 %v8892_v44 }
 0xc9f   :  { %4540 = vmatpush1.bf16.msra.mxu0 %v8881_v45 }
 0xca0   :  { %4541 = vmatprep.subr.bf16.mxu0 %v8889_v47 }
 0xca1   :  { %5025 = vmatpush1.bf16.msra.mxu1 %v8890_v48 }
 0xca2   :  { %5026 = vmatprep.subr.bf16.mxu1 %v8898_v49 }
 0xca3   :  { %4542 = vmatpush1.bf16.msra.mxu0 %v8887_v50 }
 0xca4   :  { %7748 = vmatmul.mubr.msk.bf16.gmra.mrb[56].mxu1 %vm196_vm0, %v8868_v51  ;;  %4543 = vmatprep.subr.bf16.mxu0 %v8895_v52  ;;  %v8953_v52 = vld [vmem:[%s12996_s16 + $0x100] ss:$8 sps:$4 sm:$0xff]  }
 0xca5   :  { %5027 = vmatpush1.bf16.msra.mxu1 %v8896_v53  ;;  %v8961_v53 = vld [vmem:[%s12996_s16 + $0x114] ss:$8 sps:$4 sm:$0xff]  }
 0xca6   :  { %5028 = vmatprep.subr.bf16.mxu1 %v8904_v54 }
 0xca7   :  { %4544 = vmatpush1.bf16.msra.mxu0 %v8893_v55 }
 0xca8   :  { %4545 = vmatprep.subr.bf16.mxu0 %v8901_v33  ;;  %v8959_v33 = vld [vmem:[%s12996_s16 + $0x110] ss:$8 sps:$4 sm:$0xff]  }
 0xca9   :  { %5029 = vmatpush1.bf16.msra.mxu1 %v8902_v13 }
 0xcaa   :  { %5030 = vmatprep.subr.bf16.mxu1 %v8910_v24 }
 0xcab   :  { %4546 = vmatpush1.bf16.msra.mxu0 %v8899_v3  ;;  %v8967_v3 = vld [vmem:[%s12996_s16 + $0x124] ss:$8 sps:$4 sm:$0xff]  }
 0xcac   :  { %4547 = vmatprep.subr.bf16.mxu0 %v8907_v7 }
 0xcad   :  { %5031 = vmatpush1.bf16.msra.mxu1 %v8908_v2 }
 0xcae   :  { %5032 = vmatprep.subr.bf16.mxu1 %v8916_v4 }
 0xcaf   :  { %4548 = vmatpush1.bf16.msra.mxu0 %v8905_v22 }
 0xcb0   :  { %4549 = vmatprep.subr.bf16.mxu0 %v8913_v28 }
 0xcb1   :  { %5033 = vmatpush1.bf16.msra.mxu1 %v8914_v10 }
 0xcb2   :  { %5034 = vmatprep.subr.bf16.mxu1 %v8922_v12 }
 0xcb3   :  { %4550 = vmatpush1.bf16.msra.mxu0 %v8911_v27 }
 0xcb4   :  { %4551 = vmatprep.subr.bf16.mxu0 %v8919_v30  ;;  %v8965_v30 = vld [vmem:[%s12996_s16 + $0x120] ss:$8 sps:$4 sm:$0xff]  }
 0xcb5   :  { %5035 = vmatpush1.bf16.msra.mxu1 %v8920_v37  ;;  %v8973_v37 = vld [vmem:[%s12996_s16 + $0x134] ss:$8 sps:$4 sm:$0xff]  }
 0xcb6   :  { %5036 = vmatprep.subr.bf16.mxu1 %v8928_v25 }
 0xcb7   :  { %4552 = vmatpush1.bf16.msra.mxu0 %v8917_v58  ;;  %v8971_v58 = vld [vmem:[%s12996_s16 + $0x130] ss:$8 sps:$4 sm:$0xff]  }
 0xcb8   :  { %4553 = vmatprep.subr.bf16.mxu0 %v8925_v17 }
 0xcb9   :  { %5037 = vmatpush1.bf16.msra.mxu1 %v8926_v14  ;;  %v8979_v14 = vld [vmem:[%s12996_s16 + $0x144] ss:$8 sps:$4 sm:$0xff]  }
 0xcba   :  { %5038 = vmatprep.subr.bf16.mxu1 %v8934_v16 }
 0xcbb   :  { %4554 = vmatpush1.bf16.msra.mxu0 %v8923_v63 }
 0xcbc   :  { %4555 = vmatprep.subr.bf16.mxu0 %v8931_v19 }
 0xcbd   :  { %5039 = vmatpush1.bf16.msra.mxu1 %v8932_v20 }
 0xcbe   :  { %5040 = vmatprep.subr.bf16.mxu1 %v8940_v60  ;;  %v8977_v60 = vld [vmem:[%s12996_s16 + $0x140] ss:$8 sps:$4 sm:$0xff]  }
 0xcbf   :  { %4556 = vmatpush1.bf16.msra.mxu0 %v8929_v23  ;;  %v8980_v23 = vld [vmem:[%s12996_s16 + $0x300] ss:$8 sps:$4 sm:$0xff]  }
 0xcc0   :  { %4557 = vmatprep.subr.bf16.mxu0 %v8937_v61  ;;  %v8985_v61 = vld [vmem:[%s12996_s16 + $0x154] ss:$8 sps:$4 sm:$0xff]  }
 0xcc1   :  { %5041 = vmatpush1.bf16.msra.mxu1 %v8938_v57  ;;  %v8988_v57 = vld [vmem:[%s12996_s16 + $0x314] ss:$8 sps:$4 sm:$0xff]  }
 0xcc2   :  { %5042 = vmatprep.subr.bf16.mxu1 %v8946_v56 }
 0xcc3   :  { %4558 = vmatpush1.bf16.msra.mxu0 %v8935_v1  ;;  %v8983_v1 = vld [vmem:[%s12996_s16 + $0x150] ss:$8 sps:$4 sm:$0xff]  }
 0xcc4   :  { %4559 = vmatprep.subr.bf16.mxu0 %v8943_v31  ;;  %v8986_v31 = vld [vmem:[%s12996_s16 + $0x310] ss:$8 sps:$4 sm:$0xff]  }
 0xcc5   :  { %5043 = vmatpush1.bf16.msra.mxu1 %v8944_v18 }
 0xcc6   :  { %5044 = vmatprep.subr.bf16.mxu1 %v8952_v9 }
 0xcc7   :  { %4560 = vmatpush1.bf16.msra.mxu0 %v8941_v62  ;;  %v8991_v62 = vld [vmem:[%s12996_s16 + $0x164] ss:$8 sps:$4 sm:$0xff]  }
 0xcc8   :  { %4561 = vmatprep.subr.bf16.mxu0 %v8949_v8  ;;  %v8994_v8 = vld [vmem:[%s12996_s16 + $0x324] ss:$8 sps:$4 sm:$0xff]  }
 0xcc9   :  { %5045 = vmatpush1.bf16.msra.mxu1 %v8950_v36 }
 0xcca   :  { %5046 = vmatprep.subr.bf16.mxu1 %v8958_v26  ;;  %v8989_v26 = vld [vmem:[%s12996_s16 + $0x160] ss:$8 sps:$4 sm:$0xff]  }
 0xccb   :  { %4562 = vmatpush1.bf16.msra.mxu0 %v8947_v21 }
 0xccc   :  { %4584 = vmatprep.subr.bf16.mxu0 %v8955_v5 }
 0xccd   :  { %5047 = vmatpush1.bf16.msra.mxu1 %v8956_v32  ;;  %v8992_v32 = vld [vmem:[%s12996_s16 + $0x320] ss:$8 sps:$4 sm:$0xff]  }
 0xcce   :  { %5048 = vmatprep.subr.bf16.mxu1 %v8964_v11  ;;  %v8997_v11 = vld [vmem:[%s12996_s16 + $0x174] ss:$8 sps:$4 sm:$0xff]  }
 0xcd1   :  { %5049 = vmatpush1.bf16.msra.mxu1 %v8962_v35  ;;  %v9000_v35 = vld [vmem:[%s12996_s16 + $0x334] ss:$8 sps:$4 sm:$0xff]  }
 0xcd2   :  { %5050 = vmatprep.subr.bf16.mxu1 %v8970_v38  ;;  %v8995_v38 = vld [vmem:[%s12996_s16 + $0x170] ss:$8 sps:$4 sm:$0xff]  }
 0xcd5   :  { %5051 = vmatpush1.bf16.msra.mxu1 %v8968_v15  ;;  %v8998_v15 = vld [vmem:[%s12996_s16 + $0x330] ss:$8 sps:$4 sm:$0xff]  }
 0xcd6   :  { %5052 = vmatprep.subr.bf16.mxu1 %v8976_v34  ;;  %v9003_v34 = vld [vmem:[%s12996_s16 + $0x184] ss:$8 sps:$4 sm:$0xff]  }
 0xcd9   :  { %5053 = vmatpush1.bf16.msra.mxu1 %v8974_v6  ;;  %v9006_v6 = vld [vmem:[%s12996_s16 + $0x344] ss:$8 sps:$4 sm:$0xff]  }
 0xcda   :  { %5075 = vmatprep.subr.bf16.mxu1 %v8982_v39  ;;  %v9001_v39 = vld [vmem:[%s12996_s16 + $0x180] ss:$8 sps:$4 sm:$0xff]  }
 0xd5f   :  { %v4046_v40 = vpop.f32.mrb[36].mxu0  ;;  %v11663_v0 = vpop.f32.mrb[44].mxu1 }
 0xd60   :  { %v4048_v41 = vpop.f32.mrb[37].mxu0  ;;  %v3970_v42 = vpop.f32.mrb[45].mxu1 }
 0xd61   :  { %v4050_v43 = vpop.f32.mrb[38].mxu0  ;;  %v11665_v44 = vpop.f32.mrb[46].mxu1 }
 0xd62   :  { %v11667_v45 = vpack.c.bf16 %v4050_v43, %v4046_v40  ;;  %v3987_v47 = vpack.c.bf16 %v11665_v44, %v11663_v0  ;;  %v4052_v48 = vpop.f32.mrb[39].mxu0  ;;  %v3974_v49 = vpop.f32.mrb[47].mxu1  ;;  %v9004_v40 = vld [vmem:[%s12996_s16 + $0x340] ss:$8 sps:$4 sm:$0xff]   ;;  %v9007_v43 = vld [vmem:[%s12996_s16 + $0x190] ss:$8 sps:$4 sm:$0xff]  }
 0xd63   :  { %v11671_v50 = vpack.c.bf16 %v4052_v48, %v4048_v41  ;;  %v3988_v51 = vpack.c.bf16 %v3974_v49, %v3970_v42  ;;  %v9009_v41 = vld [vmem:[%s12996_s16 + $0x194] ss:$8 sps:$4 sm:$0xff]   ;;  %v9010_v48 = vld [vmem:[%s12996_s16 + $0x350] ss:$8 sps:$4 sm:$0xff]   ;;  %v9015_v49 = vld [vmem:[%s12996_s16 + $0x1a4] ss:$8 sps:$4 sm:$0xff]  }
 0xd64   :  { %v9012_v42 = vld [vmem:[%s12996_s16 + $0x354] ss:$8 sps:$4 sm:$0xff]   ;;  %v11897_v0 = vld [vmem:[%s12999_s17 + $0x10] ss:$8 sps:$4 sm:$0xff]   ;;  %v11903_v44 = vld [vmem:[%s12999_s17 + $0x24] ss:$8 sps:$4 sm:$0xff]  }
 0xd65   :  { %4563 = vmatprep.mubr.bf16.mxu0 %v11671_v50 }
 0xd66   :  { %4564 = vmatmul.mubr.bf16.vlgmr.msra.gmra.mrb[44].mxu0 %v11667_v45 }
 0xd67   :  { %4585 = vmatpush1.bf16.msra.mxu0 %v8953_v52  ;;  %v4056_v54 = vpop.f32.mrb[40].mxu0  ;;  %v11681_v55 = vpop.f32.mrb[48].mxu1  ;;  %v9016_v52 = vld [vmem:[%s12996_s16 + $0x360] ss:$8 sps:$4 sm:$0xff]  }
 0xd68   :  { %v4058_v13 = vpop.f32.mrb[41].mxu0  ;;  %v11686_v24 = vpop.f32.mrb[49].mxu1  ;;  %4586 = vmatprep.subr.bf16.mxu0 %v8961_v53  ;;  %v9021_v53 = vld [vmem:[%s12996_s16 + $0x1b4] ss:$8 sps:$4 sm:$0xff]  }
 0xd69   :  { %v4060_v7 = vpop.f32.mrb[42].mxu0  ;;  %v11691_v2 = vpop.f32.mrb[50].mxu1 }
 0xd6a   :  { %v11693_v4 = vpack.c.bf16 %v4060_v7, %v4056_v54  ;;  %v3989_v22 = vpack.c.bf16 %v11691_v2, %v11681_v55  ;;  %v4062_v28 = vpop.f32.mrb[43].mxu0  ;;  %v11697_v10 = vpop.f32.mrb[51].mxu1  ;;  %v9024_v54 = vld [vmem:[%s12996_s16 + $0x374] ss:$8 sps:$4 sm:$0xff]   ;;  %v9030_v7 = vld [vmem:[%s12996_s16 + $0x384] ss:$8 sps:$4 sm:$0xff]  }
 0xd6b   :  { %v11699_v12 = vpack.c.bf16 %v4062_v28, %v4058_v13  ;;  %4587 = vmatpush1.bf16.msra.mxu0 %v8959_v33  ;;  %v3990_v27 = vpack.c.bf16 %v11697_v10, %v11686_v24  ;;  %v9019_v33 = vld [vmem:[%s12996_s16 + $0x1b0] ss:$8 sps:$4 sm:$0xff]   ;;  %v9025_v28 = vld [vmem:[%s12996_s16 + $0x1c0] ss:$8 sps:$4 sm:$0xff]   ;;  %v9060_v24 = vld [vmem:[%s12996_s16 + $0x3f4] ss:$8 sps:$4 sm:$0xff]  }
 0xd6c   :  { %4588 = vmatprep.subr.bf16.mxu0 %v8967_v3  ;;  %v9022_v13 = vld [vmem:[%s12996_s16 + $0x370] ss:$8 sps:$4 sm:$0xff]   ;;  %v9027_v3 = vld [vmem:[%s12996_s16 + $0x1c4] ss:$8 sps:$4 sm:$0xff]   ;;  %v11915_v10 = vld [vmem:[%s12999_s17 + $0x20] ss:$8 sps:$4 sm:$0xff]  }
 0xd6d   :  { %4573 = vmatprep.mubr.bf16.mxu0 %v11699_v12  ;;  %v11937_v55 = vld [vmem:[%s12999_s17 + $0x34] ss:$8 sps:$4 sm:$0xff]   ;;  %v11951_v2 = vld [vmem:[%s12999_s17 + $0x44] ss:$8 sps:$4 sm:$0xff]  }
 0xd6e   :  { %4574 = vmatmul.mubr.bf16.gmra.mrb[48].mxu0 %v11693_v4 }
 0xd6f   :  { %4589 = vmatpush1.bf16.msra.mxu0 %v8965_v30  ;;  %v4124_v25 = vpop.f32.mrb[52].mxu1  ;;  %4616 = vmatprep.mubr.bf16.mxu0 %v3988_v51  ;;  %v9013_v51 = vld [vmem:[%s12996_s16 + $0x1a0] ss:$8 sps:$4 sm:$0xff]  }
 0xd70   :  { %v4126_v17 = vpop.f32.mrb[53].mxu1  ;;  %4590 = vmatprep.subr.bf16.mxu0 %v8973_v37  ;;  %v9028_v30 = vld [vmem:[%s12996_s16 + $0x380] ss:$8 sps:$4 sm:$0xff]   ;;  %v9033_v37 = vld [vmem:[%s12996_s16 + $0x1d4] ss:$8 sps:$4 sm:$0xff]  }
 0xd71   :  { %v4128_v16 = vpop.f32.mrb[54].mxu1 }
 0xd72   :  { %v4143_v63 = vpack.c.bf16 %v4128_v16, %v4124_v25  ;;  %v4130_v19 = vpop.f32.mrb[55].mxu1  ;;  %v9036_v25 = vld [vmem:[%s12996_s16 + $0x394] ss:$8 sps:$4 sm:$0xff]   ;;  %v9042_v16 = vld [vmem:[%s12996_s16 + $0x3a4] ss:$8 sps:$4 sm:$0xff]  }
 0xd73   :  { %v4144_v20 = vpack.c.bf16 %v4130_v19, %v4126_v17  ;;  %4591 = vmatpush1.bf16.msra.mxu0 %v8971_v58  ;;  %v9031_v58 = vld [vmem:[%s12996_s16 + $0x1d0] ss:$8 sps:$4 sm:$0xff]   ;;  %v9040_v19 = vld [vmem:[%s12996_s16 + $0x3a0] ss:$8 sps:$4 sm:$0xff]  }
 0xd74   :  { %4592 = vmatprep.subr.bf16.mxu0 %v8979_v14  ;;  %v9034_v17 = vld [vmem:[%s12996_s16 + $0x390] ss:$8 sps:$4 sm:$0xff]   ;;  %v9039_v14 = vld [vmem:[%s12996_s16 + $0x1e4] ss:$8 sps:$4 sm:$0xff]  }
 0xd75   :  { %5054 = vmatprep.mubr.bf16.mxu1 %v4144_v20  ;;  %v9045_v20 = vld [vmem:[%s12996_s16 + $0x1f4] ss:$8 sps:$4 sm:$0xff]  }
 0xd76   :  { %5055 = vmatmul.mubr.bf16.vlgmr.msra.gmra.mrb[60].mxu1 %v4143_v63  ;;  %v9037_v63 = vld [vmem:[%s12996_s16 + $0x1e0] ss:$8 sps:$4 sm:$0xff]  }
 0xd77   :  { %4593 = vmatpush1.bf16.msra.mxu0 %v8977_v60  ;;  %5076 = vmatpush1.bf16.msra.mxu1 %v8980_v23  ;;  %v4134_v56 = vpop.f32.mrb[56].mxu1  ;;  %v9048_v60 = vld [vmem:[%s12996_s16 + $0x3b4] ss:$8 sps:$4 sm:$0xff]   ;;  %v9043_v23 = vld [vmem:[%s12996_s16 + $0x1f0] ss:$8 sps:$4 sm:$0xff]  }
 0xd78   :  { %v4136_v18 = vpop.f32.mrb[57].mxu1  ;;  %4594 = vmatprep.subr.bf16.mxu0 %v8985_v61  ;;  %5077 = vmatprep.subr.bf16.mxu1 %v8988_v57  ;;  %v9046_v61 = vld [vmem:[%s12996_s16 + $0x3b0] ss:$8 sps:$4 sm:$0xff]   ;;  %v9051_v57 = vld [vmem:[%s12996_s16 + $0x3c4] ss:$8 sps:$4 sm:$0xff]  }
 0xd79   :  { %v4138_v9 = vpop.f32.mrb[58].mxu1 }
 0xd7a   :  { %v4145_v21 = vpack.c.bf16 %v4138_v9, %v4134_v56  ;;  %v4140_v36 = vpop.f32.mrb[59].mxu1  ;;  %v11862_v56 = vld [vmem:[%s12999_s17 + $0x4] ss:$8 sps:$4 sm:$0xff]  }
 0xd7b   :  { %v4146_v5 = vpack.c.bf16 %v4140_v36, %v4136_v18  ;;  %4595 = vmatpush1.bf16.msra.mxu0 %v8983_v1  ;;  %5078 = vmatpush1.bf16.msra.mxu1 %v8986_v31  ;;  %v9049_v1 = vld [vmem:[%s12996_s16 + $0x3c0] ss:$8 sps:$4 sm:$0xff]   ;;  %v9054_v31 = vld [vmem:[%s12996_s16 + $0x3d4] ss:$8 sps:$4 sm:$0xff]   ;;  %v9057_v9 = vld [vmem:[%s12996_s16 + $0x3e4] ss:$8 sps:$4 sm:$0xff]  }
 0xd7c   :  { %4596 = vmatprep.subr.bf16.mxu0 %v8991_v62  ;;  %5079 = vmatprep.subr.bf16.mxu1 %v8994_v8  ;;  %v11874_v18 = vld [vmem:[%s12999_s17] ss:$8 sps:$4 sm:$0xff]   ;;  %v11879_v62 = vld [vmem:[%s12999_s17 + $0x14] ss:$8 sps:$4 sm:$0xff]   ;;  %v9052_v8 = vld [vmem:[%s12996_s16 + $0x3d0] ss:$8 sps:$4 sm:$0xff]  }
 0xd7d   :  { %5064 = vmatprep.mubr.bf16.mxu1 %v4146_v5  ;;  %v11984_v36 = vld [vmem:[%s12999_s17 + $0x60] ss:$8 sps:$4 sm:$0xff]   ;;  %v11993_v5 = vld [vmem:[%s12999_s17 + $0x74] ss:$8 sps:$4 sm:$0xff]  }
 0xd7e   :  { %5065 = vmatmul.mubr.bf16.gmra.mrb[64].mxu1 %v4145_v21  ;;  %v11979_v21 = vld [vmem:[%s12999_s17 + $0x64] ss:$8 sps:$4 sm:$0xff]  }
 0xd7f   :  { %4597 = vmatpush1.bf16.msra.mxu0 %v8989_v26  ;;  %5080 = vmatpush1.bf16.msra.mxu1 %v8992_v32  ;;  %v11998_v26 = vld [vmem:[%s12999_s17 + $0x70] ss:$8 sps:$4 sm:$0xff]   ;;  %v12007_v32 = vld [vmem:[%s12999_s17 + $0x84] ss:$8 sps:$4 sm:$0xff]  }
 0xd80   :  { %5107 = vmatprep.mubr.bf16.mxu1 %v11671_v50  ;;  %4598 = vmatprep.subr.bf16.mxu0 %v8997_v11  ;;  %v9018_v50 = vld [vmem:[%s12996_s16 + $0x364] ss:$8 sps:$4 sm:$0xff]   ;;  %v12012_v11 = vld [vmem:[%s12999_s17 + $0x80] ss:$8 sps:$4 sm:$0xff]  }
 0xd81   :  { %5081 = vmatprep.subr.bf16.mxu1 %v9000_v35  ;;  %v12021_v35 = vld [vmem:[%s12999_s17 + $0x94] ss:$8 sps:$4 sm:$0xff]  }
 0xd83   :  { %4599 = vmatpush1.bf16.msra.mxu0 %v8995_v38  ;;  %5082 = vmatpush1.bf16.msra.mxu1 %v8998_v15  ;;  %v12026_v38 = vld [vmem:[%s12999_s17 + $0x90] ss:$8 sps:$4 sm:$0xff]   ;;  %v12035_v15 = vld [vmem:[%s12999_s17 + $0xa4] ss:$8 sps:$4 sm:$0xff]  }
 0xd84   :  { %4600 = vmatprep.subr.bf16.mxu0 %v9003_v34  ;;  %5083 = vmatprep.subr.bf16.mxu1 %v9006_v6  ;;  %v12040_v34 = vld [vmem:[%s12999_s17 + $0xa0] ss:$8 sps:$4 sm:$0xff]   ;;  %v12049_v6 = vld [vmem:[%s12999_s17 + $0xb4] ss:$8 sps:$4 sm:$0xff]  }
 0xd87   :  { %4601 = vmatpush1.bf16.msra.mxu0 %v9001_v39  ;;  %5084 = vmatpush1.bf16.msra.mxu1 %v9004_v40  ;;  %v12054_v39 = vld [vmem:[%s12999_s17 + $0xb0] ss:$8 sps:$4 sm:$0xff]   ;;  %v12063_v40 = vld [vmem:[%s12999_s17 + $0xc4] ss:$8 sps:$4 sm:$0xff]  }
 0xd88   :  { %4602 = vmatprep.subr.bf16.mxu0 %v9009_v41  ;;  %5085 = vmatprep.subr.bf16.mxu1 %v9012_v42  ;;  %v12068_v41 = vld [vmem:[%s12999_s17 + $0xc0] ss:$8 sps:$4 sm:$0xff]   ;;  %v12077_v42 = vld [vmem:[%s12999_s17 + $0xd4] ss:$8 sps:$4 sm:$0xff]  }
 0xd8b   :  { %4603 = vmatpush1.bf16.msra.mxu0 %v9007_v43  ;;  %5086 = vmatpush1.bf16.msra.mxu1 %v9010_v48  ;;  %v12082_v43 = vld [vmem:[%s12999_s17 + $0xd0] ss:$8 sps:$4 sm:$0xff]   ;;  %v12091_v48 = vld [vmem:[%s12999_s17 + $0xe4] ss:$8 sps:$4 sm:$0xff]  }
 0xd8c   :  { %4604 = vmatprep.subr.bf16.mxu0 %v9015_v49  ;;  %5087 = vmatprep.subr.bf16.mxu1 %v9018_v50  ;;  %v12096_v49 = vld [vmem:[%s12999_s17 + $0xe0] ss:$8 sps:$4 sm:$0xff]   ;;  %v12105_v50 = vld [vmem:[%s12999_s17 + $0xf4] ss:$8 sps:$4 sm:$0xff]  }
 0xd8f   :  { %4605 = vmatpush1.bf16.msra.mxu0 %v9013_v51  ;;  %5088 = vmatpush1.bf16.msra.mxu1 %v9016_v52  ;;  %v12110_v51 = vld [vmem:[%s12999_s17 + $0xf0] ss:$8 sps:$4 sm:$0xff]  }
 0xd90   :  { %4606 = vmatprep.subr.bf16.mxu0 %v9021_v53  ;;  %5089 = vmatprep.subr.bf16.mxu1 %v9024_v54 }
 0xd93   :  { %4607 = vmatpush1.bf16.msra.mxu0 %v9019_v33  ;;  %5090 = vmatpush1.bf16.msra.mxu1 %v9022_v13 }
 0xd94   :  { %4608 = vmatprep.subr.bf16.mxu0 %v9027_v3  ;;  %5091 = vmatprep.subr.bf16.mxu1 %v9030_v7 }
 0xd97   :  { %4609 = vmatpush1.bf16.msra.mxu0 %v9025_v28  ;;  %5092 = vmatpush1.bf16.msra.mxu1 %v9028_v30 }
 0xd98   :  { %4610 = vmatprep.subr.bf16.mxu0 %v9033_v37  ;;  %5093 = vmatprep.subr.bf16.mxu1 %v9036_v25 }
 0xd9b   :  { %4611 = vmatpush1.bf16.msra.mxu0 %v9031_v58  ;;  %5094 = vmatpush1.bf16.msra.mxu1 %v9034_v17 }
 0xd9c   :  { %4612 = vmatprep.subr.bf16.mxu0 %v9039_v14  ;;  %5095 = vmatprep.subr.bf16.mxu1 %v9042_v16 }
 0xd9f   :  { %4613 = vmatpush1.bf16.msra.mxu0 %v9037_v63  ;;  %5096 = vmatpush1.bf16.msra.mxu1 %v9040_v19 }
 0xda0   :  { %4614 = vmatprep.subr.bf16.mxu0 %v9045_v20  ;;  %5097 = vmatprep.subr.bf16.mxu1 %v9048_v60 }
 0xda3   :  { %4615 = vmatpush1.bf16.msra.mxu0 %v9043_v23  ;;  %5098 = vmatpush1.bf16.msra.mxu1 %v9046_v61 }
 0xda4   :  { %5099 = vmatprep.subr.bf16.mxu1 %v9051_v57  ;;  %5368 = vmatprep.subr.bf16.mxu0 %v11862_v56 }
 0xda6   :  { %4617 = vmatmul.mubr.bf16.vlgmr.msra.gmra.mrb[44].mxu0 %v3987_v47  ;;  %v9055_v47 = vld [vmem:[%s12996_s16 + $0x3e0] ss:$8 sps:$4 sm:$0xff]  }
 0xda7   :  { %4626 = vmatprep.mubr.bf16.mxu0 %v3990_v27  ;;  %5100 = vmatpush1.bf16.msra.mxu1 %v9049_v1  ;;  %v9058_v27 = vld [vmem:[%s12996_s16 + $0x3f0] ss:$8 sps:$4 sm:$0xff]  }
 0xda8   :  { %5101 = vmatprep.subr.bf16.mxu1 %v9054_v31  ;;  %5369 = vmatpush1.bf16.msra.mxu0 %v11874_v18 }
 0xda9   :  { %5370 = vmatprep.subr.bf16.mxu0 %v11879_v62 }
 0xdab   :  { %5102 = vmatpush1.bf16.msra.mxu1 %v9052_v8 }
 0xdac   :  { %5103 = vmatprep.subr.bf16.mxu1 %v9057_v9  ;;  %5371 = vmatpush1.bf16.msra.mxu0 %v11897_v0 }
 0xdad   :  { %5372 = vmatprep.subr.bf16.mxu0 %v11903_v44 }
 0xdae   :  { %4627 = vmatmul.mubr.bf16.gmra.mrb[48].mxu0 %v3989_v22  ;;  %v11965_v22 = vld [vmem:[%s12999_s17 + $0x54] ss:$8 sps:$4 sm:$0xff]  }
 0xdaf   :  { %5104 = vmatpush1.bf16.msra.mxu1 %v9055_v47 }
 0xdb0   :  { %5105 = vmatprep.subr.bf16.mxu1 %v9060_v24  ;;  %5373 = vmatpush1.bf16.msra.mxu0 %v11915_v10 }
 0xdb1   :  { %5374 = vmatprep.subr.bf16.mxu0 %v11937_v55 }
 0xdb3   :  { %5106 = vmatpush1.bf16.msra.mxu1 %v9058_v27 }
 0xdb4   :  { %5538 = vmatprep.subr.bf16.mxu1 %v11862_v56 }
 0xdb6   :  { %5108 = vmatmul.mubr.bf16.vlgmr.msra.gmra.mrb[60].mxu1 %v11667_v45  ;;  %v11942_v45 = vld [vmem:[%s12999_s17 + $0x30] ss:$8 sps:$4 sm:$0xff]  }
 0xdb7   :  { %5117 = vmatprep.mubr.bf16.mxu1 %v11699_v12  ;;  %5539 = vmatpush1.bf16.msra.mxu1 %v11874_v18  ;;  %v11970_v12 = vld [vmem:[%s12999_s17 + $0x50] ss:$8 sps:$4 sm:$0xff]  }
 0xdb8   :  { %5540 = vmatprep.subr.bf16.mxu1 %v11879_v62  ;;  %5375 = vmatpush1.bf16.msra.mxu0 %v11942_v45 }
 0xdb9   :  { %5376 = vmatprep.subr.bf16.mxu0 %v11951_v2 }
 0xdbb   :  { %5541 = vmatpush1.bf16.msra.mxu1 %v11897_v0 }
 0xdbc   :  { %5542 = vmatprep.subr.bf16.mxu1 %v11903_v44 }
 0xdbe   :  { %5118 = vmatmul.mubr.bf16.gmra.mrb[64].mxu1 %v11693_v4  ;;  %v11956_v4 = vld [vmem:[%s12999_s17 + $0x40] ss:$8 sps:$4 sm:$0xff]  }
 0xdbf   :  { %5543 = vmatpush1.bf16.msra.mxu1 %v11915_v10  ;;  %5377 = vmatpush1.bf16.msra.mxu0 %v11956_v4 }
 0xdc0   :  { %5544 = vmatprep.subr.bf16.mxu1 %v11937_v55  ;;  %5378 = vmatprep.subr.bf16.mxu0 %v11965_v22 }
 0xdc3   :  { %5545 = vmatpush1.bf16.msra.mxu1 %v11942_v45  ;;  %5379 = vmatpush1.bf16.msra.mxu0 %v11970_v12 }
 0xdc4   :  { %5546 = vmatprep.subr.bf16.mxu1 %v11951_v2  ;;  %5380 = vmatprep.subr.bf16.mxu0 %v11979_v21 }
 0xdc7   :  { %5547 = vmatpush1.bf16.msra.mxu1 %v11956_v4  ;;  %5381 = vmatpush1.bf16.msra.mxu0 %v11984_v36 }
 0xdc8   :  { %5548 = vmatprep.subr.bf16.mxu1 %v11965_v22  ;;  %5382 = vmatprep.subr.bf16.mxu0 %v11993_v5 }
 0xdcb   :  { %5549 = vmatpush1.bf16.msra.mxu1 %v11970_v12  ;;  %5383 = vmatpush1.bf16.msra.mxu0 %v11998_v26 }
 0xdcc   :  { %5550 = vmatprep.subr.bf16.mxu1 %v11979_v21  ;;  %5384 = vmatprep.subr.bf16.mxu0 %v12007_v32 }
 0xdcf   :  { %5551 = vmatpush1.bf16.msra.mxu1 %v11984_v36  ;;  %5385 = vmatpush1.bf16.msra.mxu0 %v12012_v11 }
 0xdd0   :  { %5552 = vmatprep.subr.bf16.mxu1 %v11993_v5  ;;  %5386 = vmatprep.subr.bf16.mxu0 %v12021_v35 }
 0xdd3   :  { %5553 = vmatpush1.bf16.msra.mxu1 %v11998_v26  ;;  %5387 = vmatpush1.bf16.msra.mxu0 %v12026_v38 }
 0xdd4   :  { %5554 = vmatprep.subr.bf16.mxu1 %v12007_v32  ;;  %5388 = vmatprep.subr.bf16.mxu0 %v12035_v15 }
 0xdd7   :  { %5555 = vmatpush1.bf16.msra.mxu1 %v12012_v11  ;;  %5389 = vmatpush1.bf16.msra.mxu0 %v12040_v34 }
 0xdd8   :  { %5556 = vmatprep.subr.bf16.mxu1 %v12021_v35  ;;  %5390 = vmatprep.subr.bf16.mxu0 %v12049_v6 }
 0xddb   :  { %5557 = vmatpush1.bf16.msra.mxu1 %v12026_v38  ;;  %5391 = vmatpush1.bf16.msra.mxu0 %v12054_v39 }
 0xddc   :  { %5558 = vmatprep.subr.bf16.mxu1 %v12035_v15  ;;  %5392 = vmatprep.subr.bf16.mxu0 %v12063_v40 }
 0xddf   :  { %5559 = vmatpush1.bf16.msra.mxu1 %v12040_v34  ;;  %5393 = vmatpush1.bf16.msra.mxu0 %v12068_v41 }
 0xde0   :  { %5560 = vmatprep.subr.bf16.mxu1 %v12049_v6  ;;  %5394 = vmatprep.subr.bf16.mxu0 %v12077_v42 }
 0xde3   :  { %5561 = vmatpush1.bf16.msra.mxu1 %v12054_v39  ;;  %5395 = vmatpush1.bf16.msra.mxu0 %v12082_v43 }
 0xde4   :  { %5562 = vmatprep.subr.bf16.mxu1 %v12063_v40  ;;  %5396 = vmatprep.subr.bf16.mxu0 %v12091_v48 }
 0xde7   :  { %5563 = vmatpush1.bf16.msra.mxu1 %v12068_v41  ;;  %5397 = vmatpush1.bf16.msra.mxu0 %v12096_v49 }
 0xde8   :  { %5564 = vmatprep.subr.bf16.mxu1 %v12077_v42  ;;  %5398 = vmatprep.subr.bf16.mxu0 %v12105_v50 }
 0xdeb   :  { %5565 = vmatpush1.bf16.msra.mxu1 %v12082_v43  ;;  %5399 = vmatpush1.bf16.msra.mxu0 %v12110_v51 }
 0xdec   :  { %5566 = vmatprep.subr.bf16.mxu1 %v12091_v48  ;;  %5409 = vmatprep.subr.bf16.mxu0 %v11862_v56 }
 0xdef   :  { %5567 = vmatpush1.bf16.msra.mxu1 %v12096_v49 }
 0xdf0   :  { %5568 = vmatprep.subr.bf16.mxu1 %v12105_v50 }
 0xdf3   :  { %5569 = vmatpush1.bf16.msra.mxu1 %v12110_v51 }
 0xdf4   :  { %5579 = vmatprep.subr.bf16.mxu1 %v11862_v56 }
 0xe79   :  { %v12118_v52 = vpop.f32.mrb[44].mxu0 }
 0xe7a   :  { %v12120_v53 = vpop.f32.mrb[45].mxu0 }
 0xe7b   :  { %13092 = vst [vmem:[#allocation6_spill] sm:$0xff] %v12120_v53  ;;  %v12122_v54 = vpop.f32.mrb[46].mxu0 }
 0xe7c   :  { %v5128_v33 = vadd.f32 %v12122_v54, %v12118_v52  ;;  %v12126_v13 = vpop.f32.mrb[47].mxu0 }
 0xe7d   :  { %13093 = vst [vmem:[#allocation3_spill] sm:$0xff] %v12126_v13  ;;  %v5137_v3 = vadd.f32 %v12126_v13, %v12120_v53 }
 0xe81   :  { %v12130_v7 = vpop.f32.mrb[48].mxu0 }
 0xe82   :  { %v5129_v28 = vadd.f32 %v5128_v33, %v12130_v7  ;;  %v12133_v30 = vpop.f32.mrb[49].mxu0 }
 0xe83   :  { %13094 = vst [vmem:[#allocation4_spill] sm:$0xff] %v12133_v30  ;;  %v5138_v37 = vadd.f32 %v5137_v3, %v12133_v30  ;;  %v12136_v25 = vpop.f32.mrb[50].mxu0 }
 0xe84   :  { %13095 = vst [vmem:[#allocation5_spill] sm:$0xff] %v12136_v25  ;;  %v5130_v58 = vadd.f32 %v5129_v28, %v12136_v25  ;;  %v12139_v17 = vpop.f32.mrb[51].mxu0 }
 0xe85   :  { %13096 = vst [vmem:[#allocation7_spill] sm:$0xff] %v12139_v17  ;;  %v5139_v14 = vadd.f32 %v5138_v37, %v12139_v17 }
 0xe86   :  { %v5131_v20 = vrot.slane %v5130_v58, 4 }
 0xe87   :  { %v5140_v61 = vrot.slane %v5139_v14, 4 }
 0xe88   :  { %v5132_v56 = vadd.f32 %v5131_v20, %v5130_v58 }
 0xe89   :  { %v12142_v16 = vpop.f32.mrb[60].mxu1  ;;  %v5141_v1 = vadd.f32 %v5140_v61, %v5139_v14 }
 0xe8a   :  { %13097 = vst [vmem:[#allocation8_spill] sm:$0xff] %v12142_v16  ;;  %v12144_v63 = vpop.f32.mrb[61].mxu1  ;;  %v5133_v27 = vrot.slane %v5132_v56, 2 }
 0xe8b   :  { %13098 = vst [vmem:[#allocation9_spill] sm:$0xff] %v12144_v63  ;;  %v12146_v19 = vpop.f32.mrb[62].mxu1  ;;  %v5142_v28 = vrot.slane %v5141_v1, 2 }
 0xe8c   :  { %13099 = vst [vmem:[#allocation10_spill] sm:$0xff] %v12146_v19  ;;  %v5146_v60 = vadd.f32 %v12146_v19, %v12142_v16  ;;  %v12150_v23 = vpop.f32.mrb[63].mxu1  ;;  %v5134_v20 = vadd.f32 %v5133_v27, %v5132_v56 }
 0xe8d   :  { %13100 = vst [vmem:[#allocation11_spill] sm:$0xff] %v12150_v23  ;;  %v5155_v57 = vadd.f32 %v12150_v23, %v12144_v63  ;;  %v5143_v46 = vadd.f32 %v5142_v28, %v5141_v1 }
 0xe8e   :  { %v5135_v16 = vrot.slane %v5134_v20, 1 }
 0xe91   :  { %v12154_v31 = vpop.f32.mrb[64].mxu1 }
 0xe92   :  { %13101 = vst [vmem:[#allocation12_spill] sm:$0xff] %v12154_v31  ;;  %v5147_v8 = vadd.f32 %v5146_v60, %v12154_v31  ;;  %v12157_v9 = vpop.f32.mrb[65].mxu1 }
 0xe93   :  { %13102 = vst [vmem:[#allocation13_spill] sm:$0xff] %v12157_v9  ;;  %v5156_v47 = vadd.f32 %v5155_v57, %v12157_v9  ;;  %v12160_v24 = vpop.f32.mrb[66].mxu1  ;;  %v5144_v9 = vrot.slane %v5143_v46, 1 }
 0xe94   :  { %13103 = vst [vmem:[#allocation14_spill] sm:$0xff] %v12160_v24  ;;  %v5148_v33 = vadd.f32 %v5147_v8, %v12160_v24  ;;  %v12163_v3 = vpop.f32.mrb[67].mxu1  ;;  %v5136_v8 = vadd.f32 %v5135_v16, %v5134_v20 }
 0xe95   :  { %13104 = vst [vmem:[#allocation15_spill] sm:$0xff] %v12163_v3  ;;  %v5157_v37 = vadd.f32 %v5156_v47, %v12163_v3  ;;  %v5145_v30 = vadd.f32 %v5144_v9, %v5143_v46 }
 0xe96   :  { %v5149_v58 = vrot.slane %v5148_v33, 4 }
 0xe97   :  { %v5158_v14 = vrot.slane %v5157_v37, 4 }
 0xe98   :  { %v5150_v61 = vadd.f32 %v5149_v58, %v5148_v33 }
 0xe99   :  { %v5159_v60 = vadd.f32 %v5158_v14, %v5157_v37  ;;  %v13109_v14 = vld [vmem:[#allocation3_spill] sm:$0xff] }
 0xe9a   :  { %v5151_v31 = vrot.slane %v5150_v61, 2 }
 0xe9b   :  { %v5160_v19 = vrot.slane %v5159_v60, 2 }
 0xe9c   :  { %v5152_v57 = vadd.f32 %v5151_v31, %v5150_v61  ;;  %v13111_v61 = vld [vmem:[#allocation4_spill] sm:$0xff] }
 0xe9d   :  { %v5161_v23 = vadd.f32 %v5160_v19, %v5159_v60 }
 0xe9e   :  { %v5153_v63 = vrot.slane %v5152_v57, 1 }
 0xe9f   :  { %v5162_v17 = vrot.slane %v5161_v23, 1 }
 0xea0   :  { %v5154_v24 = vadd.f32 %v5153_v63, %v5152_v57 }
 0xea1   :  { %v5163_v13 = vadd.f32 %v5162_v17, %v5161_v23  ;;  %v13105_v23 = vld [vmem:[#allocation5_spill] sm:$0xff] }
 0xea2   :  { %v5164_v53 = vadd.f32 %v5154_v24, %v5136_v8  ;;  %v13107_v24 = vld [vmem:[#allocation6_spill] sm:$0xff] }
 0xea3   :  { %v5165_v47 = vadd.f32 %v5163_v13, %v5145_v30 }
 0xea4   :  { %v5166_v3 = vmul.f32 0.00048828125, %v5164_v53 }
 0xea5   :  { %v5167_v25 = vmul.f32 0.00048828125, %v5165_v47 }
 0xea6   :  { %v5200_v56 = vpack.c.bf16 %v5166_v3, %v5166_v3 }
 0xea7   :  { %v5201_v27 = vpack.c.bf16 %v5167_v25, %v5167_v25 }
 0xea8   :  { %v5202_v1 = vunpack.c.l.bf16 %v5200_v56 }
 0xea9   :  { %v5203_v33 = vunpack.c.l.bf16 %v5201_v27 }
 0xeaa   :  { %v5204_v28 = vsub.f32 %v5166_v3, %v5202_v1  ;;  %v13121_v1 = vld [vmem:[#allocation15_spill] sm:$0xff] }
 0xeab   :  { %v5205_v37 = vsub.f32 %v5167_v25, %v5203_v33 }
 0xeac   :  { %v5206_v31 = vpack.c.bf16 %v5204_v28, %v5204_v28 }
 0xead   :  { %v5207_v58 = vpack.c.bf16 %v5205_v37, %v5205_v37 }
 0xeaf   :  { %5400 = vmatprep.mubr.bf16.mxu0 %v5207_v58 }
 0xeb0   :  { %5401 = vmatmul.mubr.bf16.vlgmr.msra.gmra.mrb[52].mxu0 %v5206_v31 }
 0xeb1   :  { %5410 = vmatpush1.bf16.msra.mxu0 %v11874_v18  ;;  %5441 = vmatprep.mubr.bf16.mxu0 %v5201_v27 }
 0xeb2   :  { %5411 = vmatprep.subr.bf16.mxu0 %v11879_v62 }
 0xeb5   :  { %5412 = vmatpush1.bf16.msra.mxu0 %v11897_v0 }
 0xeb6   :  { %5413 = vmatprep.subr.bf16.mxu0 %v11903_v44 }
 0xeb9   :  { %5414 = vmatpush1.bf16.msra.mxu0 %v11915_v10 }
 0xeba   :  { %5415 = vmatprep.subr.bf16.mxu0 %v11937_v55 }
 0xebd   :  { %5416 = vmatpush1.bf16.msra.mxu0 %v11942_v45 }
 0xebe   :  { %5417 = vmatprep.subr.bf16.mxu0 %v11951_v2 }
 0xec1   :  { %5418 = vmatpush1.bf16.msra.mxu0 %v11956_v4 }
 0xec2   :  { %5419 = vmatprep.subr.bf16.mxu0 %v11965_v22 }
 0xec5   :  { %5420 = vmatpush1.bf16.msra.mxu0 %v11970_v12 }
 0xec6   :  { %5421 = vmatprep.subr.bf16.mxu0 %v11979_v21 }
 0xec9   :  { %5422 = vmatpush1.bf16.msra.mxu0 %v11984_v36 }
 0xeca   :  { %5423 = vmatprep.subr.bf16.mxu0 %v11993_v5 }
 0xecd   :  { %5424 = vmatpush1.bf16.msra.mxu0 %v11998_v26 }
 0xece   :  { %5425 = vmatprep.subr.bf16.mxu0 %v12007_v32 }
 0xed1   :  { %5426 = vmatpush1.bf16.msra.mxu0 %v12012_v11 }
 0xed2   :  { %5427 = vmatprep.subr.bf16.mxu0 %v12021_v35 }
 0xed5   :  { %5428 = vmatpush1.bf16.msra.mxu0 %v12026_v38 }
 0xed6   :  { %5429 = vmatprep.subr.bf16.mxu0 %v12035_v15 }
 0xed9   :  { %5430 = vmatpush1.bf16.msra.mxu0 %v12040_v34 }
 0xeda   :  { %5431 = vmatprep.subr.bf16.mxu0 %v12049_v6 }
 0xedd   :  { %5432 = vmatpush1.bf16.msra.mxu0 %v12054_v39 }
 0xede   :  { %5433 = vmatprep.subr.bf16.mxu0 %v12063_v40 }
 0xee1   :  { %5434 = vmatpush1.bf16.msra.mxu0 %v12068_v41 }
 0xee2   :  { %5435 = vmatprep.subr.bf16.mxu0 %v12077_v42 }
 0xee5   :  { %5436 = vmatpush1.bf16.msra.mxu0 %v12082_v43 }
 0xee6   :  { %5437 = vmatprep.subr.bf16.mxu0 %v12091_v48 }
 0xee9   :  { %5438 = vmatpush1.bf16.msra.mxu0 %v12096_v49 }
 0xeea   :  { %5439 = vmatprep.subr.bf16.mxu0 %v12105_v50 }
 0xeed   :  { %5440 = vmatpush1.bf16.msra.mxu0 %v12110_v51 }
 0xef0   :  { %5442 = vmatmul.mubr.bf16.vlgmr.msra.gmra.mrb[52].mxu0 %v5200_v56  ;;  %v13119_v56 = vld [vmem:[#allocation13_spill] sm:$0xff] }
 0xef1   :  { %5787 = vmatprep.mubr.bf16.mxu0 %v13070_v59 }
 0xfc3   :  { %v5443_v46 = vpop.f32.mrb[52].mxu0 }
 0xfc4   :  { %v5453_v53 = vrot.slane %v5443_v46, %v9844_v29  ;;  %v5445_v13 = vpop.f32.mrb[53].mxu0 }
 0xfc5   :  { %v5457_v30 = vrot.slane %v5445_v13, %v9844_v29  ;;  %v5447_v25 = vpop.f32.mrb[54].mxu0 }
 0xfc6   :  { %v5448_v17 = vpop.f32.mrb[55].mxu0  ;;  %v12201_v16 = vsub.f32 %v12118_v52, %v5453_v53  ;;  %v12204_v63 = vsub.f32 %v12122_v54, %v5453_v53  ;;  %v12207_v19 = vsub.f32 %v12130_v7, %v5453_v53  ;;  %v12210_v9 = vsub.f32 %v13105_v23, %v5453_v53  ;;  %v13113_v52 = vld [vmem:[#allocation7_spill] sm:$0xff]  ;;  %v13115_v54 = vld [vmem:[#allocation9_spill] sm:$0xff]  ;;  %v13123_v25 = vld [vmem:[#allocation8_spill] sm:$0xff] }
 0xfc7   :  { %v12213_v3 = vsub.f32 %v13107_v24, %v5457_v30  ;;  %v12216_v20 = vsub.f32 %v13109_v14, %v5457_v30  ;;  %v12219_v60 = vsub.f32 %v13111_v61, %v5457_v30  ;;  %v12222_v57 = vsub.f32 %v13113_v52, %v5457_v30  ;;  %v13117_v7 = vld [vmem:[#allocation11_spill] sm:$0xff]  ;;  %v13125_v23 = vld [vmem:[#allocation10_spill] sm:$0xff]  ;;  %v13127_v14 = vld [vmem:[#allocation12_spill] sm:$0xff] }
 0xfc8   :  { %13106 = vst [vmem:[#allocation5_spill] sm:$0xff] %v12210_v9  ;;  %v12225_v8 = vsub.f32 %v13115_v54, %v5457_v30  ;;  %v12228_v47 = vsub.f32 %v13117_v7, %v5457_v30  ;;  %v12231_v27 = vsub.f32 %v13119_v56, %v5457_v30  ;;  %v12234_v33 = vsub.f32 %v13121_v1, %v5457_v30  ;;  %v13129_v54 = vld [vmem:[#allocation14_spill] sm:$0xff] }
 0xfc9   :  { %13108 = vst [vmem:[#allocation6_spill] sm:$0xff] %v12213_v3  ;;  %13110 = vst [vmem:[#allocation3_spill] sm:$0xff] %v12216_v20  ;;  %v5475_v28 = vmul.f32 %v12213_v3, %v12213_v3  ;;  %v5477_v37 = vmul.f32 %v12216_v20, %v12216_v20  ;;  %v5479_v58 = vmul.f32 %v12219_v60, %v12219_v60 }
 0xfca   :  { %13112 = vst [vmem:[#allocation4_spill] sm:$0xff] %v12219_v60  ;;  %13114 = vst [vmem:[#allocation7_spill] sm:$0xff] %v12222_v57  ;;  %v5501_v31 = vmul.f32 %v12225_v8, %v12225_v8  ;;  %v5503_v46 = vmul.f32 %v12228_v47, %v12228_v47  ;;  %v5505_v13 = vmul.f32 %v12231_v27, %v12231_v27 }
 0xfcb   :  { %13116 = vst [vmem:[#allocation9_spill] sm:$0xff] %v12225_v8  ;;  %13118 = vst [vmem:[#allocation11_spill] sm:$0xff] %v12228_v47  ;;  %v5491_v30 = vadd.f32 %v5477_v37, %v5475_v28  ;;  %v12249_v17 = vsub.f32 %v13123_v25, %v5453_v53  ;;  %v12252_v24 = vsub.f32 %v13125_v23, %v5453_v53 }
 0xfcc   :  { %13120 = vst [vmem:[#allocation13_spill] sm:$0xff] %v12231_v27  ;;  %13122 = vst [vmem:[#allocation15_spill] sm:$0xff] %v12234_v33  ;;  %v12255_v61 = vsub.f32 %v13127_v14, %v5453_v53  ;;  %v5517_v52 = vadd.f32 %v5503_v46, %v5501_v31  ;;  %v12258_v7 = vsub.f32 %v13129_v54, %v5453_v53 }
 0xfcd   :  { %13124 = vst [vmem:[#allocation8_spill] sm:$0xff] %v12249_v17  ;;  %13126 = vst [vmem:[#allocation10_spill] sm:$0xff] %v12252_v24  ;;  %v5474_v56 = vmul.f32 %v12201_v16, %v12201_v16  ;;  %v5476_v1 = vmul.f32 %v12204_v63, %v12204_v63  ;;  %v5481_v28 = vmul.f32 %v12222_v57, %v12222_v57 }
 0xfce   :  { %13128 = vst [vmem:[#allocation12_spill] sm:$0xff] %v12255_v61  ;;  %13130 = vst [vmem:[#allocation14_spill] sm:$0xff] %v12258_v7  ;;  %v5492_v37 = vadd.f32 %v5491_v30, %v5479_v58  ;;  %v5507_v25 = vmul.f32 %v12234_v33, %v12234_v33  ;;  %v5500_v23 = vmul.f32 %v12249_v17, %v12249_v17 }
 0xfcf   :  { %v5518_v31 = vadd.f32 %v5517_v52, %v5505_v13  ;;  %v5478_v53 = vmul.f32 %v12207_v19, %v12207_v19  ;;  %v5482_v46 = vadd.f32 %v5476_v1, %v5474_v56  ;;  %v5502_v14 = vmul.f32 %v12252_v24, %v12252_v24 }
 0xfd0   :  { %v5493_v54 = vadd.f32 %v5492_v37, %v5481_v28  ;;  %v5480_v27 = vmul.f32 %v12210_v9, %v12210_v9  ;;  %v5504_v30 = vmul.f32 %v12255_v61, %v12255_v61  ;;  %v5506_v52 = vmul.f32 %v12258_v7, %v12258_v7 }
 0xfd1   :  { %v5519_v47 = vadd.f32 %v5518_v31, %v5507_v25  ;;  %v5483_v58 = vadd.f32 %v5482_v46, %v5478_v53  ;;  %v5508_v33 = vadd.f32 %v5502_v14, %v5500_v23 }
 0xfd2   :  { %v5494_v8 = vrot.slane %v5493_v54, 4 }
 0xfd3   :  { %v5520_v17 = vrot.slane %v5519_v47, 4  ;;  %v5484_v13 = vadd.f32 %v5483_v58, %v5480_v27  ;;  %v5509_v56 = vadd.f32 %v5508_v33, %v5504_v30 }
 0xfd4   :  { %v5495_v1 = vadd.f32 %v5494_v8, %v5493_v54 }
 0xfd5   :  { %v5521_v57 = vadd.f32 %v5520_v17, %v5519_v47  ;;  %v5485_v24 = vrot.slane %v5484_v13, 4  ;;  %v5510_v28 = vadd.f32 %v5509_v56, %v5506_v52 }
 0xfd6   :  { %v5496_v37 = vrot.slane %v5495_v1, 2 }
 0xfd7   :  { %v5522_v60 = vrot.slane %v5521_v57, 2  ;;  %v5486_v20 = vadd.f32 %v5485_v24, %v5484_v13  ;;  %v5511_v25 = vrot.slane %v5510_v28, 4 }
 0xfd8   :  { %v5497_v31 = vadd.f32 %v5496_v37, %v5495_v1 }
 0xfd9   :  { %v5523_v53 = vadd.f32 %v5522_v60, %v5521_v57  ;;  %v5487_v46 = vrot.slane %v5486_v20, 2  ;;  %v5512_v61 = vadd.f32 %v5511_v25, %v5510_v28 }
 0xfda   :  { %v5498_v23 = vrot.slane %v5497_v31, 1 }
 0xfdb   :  { %v5524_v14 = vrot.slane %v5523_v53, 1  ;;  %v5488_v3 = vadd.f32 %v5487_v46, %v5486_v20  ;;  %v5513_v27 = vrot.slane %v5512_v61, 2 }
 0xfdc   :  { %v5499_v58 = vadd.f32 %v5498_v23, %v5497_v31  ;;  %v13136_v31 = vld [vmem:[#allocation7_spill] sm:$0xff] }
 0xfdd   :  { %v5525_v9 = vadd.f32 %v5524_v14, %v5523_v53  ;;  %v5489_v7 = vrot.slane %v5488_v3, 1  ;;  %v5514_v33 = vadd.f32 %v5513_v27, %v5512_v61 }
 0xfdf   :  { %v5527_v8 = vadd.f32 %v5525_v9, %v5499_v58  ;;  %v5490_v47 = vadd.f32 %v5489_v7, %v5488_v3  ;;  %v5515_v17 = vrot.slane %v5514_v33, 1  ;;  %v13134_v3 = vld [vmem:[#allocation3_spill] sm:$0xff]  ;;  %v13135_v7 = vld [vmem:[#allocation4_spill] sm:$0xff] }
 0xfe1   :  { %v5529_v54 = vmul.f32 0.00048828125, %v5527_v8  ;;  %v5516_v30 = vadd.f32 %v5515_v17, %v5514_v33 }
 0xfe3   :  { %v5531_v52 = vpack.c.bf16 %v5529_v54, %v5529_v54  ;;  %v5526_v24 = vadd.f32 %v5516_v30, %v5490_v47 }
 0xfe5   :  { %v5533_v13 = vunpack.c.l.bf16 %v5531_v52  ;;  %v5528_v56 = vmul.f32 0.00048828125, %v5526_v24 }
 0xfe7   :  { %v5535_v60 = vsub.f32 %v5529_v54, %v5533_v13  ;;  %v5530_v57 = vpack.c.bf16 %v5528_v56, %v5528_v56  ;;  %v13137_v13 = vld [vmem:[#allocation9_spill] sm:$0xff] }
 0xfe9   :  { %v5537_v1 = vpack.c.bf16 %v5535_v60, %v5535_v60  ;;  %v5532_v28 = vunpack.c.l.bf16 %v5530_v57  ;;  %v13138_v60 = vld [vmem:[#allocation11_spill] sm:$0xff] }
 0xfeb   :  { %5570 = vmatprep.mubr.bf16.mxu1 %v5537_v1  ;;  %v5534_v20 = vsub.f32 %v5528_v56, %v5532_v28 }
 0xfed   :  { %v5536_v37 = vpack.c.bf16 %v5534_v20, %v5534_v20  ;;  %v13139_v20 = vld [vmem:[#allocation8_spill] sm:$0xff] }
 0xfef   :  { %5571 = vmatmul.mubr.bf16.vlgmr.msra.gmra.mrb[68].mxu1 %v5536_v37 }
 0xff0   :  { %5580 = vmatpush1.bf16.msra.mxu1 %v11874_v18  ;;  %5611 = vmatprep.mubr.bf16.mxu1 %v5531_v52 }
 0xff1   :  { %5581 = vmatprep.subr.bf16.mxu1 %v11879_v62 }
 0xff4   :  { %5582 = vmatpush1.bf16.msra.mxu1 %v11897_v0 }
 0xff5   :  { %5583 = vmatprep.subr.bf16.mxu1 %v11903_v44 }
 0xff8   :  { %5584 = vmatpush1.bf16.msra.mxu1 %v11915_v10 }
 0xff9   :  { %5585 = vmatprep.subr.bf16.mxu1 %v11937_v55 }
 0xffc   :  { %5586 = vmatpush1.bf16.msra.mxu1 %v11942_v45 }
 0xffd   :  { %5587 = vmatprep.subr.bf16.mxu1 %v11951_v2 }
0x1000   :  { %5588 = vmatpush1.bf16.msra.mxu1 %v11956_v4 }
0x1001   :  { %5589 = vmatprep.subr.bf16.mxu1 %v11965_v22 }
0x1004   :  { %5590 = vmatpush1.bf16.msra.mxu1 %v11970_v12 }
0x1005   :  { %5591 = vmatprep.subr.bf16.mxu1 %v11979_v21 }
0x1008   :  { %5592 = vmatpush1.bf16.msra.mxu1 %v11984_v36  ;;  %v5624_v36 = vld [vmem:[%s13002_s18] sm:$0x3] }
0x1009   :  { %5593 = vmatprep.subr.bf16.mxu1 %v11993_v5  ;;  %v5629_v5 = vrot.slane %v5624_v36, %v9844_v29 }
0x100c   :  { %5594 = vmatpush1.bf16.msra.mxu1 %v11998_v26  ;;  %v13131_v26 = vld [vmem:[#allocation2_spill] sm:$0xff] }
0x100d   :  { %5595 = vmatprep.subr.bf16.mxu1 %v12007_v32  ;;  %v5633_v32 = vrot.slane %v5624_v36, %v13131_v26 }
0x1010   :  { %5596 = vmatpush1.bf16.msra.mxu1 %v12012_v11  ;;  %v5654_v11 = vld [vmem:[%s13003_s19] sm:$0x3] }
0x1011   :  { %5597 = vmatprep.subr.bf16.mxu1 %v12021_v35 }
0x1014   :  { %5598 = vmatpush1.bf16.msra.mxu1 %v12026_v38 }
0x1015   :  { %5599 = vmatprep.subr.bf16.mxu1 %v12035_v15 }
0x1018   :  { %5600 = vmatpush1.bf16.msra.mxu1 %v12040_v34 }
0x1019   :  { %5601 = vmatprep.subr.bf16.mxu1 %v12049_v6 }
0x101c   :  { %5602 = vmatpush1.bf16.msra.mxu1 %v12054_v39  ;;  %v5659_v39 = vrot.slane %v5654_v11, %v9844_v29 }
0x101d   :  { %5603 = vmatprep.subr.bf16.mxu1 %v12063_v40 }
0x1020   :  { %5604 = vmatpush1.bf16.msra.mxu1 %v12068_v41  ;;  %v5663_v41 = vrot.slane %v5654_v11, %v13131_v26  ;;  %v13144_v11 = vld [vmem:[#allocation14_spill] sm:$0xff] }
0x1021   :  { %5605 = vmatprep.subr.bf16.mxu1 %v12077_v42 }
0x1024   :  { %5606 = vmatpush1.bf16.msra.mxu1 %v12082_v43 }
0x1025   :  { %5607 = vmatprep.subr.bf16.mxu1 %v12091_v48 }
0x1028   :  { %5608 = vmatpush1.bf16.msra.mxu1 %v12096_v49  ;;  %v13132_v49 = vld [vmem:[#allocation5_spill] sm:$0xff] }
0x1029   :  { %5609 = vmatprep.subr.bf16.mxu1 %v12105_v50 }
0x102c   :  { %5610 = vmatpush1.bf16.msra.mxu1 %v12110_v51  ;;  %v13133_v51 = vld [vmem:[#allocation6_spill] sm:$0xff] }
0x102f   :  { %5612 = vmatmul.mubr.bf16.vlgmr.msra.gmra.mrb[72].mxu1 %v5530_v57 }
0x1030   :  { %5909 = vmatprep.mubr.bf16.mxu1 %v13070_v59 }
0x10c2   :  { %v5572_v18 = vpop.f32.mrb[68].mxu1 }
0x10c3   :  { %v5574_v62 = vpop.f32.mrb[69].mxu1 }
0x10c4   :  { %v5576_v0 = vpop.f32.mrb[70].mxu1 }
0x10c5   :  { %v5577_v44 = vpop.f32.mrb[71].mxu1 }
0x1102   :  { %v5613_v10 = vpop.f32.mrb[72].mxu1 }
0x1103   :  { %v5614_v55 = vadd.f32 %v5613_v10, %v5572_v18  ;;  %v5615_v45 = vpop.f32.mrb[73].mxu1  ;;  %v13140_v18 = vld [vmem:[#allocation10_spill] sm:$0xff]  ;;  %v13141_v10 = vld [vmem:[#allocation13_spill] sm:$0xff] }
0x1104   :  { %v5616_v2 = vadd.f32 %v5615_v45, %v5574_v62  ;;  %v5617_v4 = vpop.f32.mrb[74].mxu1  ;;  %v13142_v45 = vld [vmem:[#allocation15_spill] sm:$0xff] }
0x1105   :  { %v5620_v22 = vadd.f32 1e-05, %v5614_v55  ;;  %v5618_v12 = vpop.f32.mrb[75].mxu1 }
0x1106   :  { %v5621_v21 = vadd.f32 1e-05, %v5616_v2  ;;  %v13143_v12 = vld [vmem:[#allocation12_spill] sm:$0xff] }
0x1107   :  { %9325 = vrsqrt.f32 %v5620_v22 }
0x1108   :  { %9327 = vrsqrt.f32 %v5621_v21 }
0x1111   :  { %v9326_v35 = vpop.eup %9325 }
0x1112   :  { %v9328_v38 = vpop.eup %9327  ;;  %v5636_v15 = vmul.f32 %v9326_v35, %v5629_v5 }
0x1113   :  { %v5637_v34 = vmul.f32 %v9328_v38, %v5633_v32 }
0x1114   :  { %v5641_v6 = vrot.slane %v5636_v15, %v9844_v29 }
0x1115   :  { %v5645_v40 = vrot.slane %v5637_v34, %v9844_v29 }
0x1116   :  { %v5646_v42 = vmul.f32 %v5641_v6, %v12201_v16  ;;  %v5648_v43 = vmul.f32 %v5641_v6, %v12204_v63  ;;  %v5650_v48 = vmul.f32 %v5641_v6, %v12207_v19  ;;  %v5652_v50 = vmul.f32 %v5641_v6, %v13132_v49 }
0x1117   :  { %v5647_v9 = vmul.f32 %v5645_v40, %v13133_v51  ;;  %v5649_v61 = vmul.f32 %v5645_v40, %v13134_v3  ;;  %v5651_v25 = vmul.f32 %v5645_v40, %v13135_v7  ;;  %v5653_v53 = vmul.f32 %v5645_v40, %v13136_v31  ;;  %v9121_v7 = vld [vmem:[%s13001_s21] ss:$8 sps:$4 sm:$0xff]   ;;  %v9124_v31 = vld [vmem:[%s13001_s21 + $0x10] ss:$8 sps:$4 sm:$0xff]  }
0x1118   :  { %v5666_v46 = vadd.f32 %v5659_v39, %v5646_v42  ;;  %v5668_v29 = vadd.f32 %v5659_v39, %v5648_v43  ;;  %v5670_v23 = vadd.f32 %v5659_v39, %v5650_v48  ;;  %v5672_v14 = vadd.f32 %v5659_v39, %v5652_v50 }
0x1119   :  { %v5667_v27 = vadd.f32 %v5663_v41, %v5647_v9  ;;  %v5669_v16 = vadd.f32 %v5663_v41, %v5649_v61  ;;  %v5671_v58 = vadd.f32 %v5663_v41, %v5651_v25  ;;  %v5673_v63 = vadd.f32 %v5663_v41, %v5653_v53  ;;  %v9110_v61 = vld [vmem:[%s13000_s20 + $0x20] sm:$0xff]   ;;  %v9126_v25 = vld [vmem:[%s13001_s21 + $0x14] ss:$8 sps:$4 sm:$0xff]   ;;  %v9111_v53 = vld [vmem:[%s13000_s20 + $0x8] sm:$0xff]  }
0x111a   :  { %v5674_v33 = vmax.f32 %v5666_v46, 0.0  ;;  %v5676_v19 = vmax.f32 %v5668_v29, 0.0  ;;  %v5678_v8 = vmax.f32 %v5670_v23, 0.0  ;;  %v5680_v24 = vmax.f32 %v5672_v14, 0.0  ;;  %v9112_v46 = vld [vmem:[%s13000_s20 + $0x28] sm:$0xff]  }
0x111b   :  { %v5675_v47 = vmax.f32 %v5667_v27, 0.0  ;;  %v5677_v17 = vmax.f32 %v5669_v16, 0.0  ;;  %v5679_v54 = vmax.f32 %v5671_v58, 0.0  ;;  %v5681_v30 = vmax.f32 %v5673_v63, 0.0  ;;  %v9129_v29 = vld [vmem:[%s13001_s21 + $0x24] ss:$8 sps:$4 sm:$0xff]  }
0x111c   :  { %v5706_v52 = vpack.c.bf16 %v5676_v19, %v5674_v33  ;;  %v5683_v56 = vmul.f32 %v5645_v40, %v13137_v13  ;;  %v5685_v57 = vmul.f32 %v5645_v40, %v13138_v60  ;;  %v5682_v37 = vmul.f32 %v5641_v6, %v13139_v20  ;;  %v9127_v23 = vld [vmem:[%s13001_s21 + $0x20] ss:$8 sps:$4 sm:$0xff]   ;;  %v9132_v14 = vld [vmem:[%s13001_s21 + $0x34] ss:$8 sps:$4 sm:$0xff]   ;;  %v9150_v27 = vld [vmem:[%s13001_s21 + $0x204] ss:$8 sps:$4 sm:$0xff]  }
0x111d   :  { %v5707_v1 = vpack.c.bf16 %v5677_v17, %v5675_v47  ;;  %v5709_v28 = vpack.c.bf16 %v5681_v30, %v5679_v54  ;;  %v5684_v62 = vmul.f32 %v5641_v6, %v13140_v18  ;;  %v5687_v55 = vmul.f32 %v5645_v40, %v13141_v10  ;;  %v9113_v16 = vld [vmem:[%s13000_s20 + $0x10] sm:$0xff]   ;;  %v9135_v33 = vld [vmem:[%s13001_s21 + $0x44] ss:$8 sps:$4 sm:$0xff]   ;;  %v9133_v19 = vld [vmem:[%s13001_s21 + $0x40] ss:$8 sps:$4 sm:$0xff]  }
0x111e   :  { %v5691_v0 = vadd.f32 %v5683_v56, %v5663_v41  ;;  %v5693_v44 = vadd.f32 %v5685_v57, %v5663_v41  ;;  %v5689_v2 = vmul.f32 %v5645_v40, %v13142_v45  ;;  %v5690_v4 = vadd.f32 %v5682_v37, %v5659_v39  ;;  %v9114_v58 = vld [vmem:[%s13000_s20 + $0x30] sm:$0xff]   ;;  %v9115_v47 = vld [vmem:[%s13000_s20 + $0x18] sm:$0xff]   ;;  %v9141_v30 = vld [vmem:[%s13001_s21 + $0x64] ss:$8 sps:$4 sm:$0xff]  }
0x111f   :  { %5755 = vmatprep.subr.bf16.mxu0 %v5707_v1  ;;  %5877 = vmatprep.subr.bf16.mxu1 %v5707_v1  ;;  %v5692_v22 = vadd.f32 %v5684_v62, %v5659_v39  ;;  %v5686_v21 = vmul.f32 %v5641_v6, %v13143_v12  ;;  %v5695_v26 = vadd.f32 %v5687_v55, %v5663_v41  ;;  %v9130_v63 = vld [vmem:[%s13001_s21 + $0x30] ss:$8 sps:$4 sm:$0xff]   ;;  %v9117_v13 = vld [vmem:[%s13000_s20 + $0x40] sm:$0xff]   ;;  %v9156_v57 = vld [vmem:[%s13001_s21 + $0x214] ss:$8 sps:$4 sm:$0xff]  }
0x1120   :  { %5756 = vmatpush1.bf16.msra.mxu0 %v5706_v52  ;;  %5878 = vmatpush1.bf16.msra.mxu1 %v5706_v52  ;;  %v5699_v36 = vmax.f32 %v5691_v0, 0.0  ;;  %v5701_v5 = vmax.f32 %v5693_v44, 0.0  ;;  %v5697_v32 = vadd.f32 %v5689_v2, %v5663_v41  ;;  %v5688_v35 = vmul.f32 %v5641_v6, %v13144_v11  ;;  %v9123_v6 = vld [vmem:[%s13001_s21 + $0x4] ss:$8 sps:$4 sm:$0xff]   ;;  %v9116_v17 = vld [vmem:[%s13000_s20 + $0x38] sm:$0xff]   ;;  %v9119_v12 = vld [vmem:[%s13000_s20 + $0x50] sm:$0xff]  }
0x1121   :  { %5757 = vmatprep.subr.bf16.mxu0 %v5709_v28  ;;  %5879 = vmatprep.subr.bf16.mxu1 %v5709_v28  ;;  %v5708_v38 = vpack.c.bf16 %v5680_v24, %v5678_v8  ;;  %v5698_v15 = vmax.f32 %v5690_v4, 0.0  ;;  %v5700_v34 = vmax.f32 %v5692_v22, 0.0  ;;  %v5694_v40 = vadd.f32 %v5686_v21, %v5659_v39  ;;  %v9138_v8 = vld [vmem:[%s13001_s21 + $0x54] ss:$8 sps:$4 sm:$0xff]   ;;  %v9136_v54 = vld [vmem:[%s13001_s21 + $0x50] ss:$8 sps:$4 sm:$0xff]  }
0x1122   :  { %v5711_v42 = vpack.c.bf16 %v5701_v5, %v5699_v36  ;;  %v5703_v43 = vmax.f32 %v5695_v26, 0.0  ;;  %v5705_v48 = vmax.f32 %v5697_v32, 0.0  ;;  %v5696_v49 = vadd.f32 %v5688_v35, %v5659_v39  ;;  %v9109_v39 = vld [vmem:[%s13000_s20] sm:$0xff]   ;;  %v9144_v24 = vld [vmem:[%s13001_s21 + $0x74] ss:$8 sps:$4 sm:$0xff]   ;;  %v9118_v62 = vld [vmem:[%s13000_s20 + $0x48] sm:$0xff]  }
0x1123   :  { %v5710_v50 = vpack.c.bf16 %v5700_v34, %v5698_v15  ;;  %v5702_v51 = vmax.f32 %v5694_v40, 0.0  ;;  %v9148_v56 = vld [vmem:[%s13001_s21 + $0x200] ss:$8 sps:$4 sm:$0xff]   ;;  %v9142_v60 = vld [vmem:[%s13001_s21 + $0x70] ss:$8 sps:$4 sm:$0xff]  }
0x1124   :  { %5758 = vmatpush1.bf16.msra.mxu0 %v5708_v38  ;;  %5880 = vmatpush1.bf16.msra.mxu1 %v5708_v38  ;;  %v5704_v9 = vmax.f32 %v5696_v49, 0.0  ;;  %v5713_v41 = vpack.c.bf16 %v5705_v48, %v5703_v43  ;;  %v9145_v20 = vld [vmem:[%s13001_s21 + $0x80] ss:$8 sps:$4 sm:$0xff]   ;;  %v9162_v37 = vld [vmem:[%s13001_s21 + $0x224] ss:$8 sps:$4 sm:$0xff]  }
0x1125   :  { %5759 = vmatprep.subr.bf16.mxu0 %v5711_v42  ;;  %5881 = vmatprep.subr.bf16.mxu1 %v5711_v42  ;;  %v9153_v18 = vld [vmem:[%s13001_s21 + $0x94] ss:$8 sps:$4 sm:$0xff]   ;;  %v9160_v0 = vld [vmem:[%s13001_s21 + $0x220] ss:$8 sps:$4 sm:$0xff]   ;;  %v9151_v44 = vld [vmem:[%s13001_s21 + $0x90] ss:$8 sps:$4 sm:$0xff]  }
0x1126   :  { %v5712_v3 = vpack.c.bf16 %v5704_v9, %v5702_v51  ;;  %v9168_v10 = vld [vmem:[%s13001_s21 + $0x234] ss:$8 sps:$4 sm:$0xff]   ;;  %v9159_v55 = vld [vmem:[%s13001_s21 + $0xa4] ss:$8 sps:$4 sm:$0xff]   ;;  %v9166_v45 = vld [vmem:[%s13001_s21 + $0x230] ss:$8 sps:$4 sm:$0xff]  }
0x1127   :  { %v9157_v2 = vld [vmem:[%s13001_s21 + $0xa0] ss:$8 sps:$4 sm:$0xff]   ;;  %v9174_v4 = vld [vmem:[%s13001_s21 + $0x244] ss:$8 sps:$4 sm:$0xff]   ;;  %v9165_v22 = vld [vmem:[%s13001_s21 + $0xb4] ss:$8 sps:$4 sm:$0xff]  }
0x1128   :  { %5760 = vmatpush1.bf16.msra.mxu0 %v5710_v50  ;;  %5882 = vmatpush1.bf16.msra.mxu1 %v5710_v50  ;;  %v9172_v21 = vld [vmem:[%s13001_s21 + $0x240] ss:$8 sps:$4 sm:$0xff]   ;;  %v9163_v36 = vld [vmem:[%s13001_s21 + $0xb0] ss:$8 sps:$4 sm:$0xff]   ;;  %v9180_v5 = vld [vmem:[%s13001_s21 + $0x254] ss:$8 sps:$4 sm:$0xff]  }
0x1129   :  { %5761 = vmatprep.subr.bf16.mxu0 %v5713_v41  ;;  %5883 = vmatprep.subr.bf16.mxu1 %v5713_v41  ;;  %v9171_v26 = vld [vmem:[%s13001_s21 + $0xc4] ss:$8 sps:$4 sm:$0xff]   ;;  %v9178_v32 = vld [vmem:[%s13001_s21 + $0x250] ss:$8 sps:$4 sm:$0xff]   ;;  %v9169_v11 = vld [vmem:[%s13001_s21 + $0xc0] ss:$8 sps:$4 sm:$0xff]  }
0x112a   :  { %v9186_v35 = vld [vmem:[%s13001_s21 + $0x264] ss:$8 sps:$4 sm:$0xff]   ;;  %v9184_v15 = vld [vmem:[%s13001_s21 + $0x260] ss:$8 sps:$4 sm:$0xff]   ;;  %v9175_v34 = vld [vmem:[%s13001_s21 + $0xd0] ss:$8 sps:$4 sm:$0xff]  }
0x112b   :  { %v9183_v40 = vld [vmem:[%s13001_s21 + $0xe4] ss:$8 sps:$4 sm:$0xff]   ;;  %v9187_v43 = vld [vmem:[%s13001_s21 + $0xf0] ss:$8 sps:$4 sm:$0xff]   ;;  %v9189_v48 = vld [vmem:[%s13001_s21 + $0xf4] ss:$8 sps:$4 sm:$0xff]  }
0x112c   :  { %5762 = vmatpush1.bf16.msra.mxu0 %v5712_v3  ;;  %5884 = vmatpush1.bf16.msra.mxu1 %v5712_v3  ;;  %v9190_v49 = vld [vmem:[%s13001_s21 + $0x270] ss:$8 sps:$4 sm:$0xff]   ;;  %v9195_v51 = vld [vmem:[%s13001_s21 + $0x104] ss:$8 sps:$4 sm:$0xff]   ;;  %v9196_v9 = vld [vmem:[%s13001_s21 + $0x280] ss:$8 sps:$4 sm:$0xff]  }
0x112d   :  { %5999 = vmatprep.subr.bf16.mxu0 %v5707_v1  ;;  %6464 = vmatprep.subr.bf16.mxu1 %v9123_v6  ;;  %v9147_v1 = vld [vmem:[%s13001_s21 + $0x84] ss:$8 sps:$4 sm:$0xff]   ;;  %v9202_v6 = vld [vmem:[%s13001_s21 + $0x290] ss:$8 sps:$4 sm:$0xff]  }
0x112f   :  { %7977 = vmatmul.mubr.msk.bf16.vlgmr.msra.gmra.mrb[56].mxu0 %vm5742_vm4, %v9109_v39  ;;  %7993 = vmatmul.mubr.msk.bf16.vlgmr.msra.gmra.mrb[76].mxu1 %vm5742_vm4, %v9110_v61  ;;  %v9208_v39 = vld [vmem:[%s13001_s21 + $0x2a0] ss:$8 sps:$4 sm:$0xff]   ;;  %v9210_v61 = vld [vmem:[%s13001_s21 + $0x2a4] ss:$8 sps:$4 sm:$0xff]  }
0x1130   :  { %6000 = vmatpush1.bf16.msra.mxu0 %v5706_v52  ;;  %5797 = vmatprep.mubr.bf16.mxu0 %v13070_v59  ;;  %v9139_v52 = vld [vmem:[%s13001_s21 + $0x60] ss:$8 sps:$4 sm:$0xff]  }
0x1131   :  { %6001 = vmatprep.subr.bf16.mxu0 %v5709_v28  ;;  %5919 = vmatprep.mubr.bf16.mxu1 %v13070_v59  ;;  %v9154_v28 = vld [vmem:[%s13001_s21 + $0x210] ss:$8 sps:$4 sm:$0xff]  }
0x1132   :  { %6465 = vmatpush1.bf16.msra.mxu1 %v9121_v7  ;;  %v9214_v7 = vld [vmem:[%s13001_s21 + $0x2b0] ss:$8 sps:$4 sm:$0xff]  }
0x1133   :  { %6466 = vmatprep.subr.bf16.mxu1 %v9126_v25  ;;  %v9216_v25 = vld [vmem:[%s13001_s21 + $0x2b4] ss:$8 sps:$4 sm:$0xff]  }
0x1134   :  { %6002 = vmatpush1.bf16.msra.mxu0 %v5708_v38  ;;  %v9120_v38 = vld [vmem:[%s13000_s20 + $0x58] sm:$0xff]  }
0x1135   :  { %6003 = vmatprep.subr.bf16.mxu0 %v5711_v42  ;;  %v9181_v42 = vld [vmem:[%s13001_s21 + $0xe0] ss:$8 sps:$4 sm:$0xff]  }
0x1136   :  { %6467 = vmatpush1.bf16.msra.mxu1 %v9124_v31  ;;  %v9220_v31 = vld [vmem:[%s13001_s21 + $0x2c0] ss:$8 sps:$4 sm:$0xff]  }
0x1137   :  { %7978 = vmatmul.mubr.msk.bf16.gmra.mrb[60].mxu0 %vm5742_vm4, %v9111_v53  ;;  %7994 = vmatmul.mubr.msk.bf16.gmra.mrb[80].mxu1 %vm5742_vm4, %v9112_v46  ;;  %v9222_v53 = vld [vmem:[%s13001_s21 + $0x2c4] ss:$8 sps:$4 sm:$0xff]   ;;  %v9226_v46 = vld [vmem:[%s13001_s21 + $0x2d0] ss:$8 sps:$4 sm:$0xff]  }
0x1138   :  { %6004 = vmatpush1.bf16.msra.mxu0 %v5710_v50  ;;  %5807 = vmatprep.mubr.bf16.mxu0 %v13070_v59  ;;  %v9192_v50 = vld [vmem:[%s13001_s21 + $0x274] ss:$8 sps:$4 sm:$0xff]  }
0x1139   :  { %6005 = vmatprep.subr.bf16.mxu0 %v5713_v41  ;;  %5929 = vmatprep.mubr.bf16.mxu1 %v13070_v59  ;;  %v9198_v41 = vld [vmem:[%s13001_s21 + $0x284] ss:$8 sps:$4 sm:$0xff]  }
0x113a   :  { %6468 = vmatprep.subr.bf16.mxu1 %v9129_v29  ;;  %v9228_v29 = vld [vmem:[%s13001_s21 + $0x2d4] ss:$8 sps:$4 sm:$0xff]  }
0x113b   :  { %6469 = vmatpush1.bf16.msra.mxu1 %v9127_v23  ;;  %v9232_v23 = vld [vmem:[%s13001_s21 + $0x2e0] ss:$8 sps:$4 sm:$0xff]  }
0x113c   :  { %6006 = vmatpush1.bf16.msra.mxu0 %v5712_v3  ;;  %6470 = vmatprep.subr.bf16.mxu1 %v9132_v14  ;;  %v9204_v3 = vld [vmem:[%s13001_s21 + $0x294] ss:$8 sps:$4 sm:$0xff]   ;;  %v9234_v14 = vld [vmem:[%s13001_s21 + $0x2e4] ss:$8 sps:$4 sm:$0xff]  }
0x113d   :  { %6995 = vmatprep.subr.bf16.mxu0 %v9150_v27  ;;  %v9238_v27 = vld [vmem:[%s13001_s21 + $0x2f0] ss:$8 sps:$4 sm:$0xff]  }
0x113f   :  { %7979 = vmatmul.mubr.msk.bf16.gmra.mrb[64].mxu0 %vm5742_vm4, %v9113_v16  ;;  %7995 = vmatmul.mubr.msk.bf16.gmra.mrb[84].mxu1 %vm5742_vm4, %v9114_v58  ;;  %v9240_v16 = vld [vmem:[%s13001_s21 + $0x2f4] ss:$8 sps:$4 sm:$0xff]   ;;  %v9246_v58 = vld [vmem:[%s13001_s21 + $0x304] ss:$8 sps:$4 sm:$0xff]  }
0x1140   :  { %5817 = vmatprep.mubr.bf16.mxu0 %v13070_v59  ;;  %5939 = vmatprep.mubr.bf16.mxu1 %v13070_v59 }
0x1141   :  { %6471 = vmatpush1.bf16.msra.mxu1 %v9130_v63 }
0x1142   :  { %6472 = vmatprep.subr.bf16.mxu1 %v9135_v33 }
0x1145   :  { %6473 = vmatpush1.bf16.msra.mxu1 %v9133_v19 }
0x1146   :  { %6474 = vmatprep.subr.bf16.mxu1 %v9138_v8 }
0x1147   :  { %7980 = vmatmul.mubr.msk.bf16.gmra.mrb[68].mxu0 %vm5742_vm4, %v9115_v47  ;;  %7996 = vmatmul.mubr.msk.bf16.gmra.mrb[88].mxu1 %vm5742_vm4, %v9116_v17 }
0x1148   :  { %6031 = vmatprep.mubr.bf16.mxu0 %v13070_v59 }
0x1149   :  { %6475 = vmatpush1.bf16.msra.mxu1 %v9136_v54 }
0x114a   :  { %6476 = vmatprep.subr.bf16.mxu1 %v9141_v30 }
0x114d   :  { %6477 = vmatpush1.bf16.msra.mxu1 %v9139_v52 }
0x114e   :  { %6478 = vmatprep.subr.bf16.mxu1 %v9144_v24 }
0x114f   :  { %8009 = vmatmul.mubr.msk.bf16.vlgmr.msra.gmra.mrb[72].mxu0 %vm5742_vm4, %v9117_v13 }
0x1150   :  { %6041 = vmatprep.mubr.bf16.mxu0 %v13070_v59  ;;  %6996 = vmatpush1.bf16.msra.mxu0 %v9148_v56 }
0x1151   :  { %6479 = vmatpush1.bf16.msra.mxu1 %v9142_v60  ;;  %6997 = vmatprep.subr.bf16.mxu0 %v9156_v57  ;;  %v9193_v60 = vld [vmem:[%s13001_s21 + $0x100] ss:$8 sps:$4 sm:$0xff]   ;;  %v9201_v57 = vld [vmem:[%s13001_s21 + $0x114] ss:$8 sps:$4 sm:$0xff]  }
0x1152   :  { %6480 = vmatprep.subr.bf16.mxu1 %v9147_v1 }
0x1154   :  { %6998 = vmatpush1.bf16.msra.mxu0 %v9154_v28 }
0x1155   :  { %6481 = vmatpush1.bf16.msra.mxu1 %v9145_v20  ;;  %6999 = vmatprep.subr.bf16.mxu0 %v9162_v37  ;;  %v9199_v20 = vld [vmem:[%s13001_s21 + $0x110] ss:$8 sps:$4 sm:$0xff]  }
0x1156   :  { %6482 = vmatprep.subr.bf16.mxu1 %v9153_v18 }
0x1157   :  { %8010 = vmatmul.mubr.msk.bf16.gmra.mrb[76].mxu0 %vm5742_vm4, %v9118_v62  ;;  %v9207_v62 = vld [vmem:[%s13001_s21 + $0x124] ss:$8 sps:$4 sm:$0xff]  }
0x1158   :  { %6051 = vmatprep.mubr.bf16.mxu0 %v13070_v59  ;;  %7000 = vmatpush1.bf16.msra.mxu0 %v9160_v0 }
0x1159   :  { %6483 = vmatpush1.bf16.msra.mxu1 %v9151_v44  ;;  %7001 = vmatprep.subr.bf16.mxu0 %v9168_v10 }
0x115a   :  { %6484 = vmatprep.subr.bf16.mxu1 %v9159_v55 }
0x115c   :  { %7002 = vmatpush1.bf16.msra.mxu0 %v9166_v45 }
0x115d   :  { %6485 = vmatpush1.bf16.msra.mxu1 %v9157_v2  ;;  %7003 = vmatprep.subr.bf16.mxu0 %v9174_v4 }
0x115e   :  { %6486 = vmatprep.subr.bf16.mxu1 %v9165_v22 }
0x115f   :  { %8011 = vmatmul.mubr.msk.bf16.gmra.mrb[80].mxu0 %vm5742_vm4, %v9119_v12  ;;  %v9205_v12 = vld [vmem:[%s13001_s21 + $0x120] ss:$8 sps:$4 sm:$0xff]  }
0x1160   :  { %6061 = vmatprep.mubr.bf16.mxu0 %v13070_v59  ;;  %7004 = vmatpush1.bf16.msra.mxu0 %v9172_v21  ;;  %v9177_v59 = vld [vmem:[%s13001_s21 + $0xd4] ss:$8 sps:$4 sm:$0xff]  }
0x1161   :  { %6487 = vmatpush1.bf16.msra.mxu1 %v9163_v36  ;;  %7005 = vmatprep.subr.bf16.mxu0 %v9180_v5  ;;  %v9213_v21 = vld [vmem:[%s13001_s21 + $0x134] ss:$8 sps:$4 sm:$0xff]  }
0x1162   :  { %6488 = vmatprep.subr.bf16.mxu1 %v9171_v26  ;;  %v9211_v26 = vld [vmem:[%s13001_s21 + $0x130] ss:$8 sps:$4 sm:$0xff]  }
0x1164   :  { %7006 = vmatpush1.bf16.msra.mxu0 %v9178_v32 }
0x1165   :  { %6489 = vmatpush1.bf16.msra.mxu1 %v9169_v11  ;;  %7007 = vmatprep.subr.bf16.mxu0 %v9186_v35  ;;  %v9219_v35 = vld [vmem:[%s13001_s21 + $0x144] ss:$8 sps:$4 sm:$0xff]  }
0x1166   :  { %6490 = vmatprep.subr.bf16.mxu1 %v9177_v59 }
0x1167   :  { %8012 = vmatmul.mubr.msk.bf16.gmra.mrb[84].mxu0 %vm5742_vm4, %v9120_v38 }
0x1168   :  { %7008 = vmatpush1.bf16.msra.mxu0 %v9184_v15 }
0x1169   :  { %6491 = vmatpush1.bf16.msra.mxu1 %v9175_v34  ;;  %7009 = vmatprep.subr.bf16.mxu0 %v9192_v50  ;;  %v9225_v50 = vld [vmem:[%s13001_s21 + $0x154] ss:$8 sps:$4 sm:$0xff]  }
0x116a   :  { %6492 = vmatprep.subr.bf16.mxu1 %v9183_v40 }
0x116c   :  { %7010 = vmatpush1.bf16.msra.mxu0 %v9190_v49  ;;  %v9217_v49 = vld [vmem:[%s13001_s21 + $0x140] ss:$8 sps:$4 sm:$0xff]  }
0x116d   :  { %6493 = vmatpush1.bf16.msra.mxu1 %v9181_v42  ;;  %7011 = vmatprep.subr.bf16.mxu0 %v9198_v41  ;;  %v9223_v41 = vld [vmem:[%s13001_s21 + $0x150] ss:$8 sps:$4 sm:$0xff]  }
0x116e   :  { %6494 = vmatprep.subr.bf16.mxu1 %v9189_v48 }
0x1170   :  { %7012 = vmatpush1.bf16.msra.mxu0 %v9196_v9 }
0x1171   :  { %6495 = vmatpush1.bf16.msra.mxu1 %v9187_v43  ;;  %7013 = vmatprep.subr.bf16.mxu0 %v9204_v3 }
0x1172   :  { %6537 = vmatprep.subr.bf16.mxu1 %v9195_v51 }
0x1174   :  { %7014 = vmatpush1.bf16.msra.mxu0 %v9202_v6 }
0x1175   :  { %7015 = vmatprep.subr.bf16.mxu0 %v9210_v61 }
0x1178   :  { %7016 = vmatpush1.bf16.msra.mxu0 %v9208_v39  ;;  %v9231_v39 = vld [vmem:[%s13001_s21 + $0x164] ss:$8 sps:$4 sm:$0xff]  }
0x1179   :  { %7017 = vmatprep.subr.bf16.mxu0 %v9216_v25 }
0x117c   :  { %7018 = vmatpush1.bf16.msra.mxu0 %v9214_v7 }
0x117d   :  { %7019 = vmatprep.subr.bf16.mxu0 %v9222_v53 }
0x1180   :  { %7020 = vmatpush1.bf16.msra.mxu0 %v9220_v31 }
0x1181   :  { %7021 = vmatprep.subr.bf16.mxu0 %v9228_v29 }
0x1184   :  { %7022 = vmatpush1.bf16.msra.mxu0 %v9226_v46 }
0x1185   :  { %7023 = vmatprep.subr.bf16.mxu0 %v9234_v14  ;;  %v9229_v14 = vld [vmem:[%s13001_s21 + $0x160] ss:$8 sps:$4 sm:$0xff]  }
0x1188   :  { %7024 = vmatpush1.bf16.msra.mxu0 %v9232_v23 }
0x1189   :  { %7025 = vmatprep.subr.bf16.mxu0 %v9240_v16 }
0x118c   :  { %7026 = vmatpush1.bf16.msra.mxu0 %v9238_v27  ;;  %v9237_v27 = vld [vmem:[%s13001_s21 + $0x174] ss:$8 sps:$4 sm:$0xff]  }
0x118d   :  { %7068 = vmatprep.subr.bf16.mxu0 %v9246_v58  ;;  %v9235_v58 = vld [vmem:[%s13001_s21 + $0x170] ss:$8 sps:$4 sm:$0xff]  }
0x1202   :  { %v5911_v63 = vpop.f32.mrb[76].mxu1  ;;  %v12596_v33 = vpop.f32.mrb[56].mxu0 }
0x1203   :  { %v5913_v19 = vpop.f32.mrb[77].mxu1  ;;  %v12598_v8 = vpop.f32.mrb[57].mxu0 }
0x1204   :  { %v5915_v47 = vpop.f32.mrb[78].mxu1  ;;  %v12600_v17 = vpop.f32.mrb[58].mxu0 }
0x1205   :  { %v12602_v54 = vpack.c.bf16 %v5915_v47, %v5911_v63  ;;  %v5917_v30 = vpop.f32.mrb[79].mxu1  ;;  %v5828_v52 = vpack.c.bf16 %v12600_v17, %v12596_v33  ;;  %v12606_v24 = vpop.f32.mrb[59].mxu0  ;;  %v9295_v33 = vld [vmem:[%s13001_s21 + $0x3a0] ss:$8 sps:$4 sm:$0xff]   ;;  %v9300_v17 = vld [vmem:[%s13001_s21 + $0x3b4] ss:$8 sps:$4 sm:$0xff]  }
0x1206   :  { %v12608_v13 = vpack.c.bf16 %v5917_v30, %v5913_v19  ;;  %v5829_v56 = vpack.c.bf16 %v12606_v24, %v12598_v8  ;;  %v9243_v19 = vld [vmem:[%s13001_s21 + $0x184] ss:$8 sps:$4 sm:$0xff]   ;;  %v9241_v8 = vld [vmem:[%s13001_s21 + $0x180] ss:$8 sps:$4 sm:$0xff]  }
0x1207   :  { %v9244_v24 = vld [vmem:[%s13001_s21 + $0x300] ss:$8 sps:$4 sm:$0xff]  }
0x1208   :  { %6496 = vmatprep.mubr.bf16.mxu1 %v12608_v13 }
0x1209   :  { %6497 = vmatmul.mubr.bf16.vlgmr.msra.gmra.mrb[92].mxu1 %v12602_v54 }
0x120a   :  { %6538 = vmatpush1.bf16.msra.mxu1 %v9193_v60  ;;  %v5921_v1 = vpop.f32.mrb[80].mxu1  ;;  %v12620_v28 = vpop.f32.mrb[60].mxu0 }
0x120b   :  { %v5923_v37 = vpop.f32.mrb[81].mxu1  ;;  %6539 = vmatprep.subr.bf16.mxu1 %v9201_v57  ;;  %v12625_v18 = vpop.f32.mrb[61].mxu0 }
0x120c   :  { %v5925_v0 = vpop.f32.mrb[82].mxu1  ;;  %v12630_v44 = vpop.f32.mrb[62].mxu0 }
0x120d   :  { %v12632_v10 = vpack.c.bf16 %v5925_v0, %v5921_v1  ;;  %v5927_v55 = vpop.f32.mrb[83].mxu1  ;;  %v5830_v45 = vpack.c.bf16 %v12630_v44, %v12620_v28  ;;  %v12636_v2 = vpop.f32.mrb[63].mxu0  ;;  %v9252_v1 = vld [vmem:[%s13001_s21 + $0x314] ss:$8 sps:$4 sm:$0xff]   ;;  %v9301_v28 = vld [vmem:[%s13001_s21 + $0x3c0] ss:$8 sps:$4 sm:$0xff]  }
0x120e   :  { %v12638_v4 = vpack.c.bf16 %v5927_v55, %v5923_v37  ;;  %6540 = vmatpush1.bf16.msra.mxu1 %v9199_v20  ;;  %v5831_v22 = vpack.c.bf16 %v12636_v2, %v12625_v18  ;;  %v9247_v37 = vld [vmem:[%s13001_s21 + $0x190] ss:$8 sps:$4 sm:$0xff]   ;;  %v9255_v55 = vld [vmem:[%s13001_s21 + $0x1a4] ss:$8 sps:$4 sm:$0xff]   ;;  %v9306_v44 = vld [vmem:[%s13001_s21 + $0x3d4] ss:$8 sps:$4 sm:$0xff]  }
0x120f   :  { %6541 = vmatprep.subr.bf16.mxu1 %v9207_v62  ;;  %v9250_v62 = vld [vmem:[%s13001_s21 + $0x310] ss:$8 sps:$4 sm:$0xff]   ;;  %v9303_v18 = vld [vmem:[%s13001_s21 + $0x3c4] ss:$8 sps:$4 sm:$0xff]  }
0x1210   :  { %6506 = vmatprep.mubr.bf16.mxu1 %v12638_v4  ;;  %v9309_v2 = vld [vmem:[%s13001_s21 + $0x3e4] ss:$8 sps:$4 sm:$0xff]  }
0x1211   :  { %6507 = vmatmul.mubr.bf16.gmra.mrb[96].mxu1 %v12632_v10 }
0x1212   :  { %6542 = vmatpush1.bf16.msra.mxu1 %v9205_v12  ;;  %v5931_v36 = vpop.f32.mrb[84].mxu1  ;;  %v12650_v5 = vpop.f32.mrb[64].mxu0  ;;  %v9258_v12 = vld [vmem:[%s13001_s21 + $0x324] ss:$8 sps:$4 sm:$0xff]  }
0x1213   :  { %v5933_v32 = vpop.f32.mrb[85].mxu1  ;;  %6543 = vmatprep.subr.bf16.mxu1 %v9213_v21  ;;  %v12655_v11 = vpop.f32.mrb[65].mxu0 }
0x1214   :  { %v5935_v59 = vpop.f32.mrb[86].mxu1  ;;  %v12660_v38 = vpop.f32.mrb[66].mxu0 }
0x1215   :  { %v12662_v15 = vpack.c.bf16 %v5935_v59, %v5931_v36  ;;  %v5937_v34 = vpop.f32.mrb[87].mxu1  ;;  %v5832_v40 = vpack.c.bf16 %v12660_v38, %v12650_v5  ;;  %v12666_v42 = vpop.f32.mrb[67].mxu0  ;;  %v9256_v59 = vld [vmem:[%s13001_s21 + $0x320] ss:$8 sps:$4 sm:$0xff]   ;;  %v9312_v5 = vld [vmem:[%s13001_s21 + $0x3f4] ss:$8 sps:$4 sm:$0xff]  }
0x1216   :  { %v12668_v43 = vpack.c.bf16 %v5937_v34, %v5933_v32  ;;  %6544 = vmatpush1.bf16.msra.mxu1 %v9211_v26  ;;  %v5833_v48 = vpack.c.bf16 %v12666_v42, %v12655_v11  ;;  %v9261_v34 = vld [vmem:[%s13001_s21 + $0x1b4] ss:$8 sps:$4 sm:$0xff]   ;;  %v9310_v11 = vld [vmem:[%s13001_s21 + $0x3f0] ss:$8 sps:$4 sm:$0xff]  }
0x1217   :  { %6545 = vmatprep.subr.bf16.mxu1 %v9219_v35  ;;  %v9253_v35 = vld [vmem:[%s13001_s21 + $0x1a0] ss:$8 sps:$4 sm:$0xff]  }
0x1218   :  { %6516 = vmatprep.mubr.bf16.mxu1 %v12668_v43 }
0x1219   :  { %6517 = vmatmul.mubr.bf16.gmra.mrb[100].mxu1 %v12662_v15 }
0x121a   :  { %6546 = vmatpush1.bf16.msra.mxu1 %v9217_v49  ;;  %v5941_v51 = vpop.f32.mrb[88].mxu1  ;;  %v12680_v9 = vpop.f32.mrb[68].mxu0  ;;  %v9264_v49 = vld [vmem:[%s13001_s21 + $0x334] ss:$8 sps:$4 sm:$0xff]  }
0x121b   :  { %v5943_v6 = vpop.f32.mrb[89].mxu1  ;;  %6547 = vmatprep.subr.bf16.mxu1 %v9225_v50  ;;  %v12685_v3 = vpop.f32.mrb[69].mxu0 }
0x121c   :  { %v5945_v61 = vpop.f32.mrb[90].mxu1  ;;  %v12690_v7 = vpop.f32.mrb[70].mxu0 }
0x121d   :  { %v12692_v25 = vpack.c.bf16 %v5945_v61, %v5941_v51  ;;  %v5947_v31 = vpop.f32.mrb[91].mxu1  ;;  %v5834_v53 = vpack.c.bf16 %v12690_v7, %v12680_v9  ;;  %v12696_v46 = vpop.f32.mrb[71].mxu0  ;;  %v9259_v51 = vld [vmem:[%s13001_s21 + $0x1b0] ss:$8 sps:$4 sm:$0xff]   ;;  %v9270_v61 = vld [vmem:[%s13001_s21 + $0x344] ss:$8 sps:$4 sm:$0xff]  }
0x121e   :  { %v12698_v29 = vpack.c.bf16 %v5947_v31, %v5943_v6  ;;  %6548 = vmatpush1.bf16.msra.mxu1 %v9223_v41  ;;  %v5835_v23 = vpack.c.bf16 %v12696_v46, %v12685_v3  ;;  %v9262_v41 = vld [vmem:[%s13001_s21 + $0x330] ss:$8 sps:$4 sm:$0xff]  }
0x121f   :  { %6549 = vmatprep.subr.bf16.mxu1 %v9231_v39  ;;  %v9267_v39 = vld [vmem:[%s13001_s21 + $0x1c4] ss:$8 sps:$4 sm:$0xff]  }
0x1220   :  { %6526 = vmatprep.mubr.bf16.mxu1 %v12698_v29 }
0x1221   :  { %6527 = vmatmul.mubr.bf16.gmra.mrb[104].mxu1 %v12692_v25 }
0x1222   :  { %6550 = vmatpush1.bf16.msra.mxu1 %v9229_v14  ;;  %v6033_v16 = vpop.f32.mrb[72].mxu0  ;;  %6569 = vmatprep.mubr.bf16.mxu1 %v5829_v56  ;;  %v9249_v56 = vld [vmem:[%s13001_s21 + $0x194] ss:$8 sps:$4 sm:$0xff]  }
0x1223   :  { %v6035_v63 = vpop.f32.mrb[73].mxu0  ;;  %6551 = vmatprep.subr.bf16.mxu1 %v9237_v27 }
0x1224   :  { %v6037_v47 = vpop.f32.mrb[74].mxu0 }
0x1225   :  { %v6072_v30 = vpack.c.bf16 %v6037_v47, %v6033_v16  ;;  %v6039_v60 = vpop.f32.mrb[75].mxu0  ;;  %v9276_v47 = vld [vmem:[%s13001_s21 + $0x354] ss:$8 sps:$4 sm:$0xff]  }
0x1226   :  { %v6073_v57 = vpack.c.bf16 %v6039_v60, %v6035_v63  ;;  %6552 = vmatpush1.bf16.msra.mxu1 %v9235_v58  ;;  %v9265_v58 = vld [vmem:[%s13001_s21 + $0x1c0] ss:$8 sps:$4 sm:$0xff]   ;;  %v9271_v60 = vld [vmem:[%s13001_s21 + $0x1d0] ss:$8 sps:$4 sm:$0xff]  }
0x1227   :  { %6553 = vmatprep.subr.bf16.mxu1 %v9243_v19  ;;  %v9268_v63 = vld [vmem:[%s13001_s21 + $0x340] ss:$8 sps:$4 sm:$0xff]   ;;  %v9273_v19 = vld [vmem:[%s13001_s21 + $0x1d4] ss:$8 sps:$4 sm:$0xff]  }
0x1228   :  { %7027 = vmatprep.mubr.bf16.mxu0 %v6073_v57  ;;  %v9274_v57 = vld [vmem:[%s13001_s21 + $0x350] ss:$8 sps:$4 sm:$0xff]  }
0x1229   :  { %7028 = vmatmul.mubr.bf16.vlgmr.msra.gmra.mrb[88].mxu0 %v6072_v30 }
0x122a   :  { %6554 = vmatpush1.bf16.msra.mxu1 %v9241_v8  ;;  %7069 = vmatpush1.bf16.msra.mxu0 %v9244_v24  ;;  %v6043_v20 = vpop.f32.mrb[76].mxu0  ;;  %v9279_v24 = vld [vmem:[%s13001_s21 + $0x1e4] ss:$8 sps:$4 sm:$0xff]  }
0x122b   :  { %v6045_v0 = vpop.f32.mrb[77].mxu0  ;;  %6555 = vmatprep.subr.bf16.mxu1 %v9249_v56  ;;  %7070 = vmatprep.subr.bf16.mxu0 %v9252_v1  ;;  %v9282_v56 = vld [vmem:[%s13001_s21 + $0x364] ss:$8 sps:$4 sm:$0xff]  }
0x122c   :  { %v6047_v21 = vpop.f32.mrb[78].mxu0 }
0x122d   :  { %v6074_v36 = vpack.c.bf16 %v6047_v21, %v6043_v20  ;;  %v6049_v26 = vpop.f32.mrb[79].mxu0  ;;  %v9288_v21 = vld [vmem:[%s13001_s21 + $0x374] ss:$8 sps:$4 sm:$0xff]  }
0x122e   :  { %v6075_v32 = vpack.c.bf16 %v6049_v26, %v6045_v0  ;;  %6556 = vmatpush1.bf16.msra.mxu1 %v9247_v37  ;;  %7071 = vmatpush1.bf16.msra.mxu0 %v9250_v62  ;;  %v9277_v0 = vld [vmem:[%s13001_s21 + $0x1e0] ss:$8 sps:$4 sm:$0xff]   ;;  %v9286_v26 = vld [vmem:[%s13001_s21 + $0x370] ss:$8 sps:$4 sm:$0xff]  }
0x122f   :  { %6557 = vmatprep.subr.bf16.mxu1 %v9255_v55  ;;  %7072 = vmatprep.subr.bf16.mxu0 %v9258_v12  ;;  %v9280_v55 = vld [vmem:[%s13001_s21 + $0x360] ss:$8 sps:$4 sm:$0xff]   ;;  %v9285_v12 = vld [vmem:[%s13001_s21 + $0x1f4] ss:$8 sps:$4 sm:$0xff]  }
0x1230   :  { %7037 = vmatprep.mubr.bf16.mxu0 %v6075_v32  ;;  %v9291_v32 = vld [vmem:[%s13001_s21 + $0x384] ss:$8 sps:$4 sm:$0xff]  }
0x1231   :  { %7038 = vmatmul.mubr.bf16.gmra.mrb[92].mxu0 %v6074_v36  ;;  %v9283_v36 = vld [vmem:[%s13001_s21 + $0x1f0] ss:$8 sps:$4 sm:$0xff]  }
0x1232   :  { %6558 = vmatpush1.bf16.msra.mxu1 %v9253_v35  ;;  %7073 = vmatpush1.bf16.msra.mxu0 %v9256_v59  ;;  %v6053_v50 = vpop.f32.mrb[80].mxu0  ;;  %v9289_v35 = vld [vmem:[%s13001_s21 + $0x380] ss:$8 sps:$4 sm:$0xff]   ;;  %v9294_v59 = vld [vmem:[%s13001_s21 + $0x394] ss:$8 sps:$4 sm:$0xff]  }
0x1233   :  { %v6055_v6 = vpop.f32.mrb[81].mxu0  ;;  %6559 = vmatprep.subr.bf16.mxu1 %v9261_v34  ;;  %7074 = vmatprep.subr.bf16.mxu0 %v9264_v49  ;;  %v9297_v34 = vld [vmem:[%s13001_s21 + $0x3a4] ss:$8 sps:$4 sm:$0xff]  }
0x1234   :  { %v6057_v31 = vpop.f32.mrb[82].mxu0 }
0x1235   :  { %v6076_v14 = vpack.c.bf16 %v6057_v31, %v6053_v50  ;;  %v6059_v27 = vpop.f32.mrb[83].mxu0 }
0x1236   :  { %v6077_v16 = vpack.c.bf16 %v6059_v27, %v6055_v6  ;;  %6560 = vmatpush1.bf16.msra.mxu1 %v9259_v51  ;;  %7075 = vmatpush1.bf16.msra.mxu0 %v9262_v41 }
0x1237   :  { %6561 = vmatprep.subr.bf16.mxu1 %v9267_v39  ;;  %7076 = vmatprep.subr.bf16.mxu0 %v9270_v61 }
0x1238   :  { %7047 = vmatprep.mubr.bf16.mxu0 %v6077_v16 }
0x1239   :  { %7048 = vmatmul.mubr.bf16.gmra.mrb[96].mxu0 %v6076_v14 }
0x123a   :  { %6562 = vmatpush1.bf16.msra.mxu1 %v9265_v58  ;;  %7077 = vmatpush1.bf16.msra.mxu0 %v9268_v63  ;;  %v6063_v30 = vpop.f32.mrb[84].mxu0 }
0x123b   :  { %v6065_v8 = vpop.f32.mrb[85].mxu0  ;;  %6563 = vmatprep.subr.bf16.mxu1 %v9273_v19  ;;  %7078 = vmatprep.subr.bf16.mxu0 %v9276_v47 }
0x123c   :  { %v6067_v1 = vpop.f32.mrb[86].mxu0 }
0x123d   :  { %v6078_v20 = vpack.c.bf16 %v6067_v1, %v6063_v30  ;;  %v6069_v37 = vpop.f32.mrb[87].mxu0 }
0x123e   :  { %v6079_v62 = vpack.c.bf16 %v6069_v37, %v6065_v8  ;;  %6564 = vmatpush1.bf16.msra.mxu1 %v9271_v60  ;;  %7079 = vmatpush1.bf16.msra.mxu0 %v9274_v57 }
0x123f   :  { %6565 = vmatprep.subr.bf16.mxu1 %v9279_v24  ;;  %7080 = vmatprep.subr.bf16.mxu0 %v9282_v56 }
0x1240   :  { %7057 = vmatprep.mubr.bf16.mxu0 %v6079_v62 }
0x1241   :  { %7058 = vmatmul.mubr.bf16.gmra.mrb[100].mxu0 %v6078_v20 }
0x1242   :  { %6566 = vmatpush1.bf16.msra.mxu1 %v9277_v0  ;;  %7081 = vmatpush1.bf16.msra.mxu0 %v9280_v55 }
0x1243   :  { %7100 = vmatprep.mubr.bf16.mxu0 %v12608_v13  ;;  %6567 = vmatprep.subr.bf16.mxu1 %v9285_v12  ;;  %v9292_v13 = vld [vmem:[%s13001_s21 + $0x390] ss:$8 sps:$4 sm:$0xff]  }
0x1244   :  { %7082 = vmatprep.subr.bf16.mxu0 %v9288_v21 }
0x1246   :  { %6568 = vmatpush1.bf16.msra.mxu1 %v9283_v36  ;;  %7083 = vmatpush1.bf16.msra.mxu0 %v9286_v26 }
0x1247   :  { %7084 = vmatprep.subr.bf16.mxu0 %v9291_v32 }
0x1249   :  { %6570 = vmatmul.mubr.bf16.vlgmr.msra.gmra.mrb[92].mxu1 %v5828_v52  ;;  %v9298_v52 = vld [vmem:[%s13001_s21 + $0x3b0] ss:$8 sps:$4 sm:$0xff]  }
0x124a   :  { %6579 = vmatprep.mubr.bf16.mxu1 %v5831_v22  ;;  %7085 = vmatpush1.bf16.msra.mxu0 %v9289_v35  ;;  %v9307_v22 = vld [vmem:[%s13001_s21 + $0x3e0] ss:$8 sps:$4 sm:$0xff]  }
0x124b   :  { %7086 = vmatprep.subr.bf16.mxu0 %v9294_v59 }
0x124e   :  { %7087 = vmatpush1.bf16.msra.mxu0 %v9292_v13 }
0x124f   :  { %7088 = vmatprep.subr.bf16.mxu0 %v9297_v34 }
0x1251   :  { %6580 = vmatmul.mubr.bf16.gmra.mrb[96].mxu1 %v5830_v45  ;;  %v9304_v45 = vld [vmem:[%s13001_s21 + $0x3d0] ss:$8 sps:$4 sm:$0xff]  }
0x1252   :  { %6589 = vmatprep.mubr.bf16.mxu1 %v5833_v48  ;;  %7089 = vmatpush1.bf16.msra.mxu0 %v9295_v33 }
0x1253   :  { %7090 = vmatprep.subr.bf16.mxu0 %v9300_v17 }
0x1256   :  { %7091 = vmatpush1.bf16.msra.mxu0 %v9298_v52 }
0x1257   :  { %7092 = vmatprep.subr.bf16.mxu0 %v9303_v18 }
0x1259   :  { %6590 = vmatmul.mubr.bf16.gmra.mrb[100].mxu1 %v5832_v40 }
0x125a   :  { %6599 = vmatprep.mubr.bf16.mxu1 %v5835_v23  ;;  %7093 = vmatpush1.bf16.msra.mxu0 %v9301_v28 }
0x125b   :  { %7094 = vmatprep.subr.bf16.mxu0 %v9306_v44 }
0x125e   :  { %7095 = vmatpush1.bf16.msra.mxu0 %v9304_v45 }
0x125f   :  { %7096 = vmatprep.subr.bf16.mxu0 %v9309_v2 }
0x1261   :  { %6600 = vmatmul.mubr.bf16.gmra.mrb[104].mxu1 %v5834_v53 }
0x1262   :  { %7097 = vmatpush1.bf16.msra.mxu0 %v9307_v22 }
0x1263   :  { %7098 = vmatprep.subr.bf16.mxu0 %v9312_v5 }
0x1266   :  { %7099 = vmatpush1.bf16.msra.mxu0 %v9310_v11 }
0x1269   :  { %7101 = vmatmul.mubr.bf16.vlgmr.msra.gmra.mrb[88].mxu0 %v12602_v54 }
0x126a   :  { %7110 = vmatprep.mubr.bf16.mxu0 %v12638_v4 }
0x1271   :  { %7111 = vmatmul.mubr.bf16.gmra.mrb[92].mxu0 %v12632_v10 }
0x1272   :  { %7120 = vmatprep.mubr.bf16.mxu0 %v12668_v43 }
0x1279   :  { %7121 = vmatmul.mubr.bf16.gmra.mrb[96].mxu0 %v12662_v15 }
0x127a   :  { %7130 = vmatprep.mubr.bf16.mxu0 %v12698_v29 }
0x1281   :  { %7131 = vmatmul.mubr.bf16.gmra.mrb[100].mxu0 %v12692_v25 }
0x131c   :  { %v6571_v38 = vpop.f32.mrb[92].mxu1 }
0x131d   :  { %9329 = vtanh.f32 %v6571_v38  ;;  %v6573_v40 = vpop.f32.mrb[93].mxu1 }
0x131e   :  { %9331 = vtanh.f32 %v6573_v40  ;;  %v6575_v42 = vpop.f32.mrb[94].mxu1 }
0x131f   :  { %9333 = vtanh.f32 %v6575_v42  ;;  %v6577_v48 = vpop.f32.mrb[95].mxu1 }
0x1320   :  { %9335 = vtanh.f32 %v6577_v48 }
0x1324   :  { %v6581_v54 = vpop.f32.mrb[96].mxu1 }
0x1325   :  { %9337 = vtanh.f32 %v6581_v54  ;;  %v6583_v4 = vpop.f32.mrb[97].mxu1 }
0x1326   :  { %9339 = vtanh.f32 %v6583_v4  ;;  %v6585_v10 = vpop.f32.mrb[98].mxu1 }
0x1327   :  { %v9330_v43 = vpop.eup %9329  ;;  %9341 = vtanh.f32 %v6585_v10  ;;  %v6587_v15 = vpop.f32.mrb[99].mxu1 }
0x1328   :  { %v9332_v9 = vpop.eup %9331  ;;  %7157 = vst [vmem:[%s13004_s22] sm:$0xff] %v9330_v43  ;;  %9343 = vtanh.f32 %v6587_v15 }
0x1329   :  { %v9334_v3 = vpop.eup %9333  ;;  %7158 = vst [vmem:[%s13004_s22 + $0x8] sm:$0xff] %v9332_v9 }
0x132a   :  { %v9336_v7 = vpop.eup %9335  ;;  %7159 = vst [vmem:[%s13004_s22 + $0x10] sm:$0xff] %v9334_v3 }
0x132b   :  { %7160 = vst [vmem:[%s13004_s22 + $0x18] sm:$0xff] %v9336_v7 }
0x132c   :  { %v6591_v25 = vpop.f32.mrb[100].mxu1 }
0x132d   :  { %9345 = vtanh.f32 %v6591_v25  ;;  %v6593_v53 = vpop.f32.mrb[101].mxu1 }
0x132e   :  { %9347 = vtanh.f32 %v6593_v53  ;;  %v6595_v46 = vpop.f32.mrb[102].mxu1 }
0x132f   :  { %v9338_v29 = vpop.eup %9337  ;;  %9349 = vtanh.f32 %v6595_v46  ;;  %v6597_v23 = vpop.f32.mrb[103].mxu1 }
0x1330   :  { %v9340_v49 = vpop.eup %9339  ;;  %7161 = vst [vmem:[%s13004_s22 + $0x20] sm:$0xff] %v9338_v29  ;;  %9351 = vtanh.f32 %v6597_v23 }
0x1331   :  { %v9342_v50 = vpop.eup %9341  ;;  %7162 = vst [vmem:[%s13004_s22 + $0x28] sm:$0xff] %v9340_v49 }
0x1332   :  { %v9344_v51 = vpop.eup %9343  ;;  %7163 = vst [vmem:[%s13004_s22 + $0x30] sm:$0xff] %v9342_v50 }
0x1333   :  { %7164 = vst [vmem:[%s13004_s22 + $0x38] sm:$0xff] %v9344_v51 }
0x1334   :  { %v6601_v41 = vpop.f32.mrb[104].mxu1 }
0x1335   :  { %9353 = vtanh.f32 %v6601_v41  ;;  %v6603_v6 = vpop.f32.mrb[105].mxu1 }
0x1336   :  { %9355 = vtanh.f32 %v6603_v6  ;;  %v6605_v39 = vpop.f32.mrb[106].mxu1 }
0x1337   :  { %v9346_v61 = vpop.eup %9345  ;;  %9357 = vtanh.f32 %v6605_v39  ;;  %v6607_v31 = vpop.f32.mrb[107].mxu1 }
0x1338   :  { %v9348_v14 = vpop.eup %9347  ;;  %7165 = vst [vmem:[%s13004_s22 + $0x40] sm:$0xff] %v9346_v61  ;;  %9359 = vtanh.f32 %v6607_v31 }
0x1339   :  { %v9350_v27 = vpop.eup %9349  ;;  %7166 = vst [vmem:[%s13004_s22 + $0x48] sm:$0xff] %v9348_v14 }
0x133a   :  { %v9352_v16 = vpop.eup %9351  ;;  %7167 = vst [vmem:[%s13004_s22 + $0x50] sm:$0xff] %v9350_v27 }
0x133b   :  { %7168 = vst [vmem:[%s13004_s22 + $0x58] sm:$0xff] %v9352_v16 }
0x133c   :  { %v7102_v58 = vpop.f32.mrb[88].mxu0 }
0x133d   :  { %9361 = vtanh.f32 %v7102_v58  ;;  %v7104_v63 = vpop.f32.mrb[89].mxu0 }
0x133e   :  { %9363 = vtanh.f32 %v7104_v63  ;;  %v7106_v19 = vpop.f32.mrb[90].mxu0 }
0x133f   :  { %v9354_v47 = vpop.eup %9353  ;;  %9365 = vtanh.f32 %v7106_v19  ;;  %v7108_v30 = vpop.f32.mrb[91].mxu0 }
0x1340   :  { %v9356_v60 = vpop.eup %9355  ;;  %7169 = vst [vmem:[%s13004_s22 + $0x60] sm:$0xff] %v9354_v47  ;;  %9367 = vtanh.f32 %v7108_v30 }
0x1341   :  { %v9358_v57 = vpop.eup %9357  ;;  %7170 = vst [vmem:[%s13004_s22 + $0x68] sm:$0xff] %v9356_v60 }
0x1342   :  { %v9360_v8 = vpop.eup %9359  ;;  %7171 = vst [vmem:[%s13004_s22 + $0x70] sm:$0xff] %v9358_v57 }
0x1343   :  { %7172 = vst [vmem:[%s13004_s22 + $0x78] sm:$0xff] %v9360_v8 }
0x1344   :  { %v7112_v24 = vpop.f32.mrb[92].mxu0 }
0x1345   :  { %9369 = vtanh.f32 %v7112_v24  ;;  %v7114_v56 = vpop.f32.mrb[93].mxu0 }
0x1346   :  { %9371 = vtanh.f32 %v7114_v56  ;;  %v7116_v1 = vpop.f32.mrb[94].mxu0 }
0x1347   :  { %v9362_v20 = vpop.eup %9361  ;;  %9373 = vtanh.f32 %v7116_v1  ;;  %v7118_v37 = vpop.f32.mrb[95].mxu0 }
0x1348   :  { %v9364_v62 = vpop.eup %9363  ;;  %8205 = vst [vmem:[%s13004_s22 + $0x80] sm:$0xff] %v9362_v20  ;;  %9375 = vtanh.f32 %v7118_v37 }
0x1349   :  { %v9366_v0 = vpop.eup %9365  ;;  %8206 = vst [vmem:[%s13004_s22 + $0x88] sm:$0xff] %v9364_v62 }
0x134a   :  { %v9368_v55 = vpop.eup %9367  ;;  %8207 = vst [vmem:[%s13004_s22 + $0x90] sm:$0xff] %v9366_v0 }
0x134b   :  { %8208 = vst [vmem:[%s13004_s22 + $0x98] sm:$0xff] %v9368_v55 }
0x134c   :  { %v7122_v12 = vpop.f32.mrb[96].mxu0 }
0x134d   :  { %9377 = vtanh.f32 %v7122_v12  ;;  %v7124_v21 = vpop.f32.mrb[97].mxu0 }
0x134e   :  { %9379 = vtanh.f32 %v7124_v21  ;;  %v7126_v36 = vpop.f32.mrb[98].mxu0 }
0x134f   :  { %v9370_v26 = vpop.eup %9369  ;;  %9381 = vtanh.f32 %v7126_v36  ;;  %v7128_v32 = vpop.f32.mrb[99].mxu0 }
0x1350   :  { %v9372_v35 = vpop.eup %9371  ;;  %8209 = vst [vmem:[%s13004_s22 + $0xa0] sm:$0xff] %v9370_v26  ;;  %9383 = vtanh.f32 %v7128_v32 }
0x1351   :  { %v9374_v59 = vpop.eup %9373  ;;  %8210 = vst [vmem:[%s13004_s22 + $0xa8] sm:$0xff] %v9372_v35 }
0x1352   :  { %v9376_v13 = vpop.eup %9375  ;;  %8211 = vst [vmem:[%s13004_s22 + $0xb0] sm:$0xff] %v9374_v59 }
0x1353   :  { %8212 = vst [vmem:[%s13004_s22 + $0xb8] sm:$0xff] %v9376_v13 }
0x1354   :  { %v7132_v34 = vpop.f32.mrb[100].mxu0 }
0x1355   :  { %9385 = vtanh.f32 %v7132_v34  ;;  %v7134_v33 = vpop.f32.mrb[101].mxu0 }
0x1356   :  { %9387 = vtanh.f32 %v7134_v33  ;;  %v7136_v17 = vpop.f32.mrb[102].mxu0 }
0x1357   :  { %v9378_v52 = vpop.eup %9377  ;;  %9389 = vtanh.f32 %v7136_v17  ;;  %v7138_v18 = vpop.f32.mrb[103].mxu0 }
0x1358   :  { %v9380_v28 = vpop.eup %9379  ;;  %8213 = vst [vmem:[%s13004_s22 + $0xc0] sm:$0xff] %v9378_v52  ;;  %9391 = vtanh.f32 %v7138_v18 }
0x1359   :  { %v9382_v44 = vpop.eup %9381  ;;  %8214 = vst [vmem:[%s13004_s22 + $0xc8] sm:$0xff] %v9380_v28 }
0x135a   :  { %v9384_v45 = vpop.eup %9383  ;;  %8215 = vst [vmem:[%s13004_s22 + $0xd0] sm:$0xff] %v9382_v44 }
0x135b   :  { %8216 = vst [vmem:[%s13004_s22 + $0xd8] sm:$0xff] %v9384_v45 }
0x135f   :  { %v9386_v2 = vpop.eup %9385 }
0x1360   :  { %v9388_v22 = vpop.eup %9387  ;;  %8217 = vst [vmem:[%s13004_s22 + $0xe0] sm:$0xff] %v9386_v2 }
0x1361   :  { %v9390_v5 = vpop.eup %9389  ;;  %8218 = vst [vmem:[%s13004_s22 + $0xe8] sm:$0xff] %v9388_v22 }
0x1362   :  { %v9392_v11 = vpop.eup %9391  ;;  %8219 = vst [vmem:[%s13004_s22 + $0xf0] sm:$0xff] %v9390_v5 }
0x1363   :  { %8220 = vst [vmem:[%s13004_s22 + $0xf8] sm:$0xff] %v9392_v11 }

</bundles_post_ra>
